<compile_context>
chip_gen: v7x
topology: tpu7x:2x2x1
jax: 0.10.0
libtpu: 0.0.40
codegen_flags: <defaults>
</compile_context>

<pallas_src>
import math

import jax
import jax.numpy as jnp
import numpy as np
from jax.experimental import pallas as pl
from jax.experimental.pallas import tpu as pltpu


# ----------------------------------------------------------------------------
# Fused Pallas kernel: 5 x LSTM layer + FC head, everything VMEM-resident.
# ----------------------------------------------------------------------------
def _make_fused_kernel(num_layers: int, T: int, B: int, H: int):
    """Refs (in order):
       x_ref (T*B, E) bf16,
       [w_ih_T (in,4H) bf16, w_hh_T (H,4H) bf16, bias (1,4H) f32] * num_layers,
       fc_wT (H, Cpad) bf16, fc_b (1, Cpad) f32,
       pre (1,4H) f32, scale (1,4H) f32, off (1,4H) f32,
       out_ref (B, Cpad) f32,
       hseq_a (T*B, H) f32 scratch, hseq_b (T*B, H) f32 scratch
    Gate order inside the kernel is [f | i | o | g] (re-ordered in wrapper).
    """
    GH = 4 * H

    def kernel(*refs):
        x_ref = refs[0]
        layer_refs = refs[1:1 + 3 * num_layers]
        fc_w_ref = refs[1 + 3 * num_layers]
        fc_b_ref = refs[2 + 3 * num_layers]
        pre_ref = refs[3 + 3 * num_layers]
        scale_ref = refs[4 + 3 * num_layers]
        off_ref = refs[5 + 3 * num_layers]
        out_ref = refs[6 + 3 * num_layers]
        hseq = [refs[7 + 3 * num_layers], refs[8 + 3 * num_layers]]

        # Hoisted full-width constants (one vreg each; not re-broadcast per step).
        pre = jnp.broadcast_to(pre_ref[...], (B, GH))
        scale = jnp.broadcast_to(scale_ref[...], (B, GH))
        off = jnp.broadcast_to(off_ref[...], (B, GH))
        lane = jax.lax.broadcasted_iota(jnp.int32, (B, GH), 1)
        blk0 = lane < H                                   # lane block 0 mask

        h = None
        for layer in range(num_layers):
            w_ih_t = layer_refs[3 * layer][...]           # (in, 4H) bf16
            w_hh_t = layer_refs[3 * layer + 1][...]       # (H, 4H)  bf16
            bias = layer_refs[3 * layer + 2][...]         # (1, 4H)  f32

            if layer == 0:
                xin = x_ref[...]                          # (T*B, E) bf16
            else:
                xin = hseq[(layer - 1) & 1][...].astype(jnp.bfloat16)  # (T*B, H)

            # Hoisted input projection: all T timesteps in one MXU matmul.
            proj = jnp.dot(xin, w_ih_t,
                           preferred_element_type=jnp.float32) + bias  # (T*B,4H)

            c_state = jnp.zeros((B, GH), jnp.float32)     # block 0 holds c
            h_bf = jnp.zeros((B, H), jnp.bfloat16)
            write_seq = layer < num_layers - 1
            for t in range(T):                            # fully unrolled (T static)
                gates = proj[t * B:(t + 1) * B, :] + jnp.dot(
                    h_bf, w_hh_t, preferred_element_type=jnp.float32)  # (B,4H)
                # Single full-width tanh: sigmoid(x)=0.5*tanh(x/2)+0.5 on f/i/o
                # lanes, plain tanh on g lanes.  acts = [F | I | O | G].
                acts = scale * jnp.tanh(pre * gates) + off
                rot2 = pltpu.roll(acts, shift=2 * H, axis=1)   # [O | G | F | I]
                oper = jnp.where(blk0, c_state, rot2)          # [c | G | F | I]
                m = acts * oper                                # [F*c | I*G | O*F | G*I]
                # blocks 1 and 3 of m are both I*G, so either roll direction
                # folds the i*g term onto block 0:
                s = m + pltpu.roll(m, shift=H, axis=1)         # block0 = F*c + I*G
                c_state = s                                    # only block 0 is live
                h = rot2[:, :H] * jnp.tanh(s[:, :H])           # o * tanh(c_new)
                h_bf = h.astype(jnp.bfloat16)
                if write_seq:
                    hseq[layer & 1][t * B:(t + 1) * B, :] = h

        out = jnp.dot(h_bf, fc_w_ref[...],
                      preferred_element_type=jnp.float32) + fc_b_ref[...]
        out_ref[...] = out.astype(out_ref.dtype)          # (B, Cpad) lane-dense store

    return kernel


# ----------------------------------------------------------------------------
# Wrapper: layout prep (transpose / gate reorder / cast / pad) + one pallas_call
# ----------------------------------------------------------------------------
def lstm_classifier_forward(x_bte, params):
    """Forward pass matching LSTMClassifier.forward.

    x_bte: (B, T, E) float32 (PyTorch batch_first layout)
    returns (B, num_classes) float32
    """
    B, T, E = x_bte.shape
    num_layers = len(params["lstm"])
    H = params["lstm"][0]["w_hh"].shape[1]
    C = params["fc_w"].shape[0]

    SUB, LANE = 8, 128
    B_pad = ((B + SUB - 1) // SUB) * SUB          # full sublanes
    C_pad = ((C + LANE - 1) // LANE) * LANE       # lane-dense FC output
    GH = 4 * H

    # batch_first (B,T,E) -> time-major 2D (T*B_pad, E), bf16 for the MXU.
    x = jnp.transpose(x_bte, (1, 0, 2))
    x = jnp.pad(x, ((0, 0), (0, B_pad - B), (0, 0)))
    x2d = x.reshape(T * B_pad, E).astype(jnp.bfloat16)

    # Reorder gate columns: PyTorch [i | f | g | o]  ->  kernel [f | i | o | g].
    def reorder(arr_4h_last):
        i, f, g, o = jnp.split(arr_4h_last, 4, axis=-1)
        return jnp.concatenate([f, i, o, g], axis=-1)

    flat = []
    for layer in params["lstm"]:
        flat.append(reorder(jnp.transpose(layer["w_ih"])).astype(jnp.bfloat16))  # (in,4H)
        flat.append(reorder(jnp.transpose(layer["w_hh"])).astype(jnp.bfloat16))  # (H,4H)
        flat.append(reorder(layer["bias"]).astype(jnp.float32))                  # (1,4H)

    fc_wT = jnp.transpose(params["fc_w"]).astype(jnp.bfloat16)                   # (H,C)
    fc_wT = jnp.pad(fc_wT, ((0, 0), (0, C_pad - C)))                             # (H,Cpad)
    fc_b = jnp.pad(params["fc_b"].astype(jnp.float32),
                   ((0, 0), (0, C_pad - C)))                                     # (1,Cpad)

    # Lane constants for the single-tanh gate nonlinearity (kernel gate order:
    # f,i,o sigmoid -> 0.5/0.5/0.5 ; g tanh -> 1.0/1.0/0.0).
    sig = jnp.ones((1, 3 * H), jnp.float32)
    one = jnp.ones((1, H), jnp.float32)
    pre = jnp.concatenate([0.5 * sig, one], axis=1)          # pre-scale
    scale = jnp.concatenate([0.5 * sig, one], axis=1)        # post-scale
    off = jnp.concatenate([0.5 * sig, 0.0 * one], axis=1)    # post-offset

    kernel = _make_fused_kernel(num_layers, T, B_pad, H)
    n_in = 1 + 3 * num_layers + 2 + 3
    out_pad = pl.pallas_call(
        kernel,
        out_shape=jax.ShapeDtypeStruct((B_pad, C_pad), jnp.float32),
        in_specs=[pl.BlockSpec(memory_space=pltpu.MemorySpace.VMEM)] * n_in,
        out_specs=pl.BlockSpec(memory_space=pltpu.MemorySpace.VMEM),
        scratch_shapes=[pltpu.VMEM((T * B_pad, H), jnp.float32),
                        pltpu.VMEM((T * B_pad, H), jnp.float32)],
    )(x2d, *flat, fc_wT, fc_b, pre, scale, off)

    return out_pad[:B, :C]


# ----------------------------------------------------------------------------
# Deterministic parameter init (PyTorch-style U(-1/sqrt(H), 1/sqrt(H)))
# ----------------------------------------------------------------------------
def init_params(key, embedding_len, num_classes, hidden_size, num_layers):
    params = {"lstm": []}
    bound = 1.0 / math.sqrt(hidden_size)
    for layer in range(num_layers):
        in_sz = embedding_len if layer == 0 else hidden_size
        key, k1, k2, k3, k4 = jax.random.split(key, 5)
        w_ih = jax.random.uniform(k1, (4 * hidden_size, in_sz),
                                  jnp.float32, -bound, bound)
        w_hh = jax.random.uniform(k2, (4 * hidden_size, hidden_size),
                                  jnp.float32, -bound, bound)
        b_ih = jax.random.uniform(k3, (4 * hidden_size,),
                                  jnp.float32, -bound, bound)
        b_hh = jax.random.uniform(k4, (4 * hidden_size,),
                                  jnp.float32, -bound, bound)
        params["lstm"].append({
            "w_ih": w_ih,
            "w_hh": w_hh,
            "bias": (b_ih + b_hh).reshape(1, -1),   # nn.LSTM: b_ih + b_hh
        })
    fc_bound = 1.0 / math.sqrt(hidden_size)
    key, k1, k2 = jax.random.split(key, 3)
    params["fc_w"] = jax.random.uniform(k1, (num_classes, hidden_size),
                                        jnp.float32, -fc_bound, fc_bound)
    params["fc_b"] = jax.random.uniform(k2, (num_classes,),
                                        jnp.float32, -fc_bound, fc_bound
                                        ).reshape(1, -1)
    return params


# ----------------------------------------------------------------------------
# Pure-JAX reference (numerical sanity check, PyTorch gate order)
# ----------------------------------------------------------------------------
def reference_forward(x_bte, params):
    x = x_bte  # (B, T, E)
    B, T, _ = x.shape
    for layer in params["lstm"]:
        H = layer["w_hh"].shape[1]
        h = jnp.zeros((B, H), jnp.float32)
        c = jnp.zeros((B, H), jnp.float32)
        outs = []
        for t in range(T):
            gates = (x[:, t, :] @ layer["w_ih"].T
                     + h @ layer["w_hh"].T
                     + layer["bias"])
            i_g = jax.nn.sigmoid(gates[:, 0 * H:1 * H])
            f_g = jax.nn.sigmoid(gates[:, 1 * H:2 * H])
            g_g = jnp.tanh(gates[:, 2 * H:3 * H])
            o_g = jax.nn.sigmoid(gates[:, 3 * H:4 * H])
            c = f_g * c + i_g * g_g
            h = o_g * jnp.tanh(c)
            outs.append(h)
        x = jnp.stack(outs, axis=1)  # (B, T, H)
    return x[:, -1, :] @ params["fc_w"].T + params["fc_b"]


# ----------------------------------------------------------------------------
if __name__ == "__main__":
    # Small shapes consistent with the module's forward: input (B, T, E).
    batch, seq, embedding_len = 2, 8, 16
    hidden_size, num_layers, num_classes = 32, 5, 4
    # TODO(synk): dropout / bidirectional nn.LSTM variants not implemented
    # (module defaults are dropout=0.0, bidirectional=False).

    key = jax.random.PRNGKey(0)
    key, kx, kp = jax.random.split(key, 3)
    x = jax.random.normal(kx, (batch, seq, embedding_len), jnp.float32)
    params = init_params(kp, embedding_len, num_classes, hidden_size, num_layers)

    fwd = jax.jit(lstm_classifier_forward)
    out = fwd(x, params)
    out = jax.block_until_ready(out)
    assert out.shape == (batch, num_classes)

    ref = reference_forward(x, params)
    np.testing.assert_allclose(np.asarray(out), np.asarray(ref),
                               rtol=2e-2, atol=2e-2)

    print("KERNEL_OK")
</pallas_src>

<mosaic_0001>
module attributes {stable_mosaic.version = 11 : i64} {
  func.func @kernel(%arg0: memref<64x16xbf16, #tpu.memory_space<vmem>>, %arg1: memref<16x128xbf16, #tpu.memory_space<vmem>>, %arg2: memref<32x128xbf16, #tpu.memory_space<vmem>>, %arg3: memref<1x128xf32, #tpu.memory_space<vmem>>, %arg4: memref<32x128xbf16, #tpu.memory_space<vmem>>, %arg5: memref<32x128xbf16, #tpu.memory_space<vmem>>, %arg6: memref<1x128xf32, #tpu.memory_space<vmem>>, %arg7: memref<32x128xbf16, #tpu.memory_space<vmem>>, %arg8: memref<32x128xbf16, #tpu.memory_space<vmem>>, %arg9: memref<1x128xf32, #tpu.memory_space<vmem>>, %arg10: memref<32x128xbf16, #tpu.memory_space<vmem>>, %arg11: memref<32x128xbf16, #tpu.memory_space<vmem>>, %arg12: memref<1x128xf32, #tpu.memory_space<vmem>>, %arg13: memref<32x128xbf16, #tpu.memory_space<vmem>>, %arg14: memref<32x128xbf16, #tpu.memory_space<vmem>>, %arg15: memref<1x128xf32, #tpu.memory_space<vmem>>, %arg16: memref<32x128xbf16, #tpu.memory_space<vmem>>, %arg17: memref<1x128xf32, #tpu.memory_space<vmem>>, %arg18: memref<1x128xf32, #tpu.memory_space<vmem>>, %arg19: memref<1x128xf32, #tpu.memory_space<vmem>>, %arg20: memref<1x128xf32, #tpu.memory_space<vmem>>, %arg21: memref<8x128xf32, #tpu.memory_space<vmem>>, %arg22: memref<64x32xf32, #tpu.memory_space<vmem>>, %arg23: memref<64x32xf32, #tpu.memory_space<vmem>>) attributes {dimension_semantics = [], scalar_prefetch = 0 : i64, scratch_operands = 2 : i64, tpu.core_type = #tpu.core_type<tc>} {
    %c0 = arith.constant 0 : index
    %c0_0 = arith.constant 0 : index
    %0 = vector.load %arg18[%c0, %c0_0] : memref<1x128xf32, #tpu.memory_space<vmem>>, vector<1x128xf32>
    %1 = vector.shape_cast %0 : vector<1x128xf32> to vector<1x128xf32>
    %2 = vector.broadcast %1 : vector<1x128xf32> to vector<8x128xf32>
    %c0_1 = arith.constant 0 : index
    %c0_2 = arith.constant 0 : index
    %3 = vector.load %arg19[%c0_1, %c0_2] : memref<1x128xf32, #tpu.memory_space<vmem>>, vector<1x128xf32>
    %4 = vector.shape_cast %3 : vector<1x128xf32> to vector<1x128xf32>
    %5 = vector.broadcast %4 : vector<1x128xf32> to vector<8x128xf32>
    %c0_3 = arith.constant 0 : index
    %c0_4 = arith.constant 0 : index
    %6 = vector.load %arg20[%c0_3, %c0_4] : memref<1x128xf32, #tpu.memory_space<vmem>>, vector<1x128xf32>
    %7 = vector.shape_cast %6 : vector<1x128xf32> to vector<1x128xf32>
    %8 = vector.broadcast %7 : vector<1x128xf32> to vector<8x128xf32>
    %9 = tpu.iota {dimensions = array<i32: 1>} : vector<8x128xi32>
    %c32_i32 = arith.constant 32 : i32
    %10 = vector.broadcast %c32_i32 : i32 to vector<8x128xi32>
    %11 = arith.cmpi slt, %9, %10 : vector<8x128xi32>
    %c0_5 = arith.constant 0 : index
    %c0_6 = arith.constant 0 : index
    %12 = vector.load %arg1[%c0_5, %c0_6] : memref<16x128xbf16, #tpu.memory_space<vmem>>, vector<16x128xbf16>
    %c0_7 = arith.constant 0 : index
    %c0_8 = arith.constant 0 : index
    %13 = vector.load %arg2[%c0_7, %c0_8] : memref<32x128xbf16, #tpu.memory_space<vmem>>, vector<32x128xbf16>
    %c0_9 = arith.constant 0 : index
    %c0_10 = arith.constant 0 : index
    %14 = vector.load %arg3[%c0_9, %c0_10] : memref<1x128xf32, #tpu.memory_space<vmem>>, vector<1x128xf32>
    %c0_11 = arith.constant 0 : index
    %c0_12 = arith.constant 0 : index
    %15 = vector.load %arg0[%c0_11, %c0_12] : memref<64x16xbf16, #tpu.memory_space<vmem>>, vector<64x16xbf16>
    %cst = arith.constant dense<0.000000e+00> : vector<64x128xf32>
    %16 = tpu.matmul %15, %12, %cst {dimension_numbers = #tpu.dot_dimension_numbers<[1], [0], [0], [1], [0, 0, 1, 1], [], []>} : vector<64x16xbf16>, vector<16x128xbf16>, vector<64x128xf32> -> vector<64x128xf32>
    %17 = vector.broadcast %14 : vector<1x128xf32> to vector<64x128xf32>
    %18 = arith.addf %16, %17 : vector<64x128xf32>
    %cst_13 = arith.constant 0.000000e+00 : f32
    %19 = vector.broadcast %cst_13 : f32 to vector<8x128xf32>
    %cst_14 = arith.constant 0.000000e+00 : bf16
    %20 = vector.broadcast %cst_14 : bf16 to vector<8x32xbf16>
    %21 = vector.extract_strided_slice %18 {offsets = [0, 0], sizes = [8, 128], strides = [1, 1]} : vector<64x128xf32> to vector<8x128xf32>
    %cst_15 = arith.constant dense<0.000000e+00> : vector<8x128xf32>
    %22 = tpu.matmul %20, %13, %cst_15 {dimension_numbers = #tpu.dot_dimension_numbers<[1], [0], [0], [1], [0, 0, 1, 1], [], []>} : vector<8x32xbf16>, vector<32x128xbf16>, vector<8x128xf32> -> vector<8x128xf32>
    %23 = arith.addf %21, %22 : vector<8x128xf32>
    %24 = arith.mulf %2, %23 : vector<8x128xf32>
    %25 = math.tanh %24 : vector<8x128xf32>
    %26 = arith.mulf %5, %25 : vector<8x128xf32>
    %27 = arith.addf %26, %8 : vector<8x128xf32>
    %c64_i32 = arith.constant 64 : i32
    %28 = tpu.dynamic_rotate %27 by %c64_i32 dim 1 : vector<8x128xf32>, i32 -> vector<8x128xf32>
    %29 = arith.select %11, %19, %28 : vector<8x128xi1>, vector<8x128xf32>
    %30 = arith.mulf %27, %29 : vector<8x128xf32>
    %c32_i32_16 = arith.constant 32 : i32
    %31 = tpu.dynamic_rotate %30 by %c32_i32_16 dim 1 : vector<8x128xf32>, i32 -> vector<8x128xf32>
    %32 = arith.addf %30, %31 : vector<8x128xf32>
    %33 = vector.extract_strided_slice %28 {offsets = [0, 0], sizes = [8, 32], strides = [1, 1]} : vector<8x128xf32> to vector<8x32xf32>
    %34 = vector.extract_strided_slice %32 {offsets = [0, 0], sizes = [8, 32], strides = [1, 1]} : vector<8x128xf32> to vector<8x32xf32>
    %35 = math.tanh %34 : vector<8x32xf32>
    %36 = arith.mulf %33, %35 : vector<8x32xf32>
    %37 = arith.truncf %36 : vector<8x32xf32> to vector<8x32xbf16>
    %c0_17 = arith.constant 0 : index
    %c0_18 = arith.constant 0 : index
    %38 = vector.load %arg22[%c0_17, %c0_18] : memref<64x32xf32, #tpu.memory_space<vmem>>, vector<8x32xf32>
    tpu.vector_store %arg22[%c0_17, %c0_18], %36 {strides = array<i32>} : memref<64x32xf32, #tpu.memory_space<vmem>>, vector<8x32xf32>,
    %39 = vector.extract_strided_slice %18 {offsets = [8, 0], sizes = [8, 128], strides = [1, 1]} : vector<64x128xf32> to vector<8x128xf32>
    %cst_19 = arith.constant dense<0.000000e+00> : vector<8x128xf32>
    %40 = tpu.matmul %37, %13, %cst_19 {dimension_numbers = #tpu.dot_dimension_numbers<[1], [0], [0], [1], [0, 0, 1, 1], [], []>} : vector<8x32xbf16>, vector<32x128xbf16>, vector<8x128xf32> -> vector<8x128xf32>
    %41 = arith.addf %39, %40 : vector<8x128xf32>
    %42 = arith.mulf %2, %41 : vector<8x128xf32>
    %43 = math.tanh %42 : vector<8x128xf32>
    %44 = arith.mulf %5, %43 : vector<8x128xf32>
    %45 = arith.addf %44, %8 : vector<8x128xf32>
    %c64_i32_20 = arith.constant 64 : i32
    %46 = tpu.dynamic_rotate %45 by %c64_i32_20 dim 1 : vector<8x128xf32>, i32 -> vector<8x128xf32>
    %47 = arith.select %11, %32, %46 : vector<8x128xi1>, vector<8x128xf32>
    %48 = arith.mulf %45, %47 : vector<8x128xf32>
    %c32_i32_21 = arith.constant 32 : i32
    %49 = tpu.dynamic_rotate %48 by %c32_i32_21 dim 1 : vector<8x128xf32>, i32 -> vector<8x128xf32>
    %50 = arith.addf %48, %49 : vector<8x128xf32>
    %51 = vector.extract_strided_slice %46 {offsets = [0, 0], sizes = [8, 32], strides = [1, 1]} : vector<8x128xf32> to vector<8x32xf32>
    %52 = vector.extract_strided_slice %50 {offsets = [0, 0], sizes = [8, 32], strides = [1, 1]} : vector<8x128xf32> to vector<8x32xf32>
    %53 = math.tanh %52 : vector<8x32xf32>
    %54 = arith.mulf %51, %53 : vector<8x32xf32>
    %55 = arith.truncf %54 : vector<8x32xf32> to vector<8x32xbf16>
    %c8 = arith.constant 8 : index
    %c0_22 = arith.constant 0 : index
    %56 = vector.load %arg22[%c8, %c0_22] : memref<64x32xf32, #tpu.memory_space<vmem>>, vector<8x32xf32>
    tpu.vector_store %arg22[%c8, %c0_22], %54 {strides = array<i32>} : memref<64x32xf32, #tpu.memory_space<vmem>>, vector<8x32xf32>,
    %57 = vector.extract_strided_slice %18 {offsets = [16, 0], sizes = [8, 128], strides = [1, 1]} : vector<64x128xf32> to vector<8x128xf32>
    %cst_23 = arith.constant dense<0.000000e+00> : vector<8x128xf32>
    %58 = tpu.matmul %55, %13, %cst_23 {dimension_numbers = #tpu.dot_dimension_numbers<[1], [0], [0], [1], [0, 0, 1, 1], [], []>} : vector<8x32xbf16>, vector<32x128xbf16>, vector<8x128xf32> -> vector<8x128xf32>
    %59 = arith.addf %57, %58 : vector<8x128xf32>
    %60 = arith.mulf %2, %59 : vector<8x128xf32>
    %61 = math.tanh %60 : vector<8x128xf32>
    %62 = arith.mulf %5, %61 : vector<8x128xf32>
    %63 = arith.addf %62, %8 : vector<8x128xf32>
    %c64_i32_24 = arith.constant 64 : i32
    %64 = tpu.dynamic_rotate %63 by %c64_i32_24 dim 1 : vector<8x128xf32>, i32 -> vector<8x128xf32>
    %65 = arith.select %11, %50, %64 : vector<8x128xi1>, vector<8x128xf32>
    %66 = arith.mulf %63, %65 : vector<8x128xf32>
    %c32_i32_25 = arith.constant 32 : i32
    %67 = tpu.dynamic_rotate %66 by %c32_i32_25 dim 1 : vector<8x128xf32>, i32 -> vector<8x128xf32>
    %68 = arith.addf %66, %67 : vector<8x128xf32>
    %69 = vector.extract_strided_slice %64 {offsets = [0, 0], sizes = [8, 32], strides = [1, 1]} : vector<8x128xf32> to vector<8x32xf32>
    %70 = vector.extract_strided_slice %68 {offsets = [0, 0], sizes = [8, 32], strides = [1, 1]} : vector<8x128xf32> to vector<8x32xf32>
    %71 = math.tanh %70 : vector<8x32xf32>
    %72 = arith.mulf %69, %71 : vector<8x32xf32>
    %73 = arith.truncf %72 : vector<8x32xf32> to vector<8x32xbf16>
    %c16 = arith.constant 16 : index
    %c0_26 = arith.constant 0 : index
    %74 = vector.load %arg22[%c16, %c0_26] : memref<64x32xf32, #tpu.memory_space<vmem>>, vector<8x32xf32>
    tpu.vector_store %arg22[%c16, %c0_26], %72 {strides = array<i32>} : memref<64x32xf32, #tpu.memory_space<vmem>>, vector<8x32xf32>,
    %75 = vector.extract_strided_slice %18 {offsets = [24, 0], sizes = [8, 128], strides = [1, 1]} : vector<64x128xf32> to vector<8x128xf32>
    %cst_27 = arith.constant dense<0.000000e+00> : vector<8x128xf32>
    %76 = tpu.matmul %73, %13, %cst_27 {dimension_numbers = #tpu.dot_dimension_numbers<[1], [0], [0], [1], [0, 0, 1, 1], [], []>} : vector<8x32xbf16>, vector<32x128xbf16>, vector<8x128xf32> -> vector<8x128xf32>
    %77 = arith.addf %75, %76 : vector<8x128xf32>
    %78 = arith.mulf %2, %77 : vector<8x128xf32>
    %79 = math.tanh %78 : vector<8x128xf32>
    %80 = arith.mulf %5, %79 : vector<8x128xf32>
    %81 = arith.addf %80, %8 : vector<8x128xf32>
    %c64_i32_28 = arith.constant 64 : i32
    %82 = tpu.dynamic_rotate %81 by %c64_i32_28 dim 1 : vector<8x128xf32>, i32 -> vector<8x128xf32>
    %83 = arith.select %11, %68, %82 : vector<8x128xi1>, vector<8x128xf32>
    %84 = arith.mulf %81, %83 : vector<8x128xf32>
    %c32_i32_29 = arith.constant 32 : i32
    %85 = tpu.dynamic_rotate %84 by %c32_i32_29 dim 1 : vector<8x128xf32>, i32 -> vector<8x128xf32>
    %86 = arith.addf %84, %85 : vector<8x128xf32>
    %87 = vector.extract_strided_slice %82 {offsets = [0, 0], sizes = [8, 32], strides = [1, 1]} : vector<8x128xf32> to vector<8x32xf32>
    %88 = vector.extract_strided_slice %86 {offsets = [0, 0], sizes = [8, 32], strides = [1, 1]} : vector<8x128xf32> to vector<8x32xf32>
    %89 = math.tanh %88 : vector<8x32xf32>
    %90 = arith.mulf %87, %89 : vector<8x32xf32>
    %91 = arith.truncf %90 : vector<8x32xf32> to vector<8x32xbf16>
    %c24 = arith.constant 24 : index
    %c0_30 = arith.constant 0 : index
    %92 = vector.load %arg22[%c24, %c0_30] : memref<64x32xf32, #tpu.memory_space<vmem>>, vector<8x32xf32>
    tpu.vector_store %arg22[%c24, %c0_30], %90 {strides = array<i32>} : memref<64x32xf32, #tpu.memory_space<vmem>>, vector<8x32xf32>,
    %93 = vector.extract_strided_slice %18 {offsets = [32, 0], sizes = [8, 128], strides = [1, 1]} : vector<64x128xf32> to vector<8x128xf32>
    %cst_31 = arith.constant dense<0.000000e+00> : vector<8x128xf32>
    %94 = tpu.matmul %91, %13, %cst_31 {dimension_numbers = #tpu.dot_dimension_numbers<[1], [0], [0], [1], [0, 0, 1, 1], [], []>} : vector<8x32xbf16>, vector<32x128xbf16>, vector<8x128xf32> -> vector<8x128xf32>
    %95 = arith.addf %93, %94 : vector<8x128xf32>
    %96 = arith.mulf %2, %95 : vector<8x128xf32>
    %97 = math.tanh %96 : vector<8x128xf32>
    %98 = arith.mulf %5, %97 : vector<8x128xf32>
    %99 = arith.addf %98, %8 : vector<8x128xf32>
    %c64_i32_32 = arith.constant 64 : i32
    %100 = tpu.dynamic_rotate %99 by %c64_i32_32 dim 1 : vector<8x128xf32>, i32 -> vector<8x128xf32>
    %101 = arith.select %11, %86, %100 : vector<8x128xi1>, vector<8x128xf32>
    %102 = arith.mulf %99, %101 : vector<8x128xf32>
    %c32_i32_33 = arith.constant 32 : i32
    %103 = tpu.dynamic_rotate %102 by %c32_i32_33 dim 1 : vector<8x128xf32>, i32 -> vector<8x128xf32>
    %104 = arith.addf %102, %103 : vector<8x128xf32>
    %105 = vector.extract_strided_slice %100 {offsets = [0, 0], sizes = [8, 32], strides = [1, 1]} : vector<8x128xf32> to vector<8x32xf32>
    %106 = vector.extract_strided_slice %104 {offsets = [0, 0], sizes = [8, 32], strides = [1, 1]} : vector<8x128xf32> to vector<8x32xf32>
    %107 = math.tanh %106 : vector<8x32xf32>
    %108 = arith.mulf %105, %107 : vector<8x32xf32>
    %109 = arith.truncf %108 : vector<8x32xf32> to vector<8x32xbf16>
    %c32 = arith.constant 32 : index
    %c0_34 = arith.constant 0 : index
    %110 = vector.load %arg22[%c32, %c0_34] : memref<64x32xf32, #tpu.memory_space<vmem>>, vector<8x32xf32>
    tpu.vector_store %arg22[%c32, %c0_34], %108 {strides = array<i32>} : memref<64x32xf32, #tpu.memory_space<vmem>>, vector<8x32xf32>,
    %111 = vector.extract_strided_slice %18 {offsets = [40, 0], sizes = [8, 128], strides = [1, 1]} : vector<64x128xf32> to vector<8x128xf32>
    %cst_35 = arith.constant dense<0.000000e+00> : vector<8x128xf32>
    %112 = tpu.matmul %109, %13, %cst_35 {dimension_numbers = #tpu.dot_dimension_numbers<[1], [0], [0], [1], [0, 0, 1, 1], [], []>} : vector<8x32xbf16>, vector<32x128xbf16>, vector<8x128xf32> -> vector<8x128xf32>
    %113 = arith.addf %111, %112 : vector<8x128xf32>
    %114 = arith.mulf %2, %113 : vector<8x128xf32>
    %115 = math.tanh %114 : vector<8x128xf32>
    %116 = arith.mulf %5, %115 : vector<8x128xf32>
    %117 = arith.addf %116, %8 : vector<8x128xf32>
    %c64_i32_36 = arith.constant 64 : i32
    %118 = tpu.dynamic_rotate %117 by %c64_i32_36 dim 1 : vector<8x128xf32>, i32 -> vector<8x128xf32>
    %119 = arith.select %11, %104, %118 : vector<8x128xi1>, vector<8x128xf32>
    %120 = arith.mulf %117, %119 : vector<8x128xf32>
    %c32_i32_37 = arith.constant 32 : i32
    %121 = tpu.dynamic_rotate %120 by %c32_i32_37 dim 1 : vector<8x128xf32>, i32 -> vector<8x128xf32>
    %122 = arith.addf %120, %121 : vector<8x128xf32>
    %123 = vector.extract_strided_slice %118 {offsets = [0, 0], sizes = [8, 32], strides = [1, 1]} : vector<8x128xf32> to vector<8x32xf32>
    %124 = vector.extract_strided_slice %122 {offsets = [0, 0], sizes = [8, 32], strides = [1, 1]} : vector<8x128xf32> to vector<8x32xf32>
    %125 = math.tanh %124 : vector<8x32xf32>
    %126 = arith.mulf %123, %125 : vector<8x32xf32>
    %127 = arith.truncf %126 : vector<8x32xf32> to vector<8x32xbf16>
    %c40 = arith.constant 40 : index
    %c0_38 = arith.constant 0 : index
    %128 = vector.load %arg22[%c40, %c0_38] : memref<64x32xf32, #tpu.memory_space<vmem>>, vector<8x32xf32>
    tpu.vector_store %arg22[%c40, %c0_38], %126 {strides = array<i32>} : memref<64x32xf32, #tpu.memory_space<vmem>>, vector<8x32xf32>,
    %129 = vector.extract_strided_slice %18 {offsets = [48, 0], sizes = [8, 128], strides = [1, 1]} : vector<64x128xf32> to vector<8x128xf32>
    %cst_39 = arith.constant dense<0.000000e+00> : vector<8x128xf32>
    %130 = tpu.matmul %127, %13, %cst_39 {dimension_numbers = #tpu.dot_dimension_numbers<[1], [0], [0], [1], [0, 0, 1, 1], [], []>} : vector<8x32xbf16>, vector<32x128xbf16>, vector<8x128xf32> -> vector<8x128xf32>
    %131 = arith.addf %129, %130 : vector<8x128xf32>
    %132 = arith.mulf %2, %131 : vector<8x128xf32>
    %133 = math.tanh %132 : vector<8x128xf32>
    %134 = arith.mulf %5, %133 : vector<8x128xf32>
    %135 = arith.addf %134, %8 : vector<8x128xf32>
    %c64_i32_40 = arith.constant 64 : i32
    %136 = tpu.dynamic_rotate %135 by %c64_i32_40 dim 1 : vector<8x128xf32>, i32 -> vector<8x128xf32>
    %137 = arith.select %11, %122, %136 : vector<8x128xi1>, vector<8x128xf32>
    %138 = arith.mulf %135, %137 : vector<8x128xf32>
    %c32_i32_41 = arith.constant 32 : i32
    %139 = tpu.dynamic_rotate %138 by %c32_i32_41 dim 1 : vector<8x128xf32>, i32 -> vector<8x128xf32>
    %140 = arith.addf %138, %139 : vector<8x128xf32>
    %141 = vector.extract_strided_slice %136 {offsets = [0, 0], sizes = [8, 32], strides = [1, 1]} : vector<8x128xf32> to vector<8x32xf32>
    %142 = vector.extract_strided_slice %140 {offsets = [0, 0], sizes = [8, 32], strides = [1, 1]} : vector<8x128xf32> to vector<8x32xf32>
    %143 = math.tanh %142 : vector<8x32xf32>
    %144 = arith.mulf %141, %143 : vector<8x32xf32>
    %145 = arith.truncf %144 : vector<8x32xf32> to vector<8x32xbf16>
    %c48 = arith.constant 48 : index
    %c0_42 = arith.constant 0 : index
    %146 = vector.load %arg22[%c48, %c0_42] : memref<64x32xf32, #tpu.memory_space<vmem>>, vector<8x32xf32>
    tpu.vector_store %arg22[%c48, %c0_42], %144 {strides = array<i32>} : memref<64x32xf32, #tpu.memory_space<vmem>>, vector<8x32xf32>,
    %147 = vector.extract_strided_slice %18 {offsets = [56, 0], sizes = [8, 128], strides = [1, 1]} : vector<64x128xf32> to vector<8x128xf32>
    %cst_43 = arith.constant dense<0.000000e+00> : vector<8x128xf32>
    %148 = tpu.matmul %145, %13, %cst_43 {dimension_numbers = #tpu.dot_dimension_numbers<[1], [0], [0], [1], [0, 0, 1, 1], [], []>} : vector<8x32xbf16>, vector<32x128xbf16>, vector<8x128xf32> -> vector<8x128xf32>
    %149 = arith.addf %147, %148 : vector<8x128xf32>
    %150 = arith.mulf %2, %149 : vector<8x128xf32>
    %151 = math.tanh %150 : vector<8x128xf32>
    %152 = arith.mulf %5, %151 : vector<8x128xf32>
    %153 = arith.addf %152, %8 : vector<8x128xf32>
    %c64_i32_44 = arith.constant 64 : i32
    %154 = tpu.dynamic_rotate %153 by %c64_i32_44 dim 1 : vector<8x128xf32>, i32 -> vector<8x128xf32>
    %155 = arith.select %11, %140, %154 : vector<8x128xi1>, vector<8x128xf32>
    %156 = arith.mulf %153, %155 : vector<8x128xf32>
    %c32_i32_45 = arith.constant 32 : i32
    %157 = tpu.dynamic_rotate %156 by %c32_i32_45 dim 1 : vector<8x128xf32>, i32 -> vector<8x128xf32>
    %158 = arith.addf %156, %157 : vector<8x128xf32>
    %159 = vector.extract_strided_slice %154 {offsets = [0, 0], sizes = [8, 32], strides = [1, 1]} : vector<8x128xf32> to vector<8x32xf32>
    %160 = vector.extract_strided_slice %158 {offsets = [0, 0], sizes = [8, 32], strides = [1, 1]} : vector<8x128xf32> to vector<8x32xf32>
    %161 = math.tanh %160 : vector<8x32xf32>
    %162 = arith.mulf %159, %161 : vector<8x32xf32>
    %c56 = arith.constant 56 : index
    %c0_46 = arith.constant 0 : index
    %163 = vector.load %arg22[%c56, %c0_46] : memref<64x32xf32, #tpu.memory_space<vmem>>, vector<8x32xf32>
    tpu.vector_store %arg22[%c56, %c0_46], %162 {strides = array<i32>} : memref<64x32xf32, #tpu.memory_space<vmem>>, vector<8x32xf32>,
    %c0_47 = arith.constant 0 : index
    %c0_48 = arith.constant 0 : index
    %164 = vector.load %arg4[%c0_47, %c0_48] : memref<32x128xbf16, #tpu.memory_space<vmem>>, vector<32x128xbf16>
    %c0_49 = arith.constant 0 : index
    %c0_50 = arith.constant 0 : index
    %165 = vector.load %arg5[%c0_49, %c0_50] : memref<32x128xbf16, #tpu.memory_space<vmem>>, vector<32x128xbf16>
    %c0_51 = arith.constant 0 : index
    %c0_52 = arith.constant 0 : index
    %166 = vector.load %arg6[%c0_51, %c0_52] : memref<1x128xf32, #tpu.memory_space<vmem>>, vector<1x128xf32>
    %c0_53 = arith.constant 0 : index
    %c0_54 = arith.constant 0 : index
    %167 = vector.load %arg22[%c0_53, %c0_54] : memref<64x32xf32, #tpu.memory_space<vmem>>, vector<64x32xf32>
    %168 = arith.truncf %167 : vector<64x32xf32> to vector<64x32xbf16>
    %cst_55 = arith.constant dense<0.000000e+00> : vector<64x128xf32>
    %169 = tpu.matmul %168, %164, %cst_55 {dimension_numbers = #tpu.dot_dimension_numbers<[1], [0], [0], [1], [0, 0, 1, 1], [], []>} : vector<64x32xbf16>, vector<32x128xbf16>, vector<64x128xf32> -> vector<64x128xf32>
    %170 = vector.broadcast %166 : vector<1x128xf32> to vector<64x128xf32>
    %171 = arith.addf %169, %170 : vector<64x128xf32>
    %cst_56 = arith.constant 0.000000e+00 : f32
    %172 = vector.broadcast %cst_56 : f32 to vector<8x128xf32>
    %cst_57 = arith.constant 0.000000e+00 : bf16
    %173 = vector.broadcast %cst_57 : bf16 to vector<8x32xbf16>
    %174 = vector.extract_strided_slice %171 {offsets = [0, 0], sizes = [8, 128], strides = [1, 1]} : vector<64x128xf32> to vector<8x128xf32>
    %cst_58 = arith.constant dense<0.000000e+00> : vector<8x128xf32>
    %175 = tpu.matmul %173, %165, %cst_58 {dimension_numbers = #tpu.dot_dimension_numbers<[1], [0], [0], [1], [0, 0, 1, 1], [], []>} : vector<8x32xbf16>, vector<32x128xbf16>, vector<8x128xf32> -> vector<8x128xf32>
    %176 = arith.addf %174, %175 : vector<8x128xf32>
    %177 = arith.mulf %2, %176 : vector<8x128xf32>
    %178 = math.tanh %177 : vector<8x128xf32>
    %179 = arith.mulf %5, %178 : vector<8x128xf32>
    %180 = arith.addf %179, %8 : vector<8x128xf32>
    %c64_i32_59 = arith.constant 64 : i32
    %181 = tpu.dynamic_rotate %180 by %c64_i32_59 dim 1 : vector<8x128xf32>, i32 -> vector<8x128xf32>
    %182 = arith.select %11, %172, %181 : vector<8x128xi1>, vector<8x128xf32>
    %183 = arith.mulf %180, %182 : vector<8x128xf32>
    %c32_i32_60 = arith.constant 32 : i32
    %184 = tpu.dynamic_rotate %183 by %c32_i32_60 dim 1 : vector<8x128xf32>, i32 -> vector<8x128xf32>
    %185 = arith.addf %183, %184 : vector<8x128xf32>
    %186 = vector.extract_strided_slice %181 {offsets = [0, 0], sizes = [8, 32], strides = [1, 1]} : vector<8x128xf32> to vector<8x32xf32>
    %187 = vector.extract_strided_slice %185 {offsets = [0, 0], sizes = [8, 32], strides = [1, 1]} : vector<8x128xf32> to vector<8x32xf32>
    %188 = math.tanh %187 : vector<8x32xf32>
    %189 = arith.mulf %186, %188 : vector<8x32xf32>
    %190 = arith.truncf %189 : vector<8x32xf32> to vector<8x32xbf16>
    %c0_61 = arith.constant 0 : index
    %c0_62 = arith.constant 0 : index
    %191 = vector.load %arg23[%c0_61, %c0_62] : memref<64x32xf32, #tpu.memory_space<vmem>>, vector<8x32xf32>
    tpu.vector_store %arg23[%c0_61, %c0_62], %189 {strides = array<i32>} : memref<64x32xf32, #tpu.memory_space<vmem>>, vector<8x32xf32>,
    %192 = vector.extract_strided_slice %171 {offsets = [8, 0], sizes = [8, 128], strides = [1, 1]} : vector<64x128xf32> to vector<8x128xf32>
    %cst_63 = arith.constant dense<0.000000e+00> : vector<8x128xf32>
    %193 = tpu.matmul %190, %165, %cst_63 {dimension_numbers = #tpu.dot_dimension_numbers<[1], [0], [0], [1], [0, 0, 1, 1], [], []>} : vector<8x32xbf16>, vector<32x128xbf16>, vector<8x128xf32> -> vector<8x128xf32>
    %194 = arith.addf %192, %193 : vector<8x128xf32>
    %195 = arith.mulf %2, %194 : vector<8x128xf32>
    %196 = math.tanh %195 : vector<8x128xf32>
    %197 = arith.mulf %5, %196 : vector<8x128xf32>
    %198 = arith.addf %197, %8 : vector<8x128xf32>
    %c64_i32_64 = arith.constant 64 : i32
    %199 = tpu.dynamic_rotate %198 by %c64_i32_64 dim 1 : vector<8x128xf32>, i32 -> vector<8x128xf32>
    %200 = arith.select %11, %185, %199 : vector<8x128xi1>, vector<8x128xf32>
    %201 = arith.mulf %198, %200 : vector<8x128xf32>
    %c32_i32_65 = arith.constant 32 : i32
    %202 = tpu.dynamic_rotate %201 by %c32_i32_65 dim 1 : vector<8x128xf32>, i32 -> vector<8x128xf32>
    %203 = arith.addf %201, %202 : vector<8x128xf32>
    %204 = vector.extract_strided_slice %199 {offsets = [0, 0], sizes = [8, 32], strides = [1, 1]} : vector<8x128xf32> to vector<8x32xf32>
    %205 = vector.extract_strided_slice %203 {offsets = [0, 0], sizes = [8, 32], strides = [1, 1]} : vector<8x128xf32> to vector<8x32xf32>
    %206 = math.tanh %205 : vector<8x32xf32>
    %207 = arith.mulf %204, %206 : vector<8x32xf32>
    %208 = arith.truncf %207 : vector<8x32xf32> to vector<8x32xbf16>
    %c8_66 = arith.constant 8 : index
    %c0_67 = arith.constant 0 : index
    %209 = vector.load %arg23[%c8_66, %c0_67] : memref<64x32xf32, #tpu.memory_space<vmem>>, vector<8x32xf32>
    tpu.vector_store %arg23[%c8_66, %c0_67], %207 {strides = array<i32>} : memref<64x32xf32, #tpu.memory_space<vmem>>, vector<8x32xf32>,
    %210 = vector.extract_strided_slice %171 {offsets = [16, 0], sizes = [8, 128], strides = [1, 1]} : vector<64x128xf32> to vector<8x128xf32>
    %cst_68 = arith.constant dense<0.000000e+00> : vector<8x128xf32>
    %211 = tpu.matmul %208, %165, %cst_68 {dimension_numbers = #tpu.dot_dimension_numbers<[1], [0], [0], [1], [0, 0, 1, 1], [], []>} : vector<8x32xbf16>, vector<32x128xbf16>, vector<8x128xf32> -> vector<8x128xf32>
    %212 = arith.addf %210, %211 : vector<8x128xf32>
    %213 = arith.mulf %2, %212 : vector<8x128xf32>
    %214 = math.tanh %213 : vector<8x128xf32>
    %215 = arith.mulf %5, %214 : vector<8x128xf32>
    %216 = arith.addf %215, %8 : vector<8x128xf32>
    %c64_i32_69 = arith.constant 64 : i32
    %217 = tpu.dynamic_rotate %216 by %c64_i32_69 dim 1 : vector<8x128xf32>, i32 -> vector<8x128xf32>
    %218 = arith.select %11, %203, %217 : vector<8x128xi1>, vector<8x128xf32>
    %219 = arith.mulf %216, %218 : vector<8x128xf32>
    %c32_i32_70 = arith.constant 32 : i32
    %220 = tpu.dynamic_rotate %219 by %c32_i32_70 dim 1 : vector<8x128xf32>, i32 -> vector<8x128xf32>
    %221 = arith.addf %219, %220 : vector<8x128xf32>
    %222 = vector.extract_strided_slice %217 {offsets = [0, 0], sizes = [8, 32], strides = [1, 1]} : vector<8x128xf32> to vector<8x32xf32>
    %223 = vector.extract_strided_slice %221 {offsets = [0, 0], sizes = [8, 32], strides = [1, 1]} : vector<8x128xf32> to vector<8x32xf32>
    %224 = math.tanh %223 : vector<8x32xf32>
    %225 = arith.mulf %222, %224 : vector<8x32xf32>
    %226 = arith.truncf %225 : vector<8x32xf32> to vector<8x32xbf16>
    %c16_71 = arith.constant 16 : index
    %c0_72 = arith.constant 0 : index
    %227 = vector.load %arg23[%c16_71, %c0_72] : memref<64x32xf32, #tpu.memory_space<vmem>>, vector<8x32xf32>
    tpu.vector_store %arg23[%c16_71, %c0_72], %225 {strides = array<i32>} : memref<64x32xf32, #tpu.memory_space<vmem>>, vector<8x32xf32>,
    %228 = vector.extract_strided_slice %171 {offsets = [24, 0], sizes = [8, 128], strides = [1, 1]} : vector<64x128xf32> to vector<8x128xf32>
    %cst_73 = arith.constant dense<0.000000e+00> : vector<8x128xf32>
    %229 = tpu.matmul %226, %165, %cst_73 {dimension_numbers = #tpu.dot_dimension_numbers<[1], [0], [0], [1], [0, 0, 1, 1], [], []>} : vector<8x32xbf16>, vector<32x128xbf16>, vector<8x128xf32> -> vector<8x128xf32>
    %230 = arith.addf %228, %229 : vector<8x128xf32>
    %231 = arith.mulf %2, %230 : vector<8x128xf32>
    %232 = math.tanh %231 : vector<8x128xf32>
    %233 = arith.mulf %5, %232 : vector<8x128xf32>
    %234 = arith.addf %233, %8 : vector<8x128xf32>
    %c64_i32_74 = arith.constant 64 : i32
    %235 = tpu.dynamic_rotate %234 by %c64_i32_74 dim 1 : vector<8x128xf32>, i32 -> vector<8x128xf32>
    %236 = arith.select %11, %221, %235 : vector<8x128xi1>, vector<8x128xf32>
    %237 = arith.mulf %234, %236 : vector<8x128xf32>
    %c32_i32_75 = arith.constant 32 : i32
    %238 = tpu.dynamic_rotate %237 by %c32_i32_75 dim 1 : vector<8x128xf32>, i32 -> vector<8x128xf32>
    %239 = arith.addf %237, %238 : vector<8x128xf32>
    %240 = vector.extract_strided_slice %235 {offsets = [0, 0], sizes = [8, 32], strides = [1, 1]} : vector<8x128xf32> to vector<8x32xf32>
    %241 = vector.extract_strided_slice %239 {offsets = [0, 0], sizes = [8, 32], strides = [1, 1]} : vector<8x128xf32> to vector<8x32xf32>
    %242 = math.tanh %241 : vector<8x32xf32>
    %243 = arith.mulf %240, %242 : vector<8x32xf32>
    %244 = arith.truncf %243 : vector<8x32xf32> to vector<8x32xbf16>
    %c24_76 = arith.constant 24 : index
    %c0_77 = arith.constant 0 : index
    %245 = vector.load %arg23[%c24_76, %c0_77] : memref<64x32xf32, #tpu.memory_space<vmem>>, vector<8x32xf32>
    tpu.vector_store %arg23[%c24_76, %c0_77], %243 {strides = array<i32>} : memref<64x32xf32, #tpu.memory_space<vmem>>, vector<8x32xf32>,
    %246 = vector.extract_strided_slice %171 {offsets = [32, 0], sizes = [8, 128], strides = [1, 1]} : vector<64x128xf32> to vector<8x128xf32>
    %cst_78 = arith.constant dense<0.000000e+00> : vector<8x128xf32>
    %247 = tpu.matmul %244, %165, %cst_78 {dimension_numbers = #tpu.dot_dimension_numbers<[1], [0], [0], [1], [0, 0, 1, 1], [], []>} : vector<8x32xbf16>, vector<32x128xbf16>, vector<8x128xf32> -> vector<8x128xf32>
    %248 = arith.addf %246, %247 : vector<8x128xf32>
    %249 = arith.mulf %2, %248 : vector<8x128xf32>
    %250 = math.tanh %249 : vector<8x128xf32>
    %251 = arith.mulf %5, %250 : vector<8x128xf32>
    %252 = arith.addf %251, %8 : vector<8x128xf32>
    %c64_i32_79 = arith.constant 64 : i32
    %253 = tpu.dynamic_rotate %252 by %c64_i32_79 dim 1 : vector<8x128xf32>, i32 -> vector<8x128xf32>
    %254 = arith.select %11, %239, %253 : vector<8x128xi1>, vector<8x128xf32>
    %255 = arith.mulf %252, %254 : vector<8x128xf32>
    %c32_i32_80 = arith.constant 32 : i32
    %256 = tpu.dynamic_rotate %255 by %c32_i32_80 dim 1 : vector<8x128xf32>, i32 -> vector<8x128xf32>
    %257 = arith.addf %255, %256 : vector<8x128xf32>
    %258 = vector.extract_strided_slice %253 {offsets = [0, 0], sizes = [8, 32], strides = [1, 1]} : vector<8x128xf32> to vector<8x32xf32>
    %259 = vector.extract_strided_slice %257 {offsets = [0, 0], sizes = [8, 32], strides = [1, 1]} : vector<8x128xf32> to vector<8x32xf32>
    %260 = math.tanh %259 : vector<8x32xf32>
    %261 = arith.mulf %258, %260 : vector<8x32xf32>
    %262 = arith.truncf %261 : vector<8x32xf32> to vector<8x32xbf16>
    %c32_81 = arith.constant 32 : index
    %c0_82 = arith.constant 0 : index
    %263 = vector.load %arg23[%c32_81, %c0_82] : memref<64x32xf32, #tpu.memory_space<vmem>>, vector<8x32xf32>
    tpu.vector_store %arg23[%c32_81, %c0_82], %261 {strides = array<i32>} : memref<64x32xf32, #tpu.memory_space<vmem>>, vector<8x32xf32>,
    %264 = vector.extract_strided_slice %171 {offsets = [40, 0], sizes = [8, 128], strides = [1, 1]} : vector<64x128xf32> to vector<8x128xf32>
    %cst_83 = arith.constant dense<0.000000e+00> : vector<8x128xf32>
    %265 = tpu.matmul %262, %165, %cst_83 {dimension_numbers = #tpu.dot_dimension_numbers<[1], [0], [0], [1], [0, 0, 1, 1], [], []>} : vector<8x32xbf16>, vector<32x128xbf16>, vector<8x128xf32> -> vector<8x128xf32>
    %266 = arith.addf %264, %265 : vector<8x128xf32>
    %267 = arith.mulf %2, %266 : vector<8x128xf32>
    %268 = math.tanh %267 : vector<8x128xf32>
    %269 = arith.mulf %5, %268 : vector<8x128xf32>
    %270 = arith.addf %269, %8 : vector<8x128xf32>
    %c64_i32_84 = arith.constant 64 : i32
    %271 = tpu.dynamic_rotate %270 by %c64_i32_84 dim 1 : vector<8x128xf32>, i32 -> vector<8x128xf32>
    %272 = arith.select %11, %257, %271 : vector<8x128xi1>, vector<8x128xf32>
    %273 = arith.mulf %270, %272 : vector<8x128xf32>
    %c32_i32_85 = arith.constant 32 : i32
    %274 = tpu.dynamic_rotate %273 by %c32_i32_85 dim 1 : vector<8x128xf32>, i32 -> vector<8x128xf32>
    %275 = arith.addf %273, %274 : vector<8x128xf32>
    %276 = vector.extract_strided_slice %271 {offsets = [0, 0], sizes = [8, 32], strides = [1, 1]} : vector<8x128xf32> to vector<8x32xf32>
    %277 = vector.extract_strided_slice %275 {offsets = [0, 0], sizes = [8, 32], strides = [1, 1]} : vector<8x128xf32> to vector<8x32xf32>
    %278 = math.tanh %277 : vector<8x32xf32>
    %279 = arith.mulf %276, %278 : vector<8x32xf32>
    %280 = arith.truncf %279 : vector<8x32xf32> to vector<8x32xbf16>
    %c40_86 = arith.constant 40 : index
    %c0_87 = arith.constant 0 : index
    %281 = vector.load %arg23[%c40_86, %c0_87] : memref<64x32xf32, #tpu.memory_space<vmem>>, vector<8x32xf32>
    tpu.vector_store %arg23[%c40_86, %c0_87], %279 {strides = array<i32>} : memref<64x32xf32, #tpu.memory_space<vmem>>, vector<8x32xf32>,
    %282 = vector.extract_strided_slice %171 {offsets = [48, 0], sizes = [8, 128], strides = [1, 1]} : vector<64x128xf32> to vector<8x128xf32>
    %cst_88 = arith.constant dense<0.000000e+00> : vector<8x128xf32>
    %283 = tpu.matmul %280, %165, %cst_88 {dimension_numbers = #tpu.dot_dimension_numbers<[1], [0], [0], [1], [0, 0, 1, 1], [], []>} : vector<8x32xbf16>, vector<32x128xbf16>, vector<8x128xf32> -> vector<8x128xf32>
    %284 = arith.addf %282, %283 : vector<8x128xf32>
    %285 = arith.mulf %2, %284 : vector<8x128xf32>
    %286 = math.tanh %285 : vector<8x128xf32>
    %287 = arith.mulf %5, %286 : vector<8x128xf32>
    %288 = arith.addf %287, %8 : vector<8x128xf32>
    %c64_i32_89 = arith.constant 64 : i32
    %289 = tpu.dynamic_rotate %288 by %c64_i32_89 dim 1 : vector<8x128xf32>, i32 -> vector<8x128xf32>
    %290 = arith.select %11, %275, %289 : vector<8x128xi1>, vector<8x128xf32>
    %291 = arith.mulf %288, %290 : vector<8x128xf32>
    %c32_i32_90 = arith.constant 32 : i32
    %292 = tpu.dynamic_rotate %291 by %c32_i32_90 dim 1 : vector<8x128xf32>, i32 -> vector<8x128xf32>
    %293 = arith.addf %291, %292 : vector<8x128xf32>
    %294 = vector.extract_strided_slice %289 {offsets = [0, 0], sizes = [8, 32], strides = [1, 1]} : vector<8x128xf32> to vector<8x32xf32>
    %295 = vector.extract_strided_slice %293 {offsets = [0, 0], sizes = [8, 32], strides = [1, 1]} : vector<8x128xf32> to vector<8x32xf32>
    %296 = math.tanh %295 : vector<8x32xf32>
    %297 = arith.mulf %294, %296 : vector<8x32xf32>
    %298 = arith.truncf %297 : vector<8x32xf32> to vector<8x32xbf16>
    %c48_91 = arith.constant 48 : index
    %c0_92 = arith.constant 0 : index
    %299 = vector.load %arg23[%c48_91, %c0_92] : memref<64x32xf32, #tpu.memory_space<vmem>>, vector<8x32xf32>
    tpu.vector_store %arg23[%c48_91, %c0_92], %297 {strides = array<i32>} : memref<64x32xf32, #tpu.memory_space<vmem>>, vector<8x32xf32>,
    %300 = vector.extract_strided_slice %171 {offsets = [56, 0], sizes = [8, 128], strides = [1, 1]} : vector<64x128xf32> to vector<8x128xf32>
    %cst_93 = arith.constant dense<0.000000e+00> : vector<8x128xf32>
    %301 = tpu.matmul %298, %165, %cst_93 {dimension_numbers = #tpu.dot_dimension_numbers<[1], [0], [0], [1], [0, 0, 1, 1], [], []>} : vector<8x32xbf16>, vector<32x128xbf16>, vector<8x128xf32> -> vector<8x128xf32>
    %302 = arith.addf %300, %301 : vector<8x128xf32>
    %303 = arith.mulf %2, %302 : vector<8x128xf32>
    %304 = math.tanh %303 : vector<8x128xf32>
    %305 = arith.mulf %5, %304 : vector<8x128xf32>
    %306 = arith.addf %305, %8 : vector<8x128xf32>
    %c64_i32_94 = arith.constant 64 : i32
    %307 = tpu.dynamic_rotate %306 by %c64_i32_94 dim 1 : vector<8x128xf32>, i32 -> vector<8x128xf32>
    %308 = arith.select %11, %293, %307 : vector<8x128xi1>, vector<8x128xf32>
    %309 = arith.mulf %306, %308 : vector<8x128xf32>
    %c32_i32_95 = arith.constant 32 : i32
    %310 = tpu.dynamic_rotate %309 by %c32_i32_95 dim 1 : vector<8x128xf32>, i32 -> vector<8x128xf32>
    %311 = arith.addf %309, %310 : vector<8x128xf32>
    %312 = vector.extract_strided_slice %307 {offsets = [0, 0], sizes = [8, 32], strides = [1, 1]} : vector<8x128xf32> to vector<8x32xf32>
    %313 = vector.extract_strided_slice %311 {offsets = [0, 0], sizes = [8, 32], strides = [1, 1]} : vector<8x128xf32> to vector<8x32xf32>
    %314 = math.tanh %313 : vector<8x32xf32>
    %315 = arith.mulf %312, %314 : vector<8x32xf32>
    %c56_96 = arith.constant 56 : index
    %c0_97 = arith.constant 0 : index
    %316 = vector.load %arg23[%c56_96, %c0_97] : memref<64x32xf32, #tpu.memory_space<vmem>>, vector<8x32xf32>
    tpu.vector_store %arg23[%c56_96, %c0_97], %315 {strides = array<i32>} : memref<64x32xf32, #tpu.memory_space<vmem>>, vector<8x32xf32>,
    %c0_98 = arith.constant 0 : index
    %c0_99 = arith.constant 0 : index
    %317 = vector.load %arg7[%c0_98, %c0_99] : memref<32x128xbf16, #tpu.memory_space<vmem>>, vector<32x128xbf16>
    %c0_100 = arith.constant 0 : index
    %c0_101 = arith.constant 0 : index
    %318 = vector.load %arg8[%c0_100, %c0_101] : memref<32x128xbf16, #tpu.memory_space<vmem>>, vector<32x128xbf16>
    %c0_102 = arith.constant 0 : index
    %c0_103 = arith.constant 0 : index
    %319 = vector.load %arg9[%c0_102, %c0_103] : memref<1x128xf32, #tpu.memory_space<vmem>>, vector<1x128xf32>
    %c0_104 = arith.constant 0 : index
    %c0_105 = arith.constant 0 : index
    %320 = vector.load %arg23[%c0_104, %c0_105] : memref<64x32xf32, #tpu.memory_space<vmem>>, vector<64x32xf32>
    %321 = arith.truncf %320 : vector<64x32xf32> to vector<64x32xbf16>
    %cst_106 = arith.constant dense<0.000000e+00> : vector<64x128xf32>
    %322 = tpu.matmul %321, %317, %cst_106 {dimension_numbers = #tpu.dot_dimension_numbers<[1], [0], [0], [1], [0, 0, 1, 1], [], []>} : vector<64x32xbf16>, vector<32x128xbf16>, vector<64x128xf32> -> vector<64x128xf32>
    %323 = vector.broadcast %319 : vector<1x128xf32> to vector<64x128xf32>
    %324 = arith.addf %322, %323 : vector<64x128xf32>
    %cst_107 = arith.constant 0.000000e+00 : f32
    %325 = vector.broadcast %cst_107 : f32 to vector<8x128xf32>
    %cst_108 = arith.constant 0.000000e+00 : bf16
    %326 = vector.broadcast %cst_108 : bf16 to vector<8x32xbf16>
    %327 = vector.extract_strided_slice %324 {offsets = [0, 0], sizes = [8, 128], strides = [1, 1]} : vector<64x128xf32> to vector<8x128xf32>
    %cst_109 = arith.constant dense<0.000000e+00> : vector<8x128xf32>
    %328 = tpu.matmul %326, %318, %cst_109 {dimension_numbers = #tpu.dot_dimension_numbers<[1], [0], [0], [1], [0, 0, 1, 1], [], []>} : vector<8x32xbf16>, vector<32x128xbf16>, vector<8x128xf32> -> vector<8x128xf32>
    %329 = arith.addf %327, %328 : vector<8x128xf32>
    %330 = arith.mulf %2, %329 : vector<8x128xf32>
    %331 = math.tanh %330 : vector<8x128xf32>
    %332 = arith.mulf %5, %331 : vector<8x128xf32>
    %333 = arith.addf %332, %8 : vector<8x128xf32>
    %c64_i32_110 = arith.constant 64 : i32
    %334 = tpu.dynamic_rotate %333 by %c64_i32_110 dim 1 : vector<8x128xf32>, i32 -> vector<8x128xf32>
    %335 = arith.select %11, %325, %334 : vector<8x128xi1>, vector<8x128xf32>
    %336 = arith.mulf %333, %335 : vector<8x128xf32>
    %c32_i32_111 = arith.constant 32 : i32
    %337 = tpu.dynamic_rotate %336 by %c32_i32_111 dim 1 : vector<8x128xf32>, i32 -> vector<8x128xf32>
    %338 = arith.addf %336, %337 : vector<8x128xf32>
    %339 = vector.extract_strided_slice %334 {offsets = [0, 0], sizes = [8, 32], strides = [1, 1]} : vector<8x128xf32> to vector<8x32xf32>
    %340 = vector.extract_strided_slice %338 {offsets = [0, 0], sizes = [8, 32], strides = [1, 1]} : vector<8x128xf32> to vector<8x32xf32>
    %341 = math.tanh %340 : vector<8x32xf32>
    %342 = arith.mulf %339, %341 : vector<8x32xf32>
    %343 = arith.truncf %342 : vector<8x32xf32> to vector<8x32xbf16>
    %c0_112 = arith.constant 0 : index
    %c0_113 = arith.constant 0 : index
    %344 = vector.load %arg22[%c0_112, %c0_113] : memref<64x32xf32, #tpu.memory_space<vmem>>, vector<8x32xf32>
    tpu.vector_store %arg22[%c0_112, %c0_113], %342 {strides = array<i32>} : memref<64x32xf32, #tpu.memory_space<vmem>>, vector<8x32xf32>,
    %345 = vector.extract_strided_slice %324 {offsets = [8, 0], sizes = [8, 128], strides = [1, 1]} : vector<64x128xf32> to vector<8x128xf32>
    %cst_114 = arith.constant dense<0.000000e+00> : vector<8x128xf32>
    %346 = tpu.matmul %343, %318, %cst_114 {dimension_numbers = #tpu.dot_dimension_numbers<[1], [0], [0], [1], [0, 0, 1, 1], [], []>} : vector<8x32xbf16>, vector<32x128xbf16>, vector<8x128xf32> -> vector<8x128xf32>
    %347 = arith.addf %345, %346 : vector<8x128xf32>
    %348 = arith.mulf %2, %347 : vector<8x128xf32>
    %349 = math.tanh %348 : vector<8x128xf32>
    %350 = arith.mulf %5, %349 : vector<8x128xf32>
    %351 = arith.addf %350, %8 : vector<8x128xf32>
    %c64_i32_115 = arith.constant 64 : i32
    %352 = tpu.dynamic_rotate %351 by %c64_i32_115 dim 1 : vector<8x128xf32>, i32 -> vector<8x128xf32>
    %353 = arith.select %11, %338, %352 : vector<8x128xi1>, vector<8x128xf32>
    %354 = arith.mulf %351, %353 : vector<8x128xf32>
    %c32_i32_116 = arith.constant 32 : i32
    %355 = tpu.dynamic_rotate %354 by %c32_i32_116 dim 1 : vector<8x128xf32>, i32 -> vector<8x128xf32>
    %356 = arith.addf %354, %355 : vector<8x128xf32>
    %357 = vector.extract_strided_slice %352 {offsets = [0, 0], sizes = [8, 32], strides = [1, 1]} : vector<8x128xf32> to vector<8x32xf32>
    %358 = vector.extract_strided_slice %356 {offsets = [0, 0], sizes = [8, 32], strides = [1, 1]} : vector<8x128xf32> to vector<8x32xf32>
    %359 = math.tanh %358 : vector<8x32xf32>
    %360 = arith.mulf %357, %359 : vector<8x32xf32>
    %361 = arith.truncf %360 : vector<8x32xf32> to vector<8x32xbf16>
    %c8_117 = arith.constant 8 : index
    %c0_118 = arith.constant 0 : index
    %362 = vector.load %arg22[%c8_117, %c0_118] : memref<64x32xf32, #tpu.memory_space<vmem>>, vector<8x32xf32>
    tpu.vector_store %arg22[%c8_117, %c0_118], %360 {strides = array<i32>} : memref<64x32xf32, #tpu.memory_space<vmem>>, vector<8x32xf32>,
    %363 = vector.extract_strided_slice %324 {offsets = [16, 0], sizes = [8, 128], strides = [1, 1]} : vector<64x128xf32> to vector<8x128xf32>
    %cst_119 = arith.constant dense<0.000000e+00> : vector<8x128xf32>
    %364 = tpu.matmul %361, %318, %cst_119 {dimension_numbers = #tpu.dot_dimension_numbers<[1], [0], [0], [1], [0, 0, 1, 1], [], []>} : vector<8x32xbf16>, vector<32x128xbf16>, vector<8x128xf32> -> vector<8x128xf32>
    %365 = arith.addf %363, %364 : vector<8x128xf32>
    %366 = arith.mulf %2, %365 : vector<8x128xf32>
    %367 = math.tanh %366 : vector<8x128xf32>
    %368 = arith.mulf %5, %367 : vector<8x128xf32>
    %369 = arith.addf %368, %8 : vector<8x128xf32>
    %c64_i32_120 = arith.constant 64 : i32
    %370 = tpu.dynamic_rotate %369 by %c64_i32_120 dim 1 : vector<8x128xf32>, i32 -> vector<8x128xf32>
    %371 = arith.select %11, %356, %370 : vector<8x128xi1>, vector<8x128xf32>
    %372 = arith.mulf %369, %371 : vector<8x128xf32>
    %c32_i32_121 = arith.constant 32 : i32
    %373 = tpu.dynamic_rotate %372 by %c32_i32_121 dim 1 : vector<8x128xf32>, i32 -> vector<8x128xf32>
    %374 = arith.addf %372, %373 : vector<8x128xf32>
    %375 = vector.extract_strided_slice %370 {offsets = [0, 0], sizes = [8, 32], strides = [1, 1]} : vector<8x128xf32> to vector<8x32xf32>
    %376 = vector.extract_strided_slice %374 {offsets = [0, 0], sizes = [8, 32], strides = [1, 1]} : vector<8x128xf32> to vector<8x32xf32>
    %377 = math.tanh %376 : vector<8x32xf32>
    %378 = arith.mulf %375, %377 : vector<8x32xf32>
    %379 = arith.truncf %378 : vector<8x32xf32> to vector<8x32xbf16>
    %c16_122 = arith.constant 16 : index
    %c0_123 = arith.constant 0 : index
    %380 = vector.load %arg22[%c16_122, %c0_123] : memref<64x32xf32, #tpu.memory_space<vmem>>, vector<8x32xf32>
    tpu.vector_store %arg22[%c16_122, %c0_123], %378 {strides = array<i32>} : memref<64x32xf32, #tpu.memory_space<vmem>>, vector<8x32xf32>,
    %381 = vector.extract_strided_slice %324 {offsets = [24, 0], sizes = [8, 128], strides = [1, 1]} : vector<64x128xf32> to vector<8x128xf32>
    %cst_124 = arith.constant dense<0.000000e+00> : vector<8x128xf32>
    %382 = tpu.matmul %379, %318, %cst_124 {dimension_numbers = #tpu.dot_dimension_numbers<[1], [0], [0], [1], [0, 0, 1, 1], [], []>} : vector<8x32xbf16>, vector<32x128xbf16>, vector<8x128xf32> -> vector<8x128xf32>
    %383 = arith.addf %381, %382 : vector<8x128xf32>
    %384 = arith.mulf %2, %383 : vector<8x128xf32>
    %385 = math.tanh %384 : vector<8x128xf32>
    %386 = arith.mulf %5, %385 : vector<8x128xf32>
    %387 = arith.addf %386, %8 : vector<8x128xf32>
    %c64_i32_125 = arith.constant 64 : i32
    %388 = tpu.dynamic_rotate %387 by %c64_i32_125 dim 1 : vector<8x128xf32>, i32 -> vector<8x128xf32>
    %389 = arith.select %11, %374, %388 : vector<8x128xi1>, vector<8x128xf32>
    %390 = arith.mulf %387, %389 : vector<8x128xf32>
    %c32_i32_126 = arith.constant 32 : i32
    %391 = tpu.dynamic_rotate %390 by %c32_i32_126 dim 1 : vector<8x128xf32>, i32 -> vector<8x128xf32>
    %392 = arith.addf %390, %391 : vector<8x128xf32>
    %393 = vector.extract_strided_slice %388 {offsets = [0, 0], sizes = [8, 32], strides = [1, 1]} : vector<8x128xf32> to vector<8x32xf32>
    %394 = vector.extract_strided_slice %392 {offsets = [0, 0], sizes = [8, 32], strides = [1, 1]} : vector<8x128xf32> to vector<8x32xf32>
    %395 = math.tanh %394 : vector<8x32xf32>
    %396 = arith.mulf %393, %395 : vector<8x32xf32>
    %397 = arith.truncf %396 : vector<8x32xf32> to vector<8x32xbf16>
    %c24_127 = arith.constant 24 : index
    %c0_128 = arith.constant 0 : index
    %398 = vector.load %arg22[%c24_127, %c0_128] : memref<64x32xf32, #tpu.memory_space<vmem>>, vector<8x32xf32>
    tpu.vector_store %arg22[%c24_127, %c0_128], %396 {strides = array<i32>} : memref<64x32xf32, #tpu.memory_space<vmem>>, vector<8x32xf32>,
    %399 = vector.extract_strided_slice %324 {offsets = [32, 0], sizes = [8, 128], strides = [1, 1]} : vector<64x128xf32> to vector<8x128xf32>
    %cst_129 = arith.constant dense<0.000000e+00> : vector<8x128xf32>
    %400 = tpu.matmul %397, %318, %cst_129 {dimension_numbers = #tpu.dot_dimension_numbers<[1], [0], [0], [1], [0, 0, 1, 1], [], []>} : vector<8x32xbf16>, vector<32x128xbf16>, vector<8x128xf32> -> vector<8x128xf32>
    %401 = arith.addf %399, %400 : vector<8x128xf32>
    %402 = arith.mulf %2, %401 : vector<8x128xf32>
    %403 = math.tanh %402 : vector<8x128xf32>
    %404 = arith.mulf %5, %403 : vector<8x128xf32>
    %405 = arith.addf %404, %8 : vector<8x128xf32>
    %c64_i32_130 = arith.constant 64 : i32
    %406 = tpu.dynamic_rotate %405 by %c64_i32_130 dim 1 : vector<8x128xf32>, i32 -> vector<8x128xf32>
    %407 = arith.select %11, %392, %406 : vector<8x128xi1>, vector<8x128xf32>
    %408 = arith.mulf %405, %407 : vector<8x128xf32>
    %c32_i32_131 = arith.constant 32 : i32
    %409 = tpu.dynamic_rotate %408 by %c32_i32_131 dim 1 : vector<8x128xf32>, i32 -> vector<8x128xf32>
    %410 = arith.addf %408, %409 : vector<8x128xf32>
    %411 = vector.extract_strided_slice %406 {offsets = [0, 0], sizes = [8, 32], strides = [1, 1]} : vector<8x128xf32> to vector<8x32xf32>
    %412 = vector.extract_strided_slice %410 {offsets = [0, 0], sizes = [8, 32], strides = [1, 1]} : vector<8x128xf32> to vector<8x32xf32>
    %413 = math.tanh %412 : vector<8x32xf32>
    %414 = arith.mulf %411, %413 : vector<8x32xf32>
    %415 = arith.truncf %414 : vector<8x32xf32> to vector<8x32xbf16>
    %c32_132 = arith.constant 32 : index
    %c0_133 = arith.constant 0 : index
    %416 = vector.load %arg22[%c32_132, %c0_133] : memref<64x32xf32, #tpu.memory_space<vmem>>, vector<8x32xf32>
    tpu.vector_store %arg22[%c32_132, %c0_133], %414 {strides = array<i32>} : memref<64x32xf32, #tpu.memory_space<vmem>>, vector<8x32xf32>,
    %417 = vector.extract_strided_slice %324 {offsets = [40, 0], sizes = [8, 128], strides = [1, 1]} : vector<64x128xf32> to vector<8x128xf32>
    %cst_134 = arith.constant dense<0.000000e+00> : vector<8x128xf32>
    %418 = tpu.matmul %415, %318, %cst_134 {dimension_numbers = #tpu.dot_dimension_numbers<[1], [0], [0], [1], [0, 0, 1, 1], [], []>} : vector<8x32xbf16>, vector<32x128xbf16>, vector<8x128xf32> -> vector<8x128xf32>
    %419 = arith.addf %417, %418 : vector<8x128xf32>
    %420 = arith.mulf %2, %419 : vector<8x128xf32>
    %421 = math.tanh %420 : vector<8x128xf32>
    %422 = arith.mulf %5, %421 : vector<8x128xf32>
    %423 = arith.addf %422, %8 : vector<8x128xf32>
    %c64_i32_135 = arith.constant 64 : i32
    %424 = tpu.dynamic_rotate %423 by %c64_i32_135 dim 1 : vector<8x128xf32>, i32 -> vector<8x128xf32>
    %425 = arith.select %11, %410, %424 : vector<8x128xi1>, vector<8x128xf32>
    %426 = arith.mulf %423, %425 : vector<8x128xf32>
    %c32_i32_136 = arith.constant 32 : i32
    %427 = tpu.dynamic_rotate %426 by %c32_i32_136 dim 1 : vector<8x128xf32>, i32 -> vector<8x128xf32>
    %428 = arith.addf %426, %427 : vector<8x128xf32>
    %429 = vector.extract_strided_slice %424 {offsets = [0, 0], sizes = [8, 32], strides = [1, 1]} : vector<8x128xf32> to vector<8x32xf32>
    %430 = vector.extract_strided_slice %428 {offsets = [0, 0], sizes = [8, 32], strides = [1, 1]} : vector<8x128xf32> to vector<8x32xf32>
    %431 = math.tanh %430 : vector<8x32xf32>
    %432 = arith.mulf %429, %431 : vector<8x32xf32>
    %433 = arith.truncf %432 : vector<8x32xf32> to vector<8x32xbf16>
    %c40_137 = arith.constant 40 : index
    %c0_138 = arith.constant 0 : index
    %434 = vector.load %arg22[%c40_137, %c0_138] : memref<64x32xf32, #tpu.memory_space<vmem>>, vector<8x32xf32>
    tpu.vector_store %arg22[%c40_137, %c0_138], %432 {strides = array<i32>} : memref<64x32xf32, #tpu.memory_space<vmem>>, vector<8x32xf32>,
    %435 = vector.extract_strided_slice %324 {offsets = [48, 0], sizes = [8, 128], strides = [1, 1]} : vector<64x128xf32> to vector<8x128xf32>
    %cst_139 = arith.constant dense<0.000000e+00> : vector<8x128xf32>
    %436 = tpu.matmul %433, %318, %cst_139 {dimension_numbers = #tpu.dot_dimension_numbers<[1], [0], [0], [1], [0, 0, 1, 1], [], []>} : vector<8x32xbf16>, vector<32x128xbf16>, vector<8x128xf32> -> vector<8x128xf32>
    %437 = arith.addf %435, %436 : vector<8x128xf32>
    %438 = arith.mulf %2, %437 : vector<8x128xf32>
    %439 = math.tanh %438 : vector<8x128xf32>
    %440 = arith.mulf %5, %439 : vector<8x128xf32>
    %441 = arith.addf %440, %8 : vector<8x128xf32>
    %c64_i32_140 = arith.constant 64 : i32
    %442 = tpu.dynamic_rotate %441 by %c64_i32_140 dim 1 : vector<8x128xf32>, i32 -> vector<8x128xf32>
    %443 = arith.select %11, %428, %442 : vector<8x128xi1>, vector<8x128xf32>
    %444 = arith.mulf %441, %443 : vector<8x128xf32>
    %c32_i32_141 = arith.constant 32 : i32
    %445 = tpu.dynamic_rotate %444 by %c32_i32_141 dim 1 : vector<8x128xf32>, i32 -> vector<8x128xf32>
    %446 = arith.addf %444, %445 : vector<8x128xf32>
    %447 = vector.extract_strided_slice %442 {offsets = [0, 0], sizes = [8, 32], strides = [1, 1]} : vector<8x128xf32> to vector<8x32xf32>
    %448 = vector.extract_strided_slice %446 {offsets = [0, 0], sizes = [8, 32], strides = [1, 1]} : vector<8x128xf32> to vector<8x32xf32>
    %449 = math.tanh %448 : vector<8x32xf32>
    %450 = arith.mulf %447, %449 : vector<8x32xf32>
    %451 = arith.truncf %450 : vector<8x32xf32> to vector<8x32xbf16>
    %c48_142 = arith.constant 48 : index
    %c0_143 = arith.constant 0 : index
    %452 = vector.load %arg22[%c48_142, %c0_143] : memref<64x32xf32, #tpu.memory_space<vmem>>, vector<8x32xf32>
    tpu.vector_store %arg22[%c48_142, %c0_143], %450 {strides = array<i32>} : memref<64x32xf32, #tpu.memory_space<vmem>>, vector<8x32xf32>,
    %453 = vector.extract_strided_slice %324 {offsets = [56, 0], sizes = [8, 128], strides = [1, 1]} : vector<64x128xf32> to vector<8x128xf32>
    %cst_144 = arith.constant dense<0.000000e+00> : vector<8x128xf32>
    %454 = tpu.matmul %451, %318, %cst_144 {dimension_numbers = #tpu.dot_dimension_numbers<[1], [0], [0], [1], [0, 0, 1, 1], [], []>} : vector<8x32xbf16>, vector<32x128xbf16>, vector<8x128xf32> -> vector<8x128xf32>
    %455 = arith.addf %453, %454 : vector<8x128xf32>
    %456 = arith.mulf %2, %455 : vector<8x128xf32>
    %457 = math.tanh %456 : vector<8x128xf32>
    %458 = arith.mulf %5, %457 : vector<8x128xf32>
    %459 = arith.addf %458, %8 : vector<8x128xf32>
    %c64_i32_145 = arith.constant 64 : i32
    %460 = tpu.dynamic_rotate %459 by %c64_i32_145 dim 1 : vector<8x128xf32>, i32 -> vector<8x128xf32>
    %461 = arith.select %11, %446, %460 : vector<8x128xi1>, vector<8x128xf32>
    %462 = arith.mulf %459, %461 : vector<8x128xf32>
    %c32_i32_146 = arith.constant 32 : i32
    %463 = tpu.dynamic_rotate %462 by %c32_i32_146 dim 1 : vector<8x128xf32>, i32 -> vector<8x128xf32>
    %464 = arith.addf %462, %463 : vector<8x128xf32>
    %465 = vector.extract_strided_slice %460 {offsets = [0, 0], sizes = [8, 32], strides = [1, 1]} : vector<8x128xf32> to vector<8x32xf32>
    %466 = vector.extract_strided_slice %464 {offsets = [0, 0], sizes = [8, 32], strides = [1, 1]} : vector<8x128xf32> to vector<8x32xf32>
    %467 = math.tanh %466 : vector<8x32xf32>
    %468 = arith.mulf %465, %467 : vector<8x32xf32>
    %c56_147 = arith.constant 56 : index
    %c0_148 = arith.constant 0 : index
    %469 = vector.load %arg22[%c56_147, %c0_148] : memref<64x32xf32, #tpu.memory_space<vmem>>, vector<8x32xf32>
    tpu.vector_store %arg22[%c56_147, %c0_148], %468 {strides = array<i32>} : memref<64x32xf32, #tpu.memory_space<vmem>>, vector<8x32xf32>,
    %c0_149 = arith.constant 0 : index
    %c0_150 = arith.constant 0 : index
    %470 = vector.load %arg10[%c0_149, %c0_150] : memref<32x128xbf16, #tpu.memory_space<vmem>>, vector<32x128xbf16>
    %c0_151 = arith.constant 0 : index
    %c0_152 = arith.constant 0 : index
    %471 = vector.load %arg11[%c0_151, %c0_152] : memref<32x128xbf16, #tpu.memory_space<vmem>>, vector<32x128xbf16>
    %c0_153 = arith.constant 0 : index
    %c0_154 = arith.constant 0 : index
    %472 = vector.load %arg12[%c0_153, %c0_154] : memref<1x128xf32, #tpu.memory_space<vmem>>, vector<1x128xf32>
    %c0_155 = arith.constant 0 : index
    %c0_156 = arith.constant 0 : index
    %473 = vector.load %arg22[%c0_155, %c0_156] : memref<64x32xf32, #tpu.memory_space<vmem>>, vector<64x32xf32>
    %474 = arith.truncf %473 : vector<64x32xf32> to vector<64x32xbf16>
    %cst_157 = arith.constant dense<0.000000e+00> : vector<64x128xf32>
    %475 = tpu.matmul %474, %470, %cst_157 {dimension_numbers = #tpu.dot_dimension_numbers<[1], [0], [0], [1], [0, 0, 1, 1], [], []>} : vector<64x32xbf16>, vector<32x128xbf16>, vector<64x128xf32> -> vector<64x128xf32>
    %476 = vector.broadcast %472 : vector<1x128xf32> to vector<64x128xf32>
    %477 = arith.addf %475, %476 : vector<64x128xf32>
    %cst_158 = arith.constant 0.000000e+00 : f32
    %478 = vector.broadcast %cst_158 : f32 to vector<8x128xf32>
    %cst_159 = arith.constant 0.000000e+00 : bf16
    %479 = vector.broadcast %cst_159 : bf16 to vector<8x32xbf16>
    %480 = vector.extract_strided_slice %477 {offsets = [0, 0], sizes = [8, 128], strides = [1, 1]} : vector<64x128xf32> to vector<8x128xf32>
    %cst_160 = arith.constant dense<0.000000e+00> : vector<8x128xf32>
    %481 = tpu.matmul %479, %471, %cst_160 {dimension_numbers = #tpu.dot_dimension_numbers<[1], [0], [0], [1], [0, 0, 1, 1], [], []>} : vector<8x32xbf16>, vector<32x128xbf16>, vector<8x128xf32> -> vector<8x128xf32>
    %482 = arith.addf %480, %481 : vector<8x128xf32>
    %483 = arith.mulf %2, %482 : vector<8x128xf32>
    %484 = math.tanh %483 : vector<8x128xf32>
    %485 = arith.mulf %5, %484 : vector<8x128xf32>
    %486 = arith.addf %485, %8 : vector<8x128xf32>
    %c64_i32_161 = arith.constant 64 : i32
    %487 = tpu.dynamic_rotate %486 by %c64_i32_161 dim 1 : vector<8x128xf32>, i32 -> vector<8x128xf32>
    %488 = arith.select %11, %478, %487 : vector<8x128xi1>, vector<8x128xf32>
    %489 = arith.mulf %486, %488 : vector<8x128xf32>
    %c32_i32_162 = arith.constant 32 : i32
    %490 = tpu.dynamic_rotate %489 by %c32_i32_162 dim 1 : vector<8x128xf32>, i32 -> vector<8x128xf32>
    %491 = arith.addf %489, %490 : vector<8x128xf32>
    %492 = vector.extract_strided_slice %487 {offsets = [0, 0], sizes = [8, 32], strides = [1, 1]} : vector<8x128xf32> to vector<8x32xf32>
    %493 = vector.extract_strided_slice %491 {offsets = [0, 0], sizes = [8, 32], strides = [1, 1]} : vector<8x128xf32> to vector<8x32xf32>
    %494 = math.tanh %493 : vector<8x32xf32>
    %495 = arith.mulf %492, %494 : vector<8x32xf32>
    %496 = arith.truncf %495 : vector<8x32xf32> to vector<8x32xbf16>
    %c0_163 = arith.constant 0 : index
    %c0_164 = arith.constant 0 : index
    %497 = vector.load %arg23[%c0_163, %c0_164] : memref<64x32xf32, #tpu.memory_space<vmem>>, vector<8x32xf32>
    tpu.vector_store %arg23[%c0_163, %c0_164], %495 {strides = array<i32>} : memref<64x32xf32, #tpu.memory_space<vmem>>, vector<8x32xf32>,
    %498 = vector.extract_strided_slice %477 {offsets = [8, 0], sizes = [8, 128], strides = [1, 1]} : vector<64x128xf32> to vector<8x128xf32>
    %cst_165 = arith.constant dense<0.000000e+00> : vector<8x128xf32>
    %499 = tpu.matmul %496, %471, %cst_165 {dimension_numbers = #tpu.dot_dimension_numbers<[1], [0], [0], [1], [0, 0, 1, 1], [], []>} : vector<8x32xbf16>, vector<32x128xbf16>, vector<8x128xf32> -> vector<8x128xf32>
    %500 = arith.addf %498, %499 : vector<8x128xf32>
    %501 = arith.mulf %2, %500 : vector<8x128xf32>
    %502 = math.tanh %501 : vector<8x128xf32>
    %503 = arith.mulf %5, %502 : vector<8x128xf32>
    %504 = arith.addf %503, %8 : vector<8x128xf32>
    %c64_i32_166 = arith.constant 64 : i32
    %505 = tpu.dynamic_rotate %504 by %c64_i32_166 dim 1 : vector<8x128xf32>, i32 -> vector<8x128xf32>
    %506 = arith.select %11, %491, %505 : vector<8x128xi1>, vector<8x128xf32>
    %507 = arith.mulf %504, %506 : vector<8x128xf32>
    %c32_i32_167 = arith.constant 32 : i32
    %508 = tpu.dynamic_rotate %507 by %c32_i32_167 dim 1 : vector<8x128xf32>, i32 -> vector<8x128xf32>
    %509 = arith.addf %507, %508 : vector<8x128xf32>
    %510 = vector.extract_strided_slice %505 {offsets = [0, 0], sizes = [8, 32], strides = [1, 1]} : vector<8x128xf32> to vector<8x32xf32>
    %511 = vector.extract_strided_slice %509 {offsets = [0, 0], sizes = [8, 32], strides = [1, 1]} : vector<8x128xf32> to vector<8x32xf32>
    %512 = math.tanh %511 : vector<8x32xf32>
    %513 = arith.mulf %510, %512 : vector<8x32xf32>
    %514 = arith.truncf %513 : vector<8x32xf32> to vector<8x32xbf16>
    %c8_168 = arith.constant 8 : index
    %c0_169 = arith.constant 0 : index
    %515 = vector.load %arg23[%c8_168, %c0_169] : memref<64x32xf32, #tpu.memory_space<vmem>>, vector<8x32xf32>
    tpu.vector_store %arg23[%c8_168, %c0_169], %513 {strides = array<i32>} : memref<64x32xf32, #tpu.memory_space<vmem>>, vector<8x32xf32>,
    %516 = vector.extract_strided_slice %477 {offsets = [16, 0], sizes = [8, 128], strides = [1, 1]} : vector<64x128xf32> to vector<8x128xf32>
    %cst_170 = arith.constant dense<0.000000e+00> : vector<8x128xf32>
    %517 = tpu.matmul %514, %471, %cst_170 {dimension_numbers = #tpu.dot_dimension_numbers<[1], [0], [0], [1], [0, 0, 1, 1], [], []>} : vector<8x32xbf16>, vector<32x128xbf16>, vector<8x128xf32> -> vector<8x128xf32>
    %518 = arith.addf %516, %517 : vector<8x128xf32>
    %519 = arith.mulf %2, %518 : vector<8x128xf32>
    %520 = math.tanh %519 : vector<8x128xf32>
    %521 = arith.mulf %5, %520 : vector<8x128xf32>
    %522 = arith.addf %521, %8 : vector<8x128xf32>
    %c64_i32_171 = arith.constant 64 : i32
    %523 = tpu.dynamic_rotate %522 by %c64_i32_171 dim 1 : vector<8x128xf32>, i32 -> vector<8x128xf32>
    %524 = arith.select %11, %509, %523 : vector<8x128xi1>, vector<8x128xf32>
    %525 = arith.mulf %522, %524 : vector<8x128xf32>
    %c32_i32_172 = arith.constant 32 : i32
    %526 = tpu.dynamic_rotate %525 by %c32_i32_172 dim 1 : vector<8x128xf32>, i32 -> vector<8x128xf32>
    %527 = arith.addf %525, %526 : vector<8x128xf32>
    %528 = vector.extract_strided_slice %523 {offsets = [0, 0], sizes = [8, 32], strides = [1, 1]} : vector<8x128xf32> to vector<8x32xf32>
    %529 = vector.extract_strided_slice %527 {offsets = [0, 0], sizes = [8, 32], strides = [1, 1]} : vector<8x128xf32> to vector<8x32xf32>
    %530 = math.tanh %529 : vector<8x32xf32>
    %531 = arith.mulf %528, %530 : vector<8x32xf32>
    %532 = arith.truncf %531 : vector<8x32xf32> to vector<8x32xbf16>
    %c16_173 = arith.constant 16 : index
    %c0_174 = arith.constant 0 : index
    %533 = vector.load %arg23[%c16_173, %c0_174] : memref<64x32xf32, #tpu.memory_space<vmem>>, vector<8x32xf32>
    tpu.vector_store %arg23[%c16_173, %c0_174], %531 {strides = array<i32>} : memref<64x32xf32, #tpu.memory_space<vmem>>, vector<8x32xf32>,
    %534 = vector.extract_strided_slice %477 {offsets = [24, 0], sizes = [8, 128], strides = [1, 1]} : vector<64x128xf32> to vector<8x128xf32>
    %cst_175 = arith.constant dense<0.000000e+00> : vector<8x128xf32>
    %535 = tpu.matmul %532, %471, %cst_175 {dimension_numbers = #tpu.dot_dimension_numbers<[1], [0], [0], [1], [0, 0, 1, 1], [], []>} : vector<8x32xbf16>, vector<32x128xbf16>, vector<8x128xf32> -> vector<8x128xf32>
    %536 = arith.addf %534, %535 : vector<8x128xf32>
    %537 = arith.mulf %2, %536 : vector<8x128xf32>
    %538 = math.tanh %537 : vector<8x128xf32>
    %539 = arith.mulf %5, %538 : vector<8x128xf32>
    %540 = arith.addf %539, %8 : vector<8x128xf32>
    %c64_i32_176 = arith.constant 64 : i32
    %541 = tpu.dynamic_rotate %540 by %c64_i32_176 dim 1 : vector<8x128xf32>, i32 -> vector<8x128xf32>
    %542 = arith.select %11, %527, %541 : vector<8x128xi1>, vector<8x128xf32>
    %543 = arith.mulf %540, %542 : vector<8x128xf32>
    %c32_i32_177 = arith.constant 32 : i32
    %544 = tpu.dynamic_rotate %543 by %c32_i32_177 dim 1 : vector<8x128xf32>, i32 -> vector<8x128xf32>
    %545 = arith.addf %543, %544 : vector<8x128xf32>
    %546 = vector.extract_strided_slice %541 {offsets = [0, 0], sizes = [8, 32], strides = [1, 1]} : vector<8x128xf32> to vector<8x32xf32>
    %547 = vector.extract_strided_slice %545 {offsets = [0, 0], sizes = [8, 32], strides = [1, 1]} : vector<8x128xf32> to vector<8x32xf32>
    %548 = math.tanh %547 : vector<8x32xf32>
    %549 = arith.mulf %546, %548 : vector<8x32xf32>
    %550 = arith.truncf %549 : vector<8x32xf32> to vector<8x32xbf16>
    %c24_178 = arith.constant 24 : index
    %c0_179 = arith.constant 0 : index
    %551 = vector.load %arg23[%c24_178, %c0_179] : memref<64x32xf32, #tpu.memory_space<vmem>>, vector<8x32xf32>
    tpu.vector_store %arg23[%c24_178, %c0_179], %549 {strides = array<i32>} : memref<64x32xf32, #tpu.memory_space<vmem>>, vector<8x32xf32>,
    %552 = vector.extract_strided_slice %477 {offsets = [32, 0], sizes = [8, 128], strides = [1, 1]} : vector<64x128xf32> to vector<8x128xf32>
    %cst_180 = arith.constant dense<0.000000e+00> : vector<8x128xf32>
    %553 = tpu.matmul %550, %471, %cst_180 {dimension_numbers = #tpu.dot_dimension_numbers<[1], [0], [0], [1], [0, 0, 1, 1], [], []>} : vector<8x32xbf16>, vector<32x128xbf16>, vector<8x128xf32> -> vector<8x128xf32>
    %554 = arith.addf %552, %553 : vector<8x128xf32>
    %555 = arith.mulf %2, %554 : vector<8x128xf32>
    %556 = math.tanh %555 : vector<8x128xf32>
    %557 = arith.mulf %5, %556 : vector<8x128xf32>
    %558 = arith.addf %557, %8 : vector<8x128xf32>
    %c64_i32_181 = arith.constant 64 : i32
    %559 = tpu.dynamic_rotate %558 by %c64_i32_181 dim 1 : vector<8x128xf32>, i32 -> vector<8x128xf32>
    %560 = arith.select %11, %545, %559 : vector<8x128xi1>, vector<8x128xf32>
    %561 = arith.mulf %558, %560 : vector<8x128xf32>
    %c32_i32_182 = arith.constant 32 : i32
    %562 = tpu.dynamic_rotate %561 by %c32_i32_182 dim 1 : vector<8x128xf32>, i32 -> vector<8x128xf32>
    %563 = arith.addf %561, %562 : vector<8x128xf32>
    %564 = vector.extract_strided_slice %559 {offsets = [0, 0], sizes = [8, 32], strides = [1, 1]} : vector<8x128xf32> to vector<8x32xf32>
    %565 = vector.extract_strided_slice %563 {offsets = [0, 0], sizes = [8, 32], strides = [1, 1]} : vector<8x128xf32> to vector<8x32xf32>
    %566 = math.tanh %565 : vector<8x32xf32>
    %567 = arith.mulf %564, %566 : vector<8x32xf32>
    %568 = arith.truncf %567 : vector<8x32xf32> to vector<8x32xbf16>
    %c32_183 = arith.constant 32 : index
    %c0_184 = arith.constant 0 : index
    %569 = vector.load %arg23[%c32_183, %c0_184] : memref<64x32xf32, #tpu.memory_space<vmem>>, vector<8x32xf32>
    tpu.vector_store %arg23[%c32_183, %c0_184], %567 {strides = array<i32>} : memref<64x32xf32, #tpu.memory_space<vmem>>, vector<8x32xf32>,
    %570 = vector.extract_strided_slice %477 {offsets = [40, 0], sizes = [8, 128], strides = [1, 1]} : vector<64x128xf32> to vector<8x128xf32>
    %cst_185 = arith.constant dense<0.000000e+00> : vector<8x128xf32>
    %571 = tpu.matmul %568, %471, %cst_185 {dimension_numbers = #tpu.dot_dimension_numbers<[1], [0], [0], [1], [0, 0, 1, 1], [], []>} : vector<8x32xbf16>, vector<32x128xbf16>, vector<8x128xf32> -> vector<8x128xf32>
    %572 = arith.addf %570, %571 : vector<8x128xf32>
    %573 = arith.mulf %2, %572 : vector<8x128xf32>
    %574 = math.tanh %573 : vector<8x128xf32>
    %575 = arith.mulf %5, %574 : vector<8x128xf32>
    %576 = arith.addf %575, %8 : vector<8x128xf32>
    %c64_i32_186 = arith.constant 64 : i32
    %577 = tpu.dynamic_rotate %576 by %c64_i32_186 dim 1 : vector<8x128xf32>, i32 -> vector<8x128xf32>
    %578 = arith.select %11, %563, %577 : vector<8x128xi1>, vector<8x128xf32>
    %579 = arith.mulf %576, %578 : vector<8x128xf32>
    %c32_i32_187 = arith.constant 32 : i32
    %580 = tpu.dynamic_rotate %579 by %c32_i32_187 dim 1 : vector<8x128xf32>, i32 -> vector<8x128xf32>
    %581 = arith.addf %579, %580 : vector<8x128xf32>
    %582 = vector.extract_strided_slice %577 {offsets = [0, 0], sizes = [8, 32], strides = [1, 1]} : vector<8x128xf32> to vector<8x32xf32>
    %583 = vector.extract_strided_slice %581 {offsets = [0, 0], sizes = [8, 32], strides = [1, 1]} : vector<8x128xf32> to vector<8x32xf32>
    %584 = math.tanh %583 : vector<8x32xf32>
    %585 = arith.mulf %582, %584 : vector<8x32xf32>
    %586 = arith.truncf %585 : vector<8x32xf32> to vector<8x32xbf16>
    %c40_188 = arith.constant 40 : index
    %c0_189 = arith.constant 0 : index
    %587 = vector.load %arg23[%c40_188, %c0_189] : memref<64x32xf32, #tpu.memory_space<vmem>>, vector<8x32xf32>
    tpu.vector_store %arg23[%c40_188, %c0_189], %585 {strides = array<i32>} : memref<64x32xf32, #tpu.memory_space<vmem>>, vector<8x32xf32>,
    %588 = vector.extract_strided_slice %477 {offsets = [48, 0], sizes = [8, 128], strides = [1, 1]} : vector<64x128xf32> to vector<8x128xf32>
    %cst_190 = arith.constant dense<0.000000e+00> : vector<8x128xf32>
    %589 = tpu.matmul %586, %471, %cst_190 {dimension_numbers = #tpu.dot_dimension_numbers<[1], [0], [0], [1], [0, 0, 1, 1], [], []>} : vector<8x32xbf16>, vector<32x128xbf16>, vector<8x128xf32> -> vector<8x128xf32>
    %590 = arith.addf %588, %589 : vector<8x128xf32>
    %591 = arith.mulf %2, %590 : vector<8x128xf32>
    %592 = math.tanh %591 : vector<8x128xf32>
    %593 = arith.mulf %5, %592 : vector<8x128xf32>
    %594 = arith.addf %593, %8 : vector<8x128xf32>
    %c64_i32_191 = arith.constant 64 : i32
    %595 = tpu.dynamic_rotate %594 by %c64_i32_191 dim 1 : vector<8x128xf32>, i32 -> vector<8x128xf32>
    %596 = arith.select %11, %581, %595 : vector<8x128xi1>, vector<8x128xf32>
    %597 = arith.mulf %594, %596 : vector<8x128xf32>
    %c32_i32_192 = arith.constant 32 : i32
    %598 = tpu.dynamic_rotate %597 by %c32_i32_192 dim 1 : vector<8x128xf32>, i32 -> vector<8x128xf32>
    %599 = arith.addf %597, %598 : vector<8x128xf32>
    %600 = vector.extract_strided_slice %595 {offsets = [0, 0], sizes = [8, 32], strides = [1, 1]} : vector<8x128xf32> to vector<8x32xf32>
    %601 = vector.extract_strided_slice %599 {offsets = [0, 0], sizes = [8, 32], strides = [1, 1]} : vector<8x128xf32> to vector<8x32xf32>
    %602 = math.tanh %601 : vector<8x32xf32>
    %603 = arith.mulf %600, %602 : vector<8x32xf32>
    %604 = arith.truncf %603 : vector<8x32xf32> to vector<8x32xbf16>
    %c48_193 = arith.constant 48 : index
    %c0_194 = arith.constant 0 : index
    %605 = vector.load %arg23[%c48_193, %c0_194] : memref<64x32xf32, #tpu.memory_space<vmem>>, vector<8x32xf32>
    tpu.vector_store %arg23[%c48_193, %c0_194], %603 {strides = array<i32>} : memref<64x32xf32, #tpu.memory_space<vmem>>, vector<8x32xf32>,
    %606 = vector.extract_strided_slice %477 {offsets = [56, 0], sizes = [8, 128], strides = [1, 1]} : vector<64x128xf32> to vector<8x128xf32>
    %cst_195 = arith.constant dense<0.000000e+00> : vector<8x128xf32>
    %607 = tpu.matmul %604, %471, %cst_195 {dimension_numbers = #tpu.dot_dimension_numbers<[1], [0], [0], [1], [0, 0, 1, 1], [], []>} : vector<8x32xbf16>, vector<32x128xbf16>, vector<8x128xf32> -> vector<8x128xf32>
    %608 = arith.addf %606, %607 : vector<8x128xf32>
    %609 = arith.mulf %2, %608 : vector<8x128xf32>
    %610 = math.tanh %609 : vector<8x128xf32>
    %611 = arith.mulf %5, %610 : vector<8x128xf32>
    %612 = arith.addf %611, %8 : vector<8x128xf32>
    %c64_i32_196 = arith.constant 64 : i32
    %613 = tpu.dynamic_rotate %612 by %c64_i32_196 dim 1 : vector<8x128xf32>, i32 -> vector<8x128xf32>
    %614 = arith.select %11, %599, %613 : vector<8x128xi1>, vector<8x128xf32>
    %615 = arith.mulf %612, %614 : vector<8x128xf32>
    %c32_i32_197 = arith.constant 32 : i32
    %616 = tpu.dynamic_rotate %615 by %c32_i32_197 dim 1 : vector<8x128xf32>, i32 -> vector<8x128xf32>
    %617 = arith.addf %615, %616 : vector<8x128xf32>
    %618 = vector.extract_strided_slice %613 {offsets = [0, 0], sizes = [8, 32], strides = [1, 1]} : vector<8x128xf32> to vector<8x32xf32>
    %619 = vector.extract_strided_slice %617 {offsets = [0, 0], sizes = [8, 32], strides = [1, 1]} : vector<8x128xf32> to vector<8x32xf32>
    %620 = math.tanh %619 : vector<8x32xf32>
    %621 = arith.mulf %618, %620 : vector<8x32xf32>
    %c56_198 = arith.constant 56 : index
    %c0_199 = arith.constant 0 : index
    %622 = vector.load %arg23[%c56_198, %c0_199] : memref<64x32xf32, #tpu.memory_space<vmem>>, vector<8x32xf32>
    tpu.vector_store %arg23[%c56_198, %c0_199], %621 {strides = array<i32>} : memref<64x32xf32, #tpu.memory_space<vmem>>, vector<8x32xf32>,
    %c0_200 = arith.constant 0 : index
    %c0_201 = arith.constant 0 : index
    %623 = vector.load %arg13[%c0_200, %c0_201] : memref<32x128xbf16, #tpu.memory_space<vmem>>, vector<32x128xbf16>
    %c0_202 = arith.constant 0 : index
    %c0_203 = arith.constant 0 : index
    %624 = vector.load %arg14[%c0_202, %c0_203] : memref<32x128xbf16, #tpu.memory_space<vmem>>, vector<32x128xbf16>
    %c0_204 = arith.constant 0 : index
    %c0_205 = arith.constant 0 : index
    %625 = vector.load %arg15[%c0_204, %c0_205] : memref<1x128xf32, #tpu.memory_space<vmem>>, vector<1x128xf32>
    %c0_206 = arith.constant 0 : index
    %c0_207 = arith.constant 0 : index
    %626 = vector.load %arg23[%c0_206, %c0_207] : memref<64x32xf32, #tpu.memory_space<vmem>>, vector<64x32xf32>
    %627 = arith.truncf %626 : vector<64x32xf32> to vector<64x32xbf16>
    %cst_208 = arith.constant dense<0.000000e+00> : vector<64x128xf32>
    %628 = tpu.matmul %627, %623, %cst_208 {dimension_numbers = #tpu.dot_dimension_numbers<[1], [0], [0], [1], [0, 0, 1, 1], [], []>} : vector<64x32xbf16>, vector<32x128xbf16>, vector<64x128xf32> -> vector<64x128xf32>
    %629 = vector.broadcast %625 : vector<1x128xf32> to vector<64x128xf32>
    %630 = arith.addf %628, %629 : vector<64x128xf32>
    %cst_209 = arith.constant 0.000000e+00 : f32
    %631 = vector.broadcast %cst_209 : f32 to vector<8x128xf32>
    %cst_210 = arith.constant 0.000000e+00 : bf16
    %632 = vector.broadcast %cst_210 : bf16 to vector<8x32xbf16>
    %633 = vector.extract_strided_slice %630 {offsets = [0, 0], sizes = [8, 128], strides = [1, 1]} : vector<64x128xf32> to vector<8x128xf32>
    %cst_211 = arith.constant dense<0.000000e+00> : vector<8x128xf32>
    %634 = tpu.matmul %632, %624, %cst_211 {dimension_numbers = #tpu.dot_dimension_numbers<[1], [0], [0], [1], [0, 0, 1, 1], [], []>} : vector<8x32xbf16>, vector<32x128xbf16>, vector<8x128xf32> -> vector<8x128xf32>
    %635 = arith.addf %633, %634 : vector<8x128xf32>
    %636 = arith.mulf %2, %635 : vector<8x128xf32>
    %637 = math.tanh %636 : vector<8x128xf32>
    %638 = arith.mulf %5, %637 : vector<8x128xf32>
    %639 = arith.addf %638, %8 : vector<8x128xf32>
    %c64_i32_212 = arith.constant 64 : i32
    %640 = tpu.dynamic_rotate %639 by %c64_i32_212 dim 1 : vector<8x128xf32>, i32 -> vector<8x128xf32>
    %641 = arith.select %11, %631, %640 : vector<8x128xi1>, vector<8x128xf32>
    %642 = arith.mulf %639, %641 : vector<8x128xf32>
    %c32_i32_213 = arith.constant 32 : i32
    %643 = tpu.dynamic_rotate %642 by %c32_i32_213 dim 1 : vector<8x128xf32>, i32 -> vector<8x128xf32>
    %644 = arith.addf %642, %643 : vector<8x128xf32>
    %645 = vector.extract_strided_slice %640 {offsets = [0, 0], sizes = [8, 32], strides = [1, 1]} : vector<8x128xf32> to vector<8x32xf32>
    %646 = vector.extract_strided_slice %644 {offsets = [0, 0], sizes = [8, 32], strides = [1, 1]} : vector<8x128xf32> to vector<8x32xf32>
    %647 = math.tanh %646 : vector<8x32xf32>
    %648 = arith.mulf %645, %647 : vector<8x32xf32>
    %649 = arith.truncf %648 : vector<8x32xf32> to vector<8x32xbf16>
    %650 = vector.extract_strided_slice %630 {offsets = [8, 0], sizes = [8, 128], strides = [1, 1]} : vector<64x128xf32> to vector<8x128xf32>
    %cst_214 = arith.constant dense<0.000000e+00> : vector<8x128xf32>
    %651 = tpu.matmul %649, %624, %cst_214 {dimension_numbers = #tpu.dot_dimension_numbers<[1], [0], [0], [1], [0, 0, 1, 1], [], []>} : vector<8x32xbf16>, vector<32x128xbf16>, vector<8x128xf32> -> vector<8x128xf32>
    %652 = arith.addf %650, %651 : vector<8x128xf32>
    %653 = arith.mulf %2, %652 : vector<8x128xf32>
    %654 = math.tanh %653 : vector<8x128xf32>
    %655 = arith.mulf %5, %654 : vector<8x128xf32>
    %656 = arith.addf %655, %8 : vector<8x128xf32>
    %c64_i32_215 = arith.constant 64 : i32
    %657 = tpu.dynamic_rotate %656 by %c64_i32_215 dim 1 : vector<8x128xf32>, i32 -> vector<8x128xf32>
    %658 = arith.select %11, %644, %657 : vector<8x128xi1>, vector<8x128xf32>
    %659 = arith.mulf %656, %658 : vector<8x128xf32>
    %c32_i32_216 = arith.constant 32 : i32
    %660 = tpu.dynamic_rotate %659 by %c32_i32_216 dim 1 : vector<8x128xf32>, i32 -> vector<8x128xf32>
    %661 = arith.addf %659, %660 : vector<8x128xf32>
    %662 = vector.extract_strided_slice %657 {offsets = [0, 0], sizes = [8, 32], strides = [1, 1]} : vector<8x128xf32> to vector<8x32xf32>
    %663 = vector.extract_strided_slice %661 {offsets = [0, 0], sizes = [8, 32], strides = [1, 1]} : vector<8x128xf32> to vector<8x32xf32>
    %664 = math.tanh %663 : vector<8x32xf32>
    %665 = arith.mulf %662, %664 : vector<8x32xf32>
    %666 = arith.truncf %665 : vector<8x32xf32> to vector<8x32xbf16>
    %667 = vector.extract_strided_slice %630 {offsets = [16, 0], sizes = [8, 128], strides = [1, 1]} : vector<64x128xf32> to vector<8x128xf32>
    %cst_217 = arith.constant dense<0.000000e+00> : vector<8x128xf32>
    %668 = tpu.matmul %666, %624, %cst_217 {dimension_numbers = #tpu.dot_dimension_numbers<[1], [0], [0], [1], [0, 0, 1, 1], [], []>} : vector<8x32xbf16>, vector<32x128xbf16>, vector<8x128xf32> -> vector<8x128xf32>
    %669 = arith.addf %667, %668 : vector<8x128xf32>
    %670 = arith.mulf %2, %669 : vector<8x128xf32>
    %671 = math.tanh %670 : vector<8x128xf32>
    %672 = arith.mulf %5, %671 : vector<8x128xf32>
    %673 = arith.addf %672, %8 : vector<8x128xf32>
    %c64_i32_218 = arith.constant 64 : i32
    %674 = tpu.dynamic_rotate %673 by %c64_i32_218 dim 1 : vector<8x128xf32>, i32 -> vector<8x128xf32>
    %675 = arith.select %11, %661, %674 : vector<8x128xi1>, vector<8x128xf32>
    %676 = arith.mulf %673, %675 : vector<8x128xf32>
    %c32_i32_219 = arith.constant 32 : i32
    %677 = tpu.dynamic_rotate %676 by %c32_i32_219 dim 1 : vector<8x128xf32>, i32 -> vector<8x128xf32>
    %678 = arith.addf %676, %677 : vector<8x128xf32>
    %679 = vector.extract_strided_slice %674 {offsets = [0, 0], sizes = [8, 32], strides = [1, 1]} : vector<8x128xf32> to vector<8x32xf32>
    %680 = vector.extract_strided_slice %678 {offsets = [0, 0], sizes = [8, 32], strides = [1, 1]} : vector<8x128xf32> to vector<8x32xf32>
    %681 = math.tanh %680 : vector<8x32xf32>
    %682 = arith.mulf %679, %681 : vector<8x32xf32>
    %683 = arith.truncf %682 : vector<8x32xf32> to vector<8x32xbf16>
    %684 = vector.extract_strided_slice %630 {offsets = [24, 0], sizes = [8, 128], strides = [1, 1]} : vector<64x128xf32> to vector<8x128xf32>
    %cst_220 = arith.constant dense<0.000000e+00> : vector<8x128xf32>
    %685 = tpu.matmul %683, %624, %cst_220 {dimension_numbers = #tpu.dot_dimension_numbers<[1], [0], [0], [1], [0, 0, 1, 1], [], []>} : vector<8x32xbf16>, vector<32x128xbf16>, vector<8x128xf32> -> vector<8x128xf32>
    %686 = arith.addf %684, %685 : vector<8x128xf32>
    %687 = arith.mulf %2, %686 : vector<8x128xf32>
    %688 = math.tanh %687 : vector<8x128xf32>
    %689 = arith.mulf %5, %688 : vector<8x128xf32>
    %690 = arith.addf %689, %8 : vector<8x128xf32>
    %c64_i32_221 = arith.constant 64 : i32
    %691 = tpu.dynamic_rotate %690 by %c64_i32_221 dim 1 : vector<8x128xf32>, i32 -> vector<8x128xf32>
    %692 = arith.select %11, %678, %691 : vector<8x128xi1>, vector<8x128xf32>
    %693 = arith.mulf %690, %692 : vector<8x128xf32>
    %c32_i32_222 = arith.constant 32 : i32
    %694 = tpu.dynamic_rotate %693 by %c32_i32_222 dim 1 : vector<8x128xf32>, i32 -> vector<8x128xf32>
    %695 = arith.addf %693, %694 : vector<8x128xf32>
    %696 = vector.extract_strided_slice %691 {offsets = [0, 0], sizes = [8, 32], strides = [1, 1]} : vector<8x128xf32> to vector<8x32xf32>
    %697 = vector.extract_strided_slice %695 {offsets = [0, 0], sizes = [8, 32], strides = [1, 1]} : vector<8x128xf32> to vector<8x32xf32>
    %698 = math.tanh %697 : vector<8x32xf32>
    %699 = arith.mulf %696, %698 : vector<8x32xf32>
    %700 = arith.truncf %699 : vector<8x32xf32> to vector<8x32xbf16>
    %701 = vector.extract_strided_slice %630 {offsets = [32, 0], sizes = [8, 128], strides = [1, 1]} : vector<64x128xf32> to vector<8x128xf32>
    %cst_223 = arith.constant dense<0.000000e+00> : vector<8x128xf32>
    %702 = tpu.matmul %700, %624, %cst_223 {dimension_numbers = #tpu.dot_dimension_numbers<[1], [0], [0], [1], [0, 0, 1, 1], [], []>} : vector<8x32xbf16>, vector<32x128xbf16>, vector<8x128xf32> -> vector<8x128xf32>
    %703 = arith.addf %701, %702 : vector<8x128xf32>
    %704 = arith.mulf %2, %703 : vector<8x128xf32>
    %705 = math.tanh %704 : vector<8x128xf32>
    %706 = arith.mulf %5, %705 : vector<8x128xf32>
    %707 = arith.addf %706, %8 : vector<8x128xf32>
    %c64_i32_224 = arith.constant 64 : i32
    %708 = tpu.dynamic_rotate %707 by %c64_i32_224 dim 1 : vector<8x128xf32>, i32 -> vector<8x128xf32>
    %709 = arith.select %11, %695, %708 : vector<8x128xi1>, vector<8x128xf32>
    %710 = arith.mulf %707, %709 : vector<8x128xf32>
    %c32_i32_225 = arith.constant 32 : i32
    %711 = tpu.dynamic_rotate %710 by %c32_i32_225 dim 1 : vector<8x128xf32>, i32 -> vector<8x128xf32>
    %712 = arith.addf %710, %711 : vector<8x128xf32>
    %713 = vector.extract_strided_slice %708 {offsets = [0, 0], sizes = [8, 32], strides = [1, 1]} : vector<8x128xf32> to vector<8x32xf32>
    %714 = vector.extract_strided_slice %712 {offsets = [0, 0], sizes = [8, 32], strides = [1, 1]} : vector<8x128xf32> to vector<8x32xf32>
    %715 = math.tanh %714 : vector<8x32xf32>
    %716 = arith.mulf %713, %715 : vector<8x32xf32>
    %717 = arith.truncf %716 : vector<8x32xf32> to vector<8x32xbf16>
    %718 = vector.extract_strided_slice %630 {offsets = [40, 0], sizes = [8, 128], strides = [1, 1]} : vector<64x128xf32> to vector<8x128xf32>
    %cst_226 = arith.constant dense<0.000000e+00> : vector<8x128xf32>
    %719 = tpu.matmul %717, %624, %cst_226 {dimension_numbers = #tpu.dot_dimension_numbers<[1], [0], [0], [1], [0, 0, 1, 1], [], []>} : vector<8x32xbf16>, vector<32x128xbf16>, vector<8x128xf32> -> vector<8x128xf32>
    %720 = arith.addf %718, %719 : vector<8x128xf32>
    %721 = arith.mulf %2, %720 : vector<8x128xf32>
    %722 = math.tanh %721 : vector<8x128xf32>
    %723 = arith.mulf %5, %722 : vector<8x128xf32>
    %724 = arith.addf %723, %8 : vector<8x128xf32>
    %c64_i32_227 = arith.constant 64 : i32
    %725 = tpu.dynamic_rotate %724 by %c64_i32_227 dim 1 : vector<8x128xf32>, i32 -> vector<8x128xf32>
    %726 = arith.select %11, %712, %725 : vector<8x128xi1>, vector<8x128xf32>
    %727 = arith.mulf %724, %726 : vector<8x128xf32>
    %c32_i32_228 = arith.constant 32 : i32
    %728 = tpu.dynamic_rotate %727 by %c32_i32_228 dim 1 : vector<8x128xf32>, i32 -> vector<8x128xf32>
    %729 = arith.addf %727, %728 : vector<8x128xf32>
    %730 = vector.extract_strided_slice %725 {offsets = [0, 0], sizes = [8, 32], strides = [1, 1]} : vector<8x128xf32> to vector<8x32xf32>
    %731 = vector.extract_strided_slice %729 {offsets = [0, 0], sizes = [8, 32], strides = [1, 1]} : vector<8x128xf32> to vector<8x32xf32>
    %732 = math.tanh %731 : vector<8x32xf32>
    %733 = arith.mulf %730, %732 : vector<8x32xf32>
    %734 = arith.truncf %733 : vector<8x32xf32> to vector<8x32xbf16>
    %735 = vector.extract_strided_slice %630 {offsets = [48, 0], sizes = [8, 128], strides = [1, 1]} : vector<64x128xf32> to vector<8x128xf32>
    %cst_229 = arith.constant dense<0.000000e+00> : vector<8x128xf32>
    %736 = tpu.matmul %734, %624, %cst_229 {dimension_numbers = #tpu.dot_dimension_numbers<[1], [0], [0], [1], [0, 0, 1, 1], [], []>} : vector<8x32xbf16>, vector<32x128xbf16>, vector<8x128xf32> -> vector<8x128xf32>
    %737 = arith.addf %735, %736 : vector<8x128xf32>
    %738 = arith.mulf %2, %737 : vector<8x128xf32>
    %739 = math.tanh %738 : vector<8x128xf32>
    %740 = arith.mulf %5, %739 : vector<8x128xf32>
    %741 = arith.addf %740, %8 : vector<8x128xf32>
    %c64_i32_230 = arith.constant 64 : i32
    %742 = tpu.dynamic_rotate %741 by %c64_i32_230 dim 1 : vector<8x128xf32>, i32 -> vector<8x128xf32>
    %743 = arith.select %11, %729, %742 : vector<8x128xi1>, vector<8x128xf32>
    %744 = arith.mulf %741, %743 : vector<8x128xf32>
    %c32_i32_231 = arith.constant 32 : i32
    %745 = tpu.dynamic_rotate %744 by %c32_i32_231 dim 1 : vector<8x128xf32>, i32 -> vector<8x128xf32>
    %746 = arith.addf %744, %745 : vector<8x128xf32>
    %747 = vector.extract_strided_slice %742 {offsets = [0, 0], sizes = [8, 32], strides = [1, 1]} : vector<8x128xf32> to vector<8x32xf32>
    %748 = vector.extract_strided_slice %746 {offsets = [0, 0], sizes = [8, 32], strides = [1, 1]} : vector<8x128xf32> to vector<8x32xf32>
    %749 = math.tanh %748 : vector<8x32xf32>
    %750 = arith.mulf %747, %749 : vector<8x32xf32>
    %751 = arith.truncf %750 : vector<8x32xf32> to vector<8x32xbf16>
    %752 = vector.extract_strided_slice %630 {offsets = [56, 0], sizes = [8, 128], strides = [1, 1]} : vector<64x128xf32> to vector<8x128xf32>
    %cst_232 = arith.constant dense<0.000000e+00> : vector<8x128xf32>
    %753 = tpu.matmul %751, %624, %cst_232 {dimension_numbers = #tpu.dot_dimension_numbers<[1], [0], [0], [1], [0, 0, 1, 1], [], []>} : vector<8x32xbf16>, vector<32x128xbf16>, vector<8x128xf32> -> vector<8x128xf32>
    %754 = arith.addf %752, %753 : vector<8x128xf32>
    %755 = arith.mulf %2, %754 : vector<8x128xf32>
    %756 = math.tanh %755 : vector<8x128xf32>
    %757 = arith.mulf %5, %756 : vector<8x128xf32>
    %758 = arith.addf %757, %8 : vector<8x128xf32>
    %c64_i32_233 = arith.constant 64 : i32
    %759 = tpu.dynamic_rotate %758 by %c64_i32_233 dim 1 : vector<8x128xf32>, i32 -> vector<8x128xf32>
    %760 = arith.select %11, %746, %759 : vector<8x128xi1>, vector<8x128xf32>
    %761 = arith.mulf %758, %760 : vector<8x128xf32>
    %c32_i32_234 = arith.constant 32 : i32
    %762 = tpu.dynamic_rotate %761 by %c32_i32_234 dim 1 : vector<8x128xf32>, i32 -> vector<8x128xf32>
    %763 = arith.addf %761, %762 : vector<8x128xf32>
    %764 = vector.extract_strided_slice %759 {offsets = [0, 0], sizes = [8, 32], strides = [1, 1]} : vector<8x128xf32> to vector<8x32xf32>
    %765 = vector.extract_strided_slice %763 {offsets = [0, 0], sizes = [8, 32], strides = [1, 1]} : vector<8x128xf32> to vector<8x32xf32>
    %766 = math.tanh %765 : vector<8x32xf32>
    %767 = arith.mulf %764, %766 : vector<8x32xf32>
    %768 = arith.truncf %767 : vector<8x32xf32> to vector<8x32xbf16>
    %c0_235 = arith.constant 0 : index
    %c0_236 = arith.constant 0 : index
    %769 = vector.load %arg16[%c0_235, %c0_236] : memref<32x128xbf16, #tpu.memory_space<vmem>>, vector<32x128xbf16>
    %cst_237 = arith.constant dense<0.000000e+00> : vector<8x128xf32>
    %770 = tpu.matmul %768, %769, %cst_237 {dimension_numbers = #tpu.dot_dimension_numbers<[1], [0], [0], [1], [0, 0, 1, 1], [], []>} : vector<8x32xbf16>, vector<32x128xbf16>, vector<8x128xf32> -> vector<8x128xf32>
    %c0_238 = arith.constant 0 : index
    %c0_239 = arith.constant 0 : index
    %771 = vector.load %arg17[%c0_238, %c0_239] : memref<1x128xf32, #tpu.memory_space<vmem>>, vector<1x128xf32>
    %772 = vector.broadcast %771 : vector<1x128xf32> to vector<8x128xf32>
    %773 = arith.addf %770, %772 : vector<8x128xf32>
    %c0_240 = arith.constant 0 : index
    %c0_241 = arith.constant 0 : index
    %774 = vector.load %arg21[%c0_240, %c0_241] : memref<8x128xf32, #tpu.memory_space<vmem>>, vector<8x128xf32>
    tpu.vector_store %arg21[%c0_240, %c0_241], %773 {strides = array<i32>} : memref<8x128xf32, #tpu.memory_space<vmem>>, vector<8x128xf32>,
    return
  }
}

</mosaic_0001>

<bundles_post_ra>
// kernel: lstm_classifier_forward.1
= control target key start
LH: loop header
LB: loop body
LE: loop exit
PB: predicated region body
PF: predicated region fallthrough
CT: control target
= control target key end

     0   :  { %v3974_v0 = vmov 0.0   ;;  %vm3975_vm0 = vmmov 0   ;;  %vm140_vm1 = vcmask 130048   ;;  %v3976_v6 = vmov 0   ;;  %s3978_s22 = smov 32   ;;  %s5019_s1 = inlined_call_operand.vmem [shape: bf16[16,128], index: 1, kind: input, shape index: {}]   ;;  %s5020_s2 = inlined_call_operand.vmem [shape: bf16[32,128], index: 2, kind: input, shape index: {}]   ;;  %s5021_s0 = inlined_call_operand.vmem [shape: bf16[64,16], index: 0, kind: input, shape index: {}]   ;;  %s5022_s3 = inlined_call_operand.vmem [shape: f32[1,128], index: 3, kind: input, shape index: {}]   ;;  %s5023_s18 = inlined_call_operand.vmem [shape: f32[1,128], index: 18, kind: input, shape index: {}, may-alias: {18,19}]   ;;  %s5024_s19 = inlined_call_operand.vmem [shape: f32[1,128], index: 19, kind: input, shape index: {}, may-alias: {18,19}]   ;;  %s5025_s20 = inlined_call_operand.vmem [shape: f32[1,128], index: 20, kind: input, shape index: {}]   ;;  %s5026_s4 = inlined_call_operand.vmem [shape: bf16[32,128], index: 4, kind: input, shape index: {}]   ;;  %s5027_s5 = inlined_call_operand.vmem [shape: bf16[32,128], index: 5, kind: input, shape index: {}]   ;;  %s5028_s6 = inlined_call_operand.vmem [shape: f32[1,128], index: 6, kind: input, shape index: {}]   ;;  %s5029_s7 = inlined_call_operand.vmem [shape: bf16[32,128], index: 7, kind: input, shape index: {}]   ;;  %s5030_s8 = inlined_call_operand.vmem [shape: bf16[32,128], index: 8, kind: input, shape index: {}]   ;;  %s5031_s9 = inlined_call_operand.vmem [shape: f32[1,128], index: 9, kind: input, shape index: {}]   ;;  %s5032_s10 = inlined_call_operand.vmem [shape: bf16[32,128], index: 10, kind: input, shape index: {}]   ;;  %s5033_s11 = inlined_call_operand.vmem [shape: bf16[32,128], index: 11, kind: input, shape index: {}]   ;;  %s5034_s12 = inlined_call_operand.vmem [shape: f32[1,128], index: 12, kind: input, shape index: {}]   ;;  %s5035_s13 = inlined_call_operand.vmem [shape: bf16[32,128], index: 13, kind: input, shape index: {}]   ;;  %s5036_s14 = inlined_call_operand.vmem [shape: bf16[32,128], index: 14, kind: input, shape index: {}]   ;;  %s5037_s15 = inlined_call_operand.vmem [shape: f32[1,128], index: 15, kind: input, shape index: {}]   ;;  %s5038_s16 = inlined_call_operand.vmem [shape: bf16[32,128], index: 16, kind: input, shape index: {}]   ;;  %s5039_s17 = inlined_call_operand.vmem [shape: f32[1,128], index: 17, kind: input, shape index: {}]   ;;  %s5040_s21 = inlined_call_operand.vmem [shape: f32[8,128], index: 21, kind: output, shape index: {}]  }
   0x1   :  { %5045 = sst [smem:[#allocation4_spill]] %s5019_s1  ;;  %3402 = vmatprep.subr.bf16.mxu1 %v3974_v0  ;;  %3406 = vmatprep.mubr.msk.bf16.mxu1 %vm3975_vm0, %v3974_v0  ;;  %v4153_v22 = vld [vmem:[%s5025_s20] ss:$0 sm:$0xff]  ;;  %v90_v25 = vlaneseq  ;;  %vm230_vm3 = vcmask 261120  }
   0x2   :  { %5046 = sst [smem:[#allocation5_spill]] %s5020_s2  ;;  %s5051_s26 = sld [smem:[#allocation4_spill]] }
   0x3   :  { %5047 = sst [smem:[#allocation6_spill]] %s5021_s0  ;;  %s5052_s28 = sld [smem:[#allocation5_spill]]  ;;  %v4158_v26 = vand.u32 127, %v90_v25 }
   0x4   :  { %5048 = sst [smem:[#allocation7_spill]] %s5022_s3 }
   0x5   :  { %5049 = sst [smem:[#allocation8_spill]] %s5023_s18  ;;  %s5053_s18 = sld [smem:[#allocation6_spill]]  ;;  %vm92_vm2 = vcmp.lt.s32.totalorder %v4158_v26, 32  ;;  %v3236_v26 = vld [vmem:[%s5039_s17] ss:$0 sm:$0xff] }
   0x6   :  { %5050 = sst [smem:[#allocation9_spill]] %s5024_s19  ;;  %s5054_s0 = sld [smem:[#allocation7_spill]] }
   0x7   :  { %s5055_s27 = sld [smem:[#allocation8_spill]]  ;;  %s5056_s29 = sld [smem:[#allocation9_spill]] }
   0x8   :  { %v3783_v1 = vld [vmem:[%s5051_s26] sm:$0xff]   ;;  %s3977_s19 = smov 64  }
   0x9   :  { %v4098_v2 = vld [vmem:[%s5052_s28] sm:$0xff]   ;;  %3392 = vmatprep.subr.bf16.mxu0 %v3783_v1  ;;  %v4112_v5 = vld [vmem:[%s5052_s28 + $0x8] sm:$0xff]  }
   0xa   :  { %3403 = vmatpush3.bf16.msra.mxu1 %v4098_v2  ;;  %3393 = vmatpush3.bf16.msra.mxu0 %v3783_v1 }
   0xb   :  { %v3785_v3 = vld [vmem:[%s5053_s18] sm:$0xff]   ;;  %v3786_v4 = vld [vmem:[%s5053_s18 + $0x8] sm:$0xff]   ;;  %3404 = vmatprep.subr.bf16.mxu1 %v3974_v0  ;;  %3418 = vmatprep.subr.bf16.mxu0 %v3974_v0  ;;  %v3788_v45 = vld [vmem:[%s5053_s18 + $0x10] sm:$0xff]  }
   0xc   :  { %3394 = vmatprep.mubr.msk.bf16.mxu0 %vm140_vm1, %v3785_v3  ;;  %v4132_v7 = vld [vmem:[%s5054_s0] ss:$0 sm:$0xff]  ;;  %v3789_v46 = vld [vmem:[%s5053_s18 + $0x18] sm:$0xff]  }
   0xd   :  { %3395 = vmatmul.mubr.msk.bf16.vlgmr.msra.gmra.mrb[0].mxu0 %vm140_vm1, %v3786_v4  ;;  %v4142_v13 = vld [vmem:[%s5055_s27] ss:$0 sm:$0xff] }
   0xe   :  { %3405 = vmatpush3.bf16.msra.mxu1 %v4112_v5  ;;  %3419 = vmatpush3.bf16.msra.mxu0 %v4098_v2  ;;  %v4148_v20 = vld [vmem:[%s5056_s29] ss:$0 sm:$0xff] }
   0xf   :  { %3410 = vmatprep.subr.bf16.mxu1 %v3974_v0  ;;  %3420 = vmatprep.subr.bf16.mxu0 %v3974_v0 }
  0x10   :  { %3398 = vmatprep.mubr.msk.bf16.mxu0 %vm140_vm1, %v3788_v45 }
  0x11   :  { %3407 = vmatmul.mubr.bf16.vlgmr.msra.gmra.mrb[0].mxu1 %v3976_v6 }
  0x12   :  { %3411 = vmatpush3.bf16.msra.mxu1 %v4098_v2  ;;  %3414 = vmatprep.mubr.msk.bf16.mxu1 %vm3975_vm0, %v3974_v0 }
  0x13   :  { %3412 = vmatprep.subr.bf16.mxu1 %v3974_v0  ;;  %3421 = vmatpush3.bf16.msra.mxu0 %v4112_v5 }
  0x14   :  { %3434 = vmatprep.subr.bf16.mxu0 %v3974_v0 }
  0x15   :  { %3399 = vmatmul.mubr.msk.bf16.gmra.mrb[4].mxu0 %vm140_vm1, %v3789_v46 }
  0x16   :  { %3413 = vmatpush3.bf16.msra.mxu1 %v4112_v5  ;;  %3422 = vmatprep.mubr.msk.bf16.mxu0 %vm3975_vm0, %v3974_v0 }
  0x17   :  { %3426 = vmatprep.subr.bf16.mxu1 %v3974_v0 }
  0xe0   :  { %v4134_v8 = vpop.f32.mrb[0].mxu0 }
  0xe1   :  { %v187_v9 = vpop.f32.mrb[1].mxu0  ;;  %v196_v59 = vadd.f32 %v4134_v8, %v4132_v7 }
  0xe2   :  { %v188_v10 = vadd.f32 %v4132_v7, %v187_v9  ;;  %v4137_v11 = vpop.f32.mrb[2].mxu0 }
  0xe3   :  { %v190_v12 = vpop.f32.mrb[3].mxu0 }
  0xe4   :  { %v268_v14 = vpop.f32.mrb[0].mxu1  ;;  %v191_v35 = vadd.f32 %v4132_v7, %v190_v12 }
  0xe5   :  { %v274_v15 = vadd.f32 %v268_v14, %v188_v10  ;;  %v3408_v16 = vpop.f32.mrb[1].mxu1 }
  0xe6   :  { %v271_v17 = vpop.f32.mrb[2].mxu1 }
  0xe7   :  { %v275_v18 = vmul.f32 %v4142_v13, %v274_v15  ;;  %v3409_v19 = vpop.f32.mrb[3].mxu1 }
  0xe8   :  { %v4198_v55 = vpop.f32.mrb[4].mxu0 }
  0xe9   :  { %3808 = vtanh.f32 %v275_v18  ;;  %v203_v56 = vpop.f32.mrb[5].mxu0 }
  0xea   :  { %v4200_v57 = vpop.f32.mrb[6].mxu0 }
  0xeb   :  { %v4202_v58 = vpop.f32.mrb[7].mxu0 }
  0xf3   :  { %v3809_v21 = vpop.eup %3808 }
  0xf4   :  { %v277_v23 = vmul.f32 %v3809_v21, %v4148_v20  ;;  %v199_v21 = vadd.f32 %v4137_v11, %v4132_v7 }
  0xf6   :  { %v278_v24 = vadd.f32 %v4153_v22, %v277_v23 }
  0xf8   :  { %279 = vrot.lane.b32.xlu0 %v278_v24, %s3977_s19 }
 0x16a   :  { %v280_v27 = vpop.permute.xlu0 %279 }
 0x16b   :  { %v281_v28 = vsel %vm92_vm2, 0.0, %v280_v27 }
 0x16c   :  { %v282_v29 = vmul.f32 %v281_v28, %v278_v24 }
 0x16e   :  { %283 = vrot.lane.b32.xlu0 %v282_v29, %s3978_s22 }
 0x1e0   :  { %v284_v30 = vpop.permute.xlu0 %283 }
 0x1e1   :  { %v285_v31 = vadd.f32 %v284_v30, %v282_v29 }
 0x1e3   :  { %3810 = vtanh.f32 %v285_v31 }
 0x1ed   :  { %v3811_v32 = vpop.eup %3810 }
 0x1ee   :  { %v287_v33 = vmul.f32 %v3811_v32, %v280_v27 }
 0x1f0   :  { %289 = vst.msk [vmem:[#allocation2] sm:$0xff] %vm230_vm3, %v287_v33  ;;  %v288_v34 = vpack.c.bf16 %v287_v33, %v287_v33 }
 0x1f2   :  { %3415 = vmatmul.mubr.msk.bf16.vlgmr.msra.gmra.mrb[4].mxu1 %vm230_vm3, %v288_v34 }
 0x1f3   :  { %3427 = vmatpush3.bf16.msra.mxu1 %v4098_v2  ;;  %3430 = vmatprep.mubr.msk.bf16.mxu1 %vm3975_vm0, %v3974_v0 }
 0x1f4   :  { %3428 = vmatprep.subr.bf16.mxu1 %v3974_v0 }
 0x1f7   :  { %3429 = vmatpush3.bf16.msra.mxu1 %v4112_v5 }
 0x1f8   :  { %3442 = vmatprep.subr.bf16.mxu1 %v3974_v0 }
 0x2c5   :  { %v327_v36 = vpop.f32.mrb[4].mxu1 }
 0x2c6   :  { %v333_v37 = vadd.f32 %v327_v36, %v191_v35  ;;  %v3416_v38 = vpop.f32.mrb[5].mxu1 }
 0x2c7   :  { %v330_v39 = vpop.f32.mrb[6].mxu1 }
 0x2c8   :  { %v334_v40 = vmul.f32 %v4142_v13, %v333_v37  ;;  %v3417_v41 = vpop.f32.mrb[7].mxu1 }
 0x2ca   :  { %3812 = vtanh.f32 %v334_v40  ;;  %v204_v40 = vadd.f32 %v4132_v7, %v203_v56 }
 0x2d4   :  { %v3813_v42 = vpop.eup %3812 }
 0x2d5   :  { %v336_v43 = vmul.f32 %v3813_v42, %v4148_v20 }
 0x2d7   :  { %v337_v44 = vadd.f32 %v4153_v22, %v336_v43 }
 0x2d9   :  { %338 = vrot.lane.b32.xlu1 %v337_v44, %s3977_s19 }
 0x34b   :  { %v339_v47 = vpop.permute.xlu1 %338 }
 0x34c   :  { %v340_v48 = vsel %vm92_vm2, %v285_v31, %v339_v47 }
 0x34d   :  { %v341_v49 = vmul.f32 %v340_v48, %v337_v44 }
 0x34f   :  { %342 = vrot.lane.b32.xlu1 %v341_v49, %s3978_s22 }
 0x3c1   :  { %v343_v50 = vpop.permute.xlu1 %342 }
 0x3c2   :  { %v344_v51 = vadd.f32 %v343_v50, %v341_v49 }
 0x3c4   :  { %3814 = vtanh.f32 %v344_v51 }
 0x3ce   :  { %v3815_v52 = vpop.eup %3814 }
 0x3cf   :  { %v346_v53 = vmul.f32 %v3815_v52, %v339_v47 }
 0x3d1   :  { %v347_v54 = vpack.c.bf16 %v346_v53, %v346_v53  ;;  %348 = vst.msk [vmem:[#allocation2 + $0x8] sm:$0xff] %vm230_vm3, %v346_v53 }
 0x3d3   :  { %3423 = vmatmul.mubr.msk.bf16.vlgmr.msra.gmra.mrb[8].mxu0 %vm230_vm3, %v347_v54 }
 0x3d4   :  { %3435 = vmatpush3.bf16.msra.mxu0 %v4098_v2  ;;  %3438 = vmatprep.mubr.msk.bf16.mxu0 %vm3975_vm0, %v3974_v0 }
 0x3d5   :  { %3436 = vmatprep.subr.bf16.mxu0 %v3974_v0 }
 0x3d8   :  { %3437 = vmatpush3.bf16.msra.mxu0 %v4112_v5 }
 0x3d9   :  { %3450 = vmatprep.subr.bf16.mxu0 %v3974_v0 }
 0x4a6   :  { %v386_v60 = vpop.f32.mrb[8].mxu0 }
 0x4a7   :  { %v392_v61 = vadd.f32 %v386_v60, %v196_v59  ;;  %v3424_v62 = vpop.f32.mrb[9].mxu0 }
 0x4a8   :  { %v389_v63 = vpop.f32.mrb[10].mxu0 }
 0x4a9   :  { %v393_v1 = vmul.f32 %v4142_v13, %v392_v61  ;;  %v3425_v3 = vpop.f32.mrb[11].mxu0  ;;  %v207_v61 = vadd.f32 %v4132_v7, %v4202_v58 }
 0x4ab   :  { %3816 = vtanh.f32 %v393_v1 }
 0x4b5   :  { %v3817_v4 = vpop.eup %3816 }
 0x4b6   :  { %v395_v9 = vmul.f32 %v3817_v4, %v4148_v20 }
 0x4b8   :  { %v396_v10 = vadd.f32 %v4153_v22, %v395_v9 }
 0x4ba   :  { %397 = vrot.lane.b32.xlu0 %v396_v10, %s3977_s19 }
 0x52c   :  { %v398_v12 = vpop.permute.xlu0 %397 }
 0x52d   :  { %v399_v14 = vsel %vm92_vm2, %v344_v51, %v398_v12 }
 0x52e   :  { %v400_v8 = vmul.f32 %v399_v14, %v396_v10 }
 0x530   :  { %401 = vrot.lane.b32.xlu1 %v400_v8, %s3978_s22 }
 0x5a2   :  { %v402_v15 = vpop.permute.xlu1 %401 }
 0x5a3   :  { %v403_v16 = vadd.f32 %v402_v15, %v400_v8  ;;  %v3790_v8 = vld [vmem:[%s5026_s4] sm:$0xff]  }
 0x5a5   :  { %3818 = vtanh.f32 %v403_v16 }
 0x5af   :  { %v3819_v17 = vpop.eup %3818 }
 0x5b0   :  { %v405_v18 = vmul.f32 %v3819_v17, %v398_v12 }
 0x5b2   :  { %407 = vst.msk [vmem:[#allocation2 + $0x10] sm:$0xff] %vm230_vm3, %v405_v18  ;;  %v406_v19 = vpack.c.bf16 %v405_v18, %v405_v18 }
 0x5b4   :  { %3431 = vmatmul.mubr.msk.bf16.vlgmr.msra.gmra.mrb[8].mxu1 %vm230_vm3, %v406_v19  ;;  %v712_v19 = vld [vmem:[#allocation2 + $0x8] sm:$0xff] }
 0x5b5   :  { %3443 = vmatpush3.bf16.msra.mxu1 %v4098_v2  ;;  %3446 = vmatprep.mubr.msk.bf16.mxu1 %vm3975_vm0, %v3974_v0 }
 0x5b6   :  { %3444 = vmatprep.subr.bf16.mxu1 %v3974_v0 }
 0x5b9   :  { %3445 = vmatpush3.bf16.msra.mxu1 %v4112_v5 }
 0x5ba   :  { %3458 = vmatprep.subr.bf16.mxu1 %v3974_v0 }
 0x687   :  { %v445_v23 = vpop.f32.mrb[8].mxu1 }
 0x688   :  { %v451_v24 = vadd.f32 %v445_v23, %v199_v21  ;;  %v3432_v25 = vpop.f32.mrb[9].mxu1  ;;  %v711_v23 = vld [vmem:[#allocation2] sm:$0xff] }
 0x689   :  { %v448_v27 = vpop.f32.mrb[10].mxu1  ;;  %v719_v25 = vpack.c.bf16 %v712_v19, %v711_v23 }
 0x68a   :  { %v452_v28 = vmul.f32 %v4142_v13, %v451_v24  ;;  %v3433_v29 = vpop.f32.mrb[11].mxu1  ;;  %v3791_v24 = vld [vmem:[%s5026_s4 + $0x8] sm:$0xff]  }
 0x68c   :  { %3820 = vtanh.f32 %v452_v28  ;;  %v713_v28 = vld [vmem:[#allocation2 + $0x10] sm:$0xff] }
 0x696   :  { %v3821_v30 = vpop.eup %3820 }
 0x697   :  { %v454_v31 = vmul.f32 %v3821_v30, %v4148_v20 }
 0x699   :  { %v455_v32 = vadd.f32 %v4153_v22, %v454_v31 }
 0x69b   :  { %456 = vrot.lane.b32.xlu0 %v455_v32, %s3977_s19 }
 0x70d   :  { %v457_v33 = vpop.permute.xlu0 %456 }
 0x70e   :  { %v458_v34 = vsel %vm92_vm2, %v403_v16, %v457_v33 }
 0x70f   :  { %v459_v11 = vmul.f32 %v458_v34, %v455_v32 }
 0x711   :  { %460 = vrot.lane.b32.xlu1 %v459_v11, %s3978_s22 }
 0x783   :  { %v461_v35 = vpop.permute.xlu1 %460 }
 0x784   :  { %v462_v36 = vadd.f32 %v461_v35, %v459_v11 }
 0x786   :  { %3822 = vtanh.f32 %v462_v36 }
 0x790   :  { %v3823_v37 = vpop.eup %3822 }
 0x791   :  { %v464_v38 = vmul.f32 %v3823_v37, %v457_v33  ;;  %v212_v33 = vadd.f32 %v4198_v55, %v4132_v7 }
 0x793   :  { %466 = vst.msk [vmem:[#allocation2 + $0x18] sm:$0xff] %vm230_vm3, %v464_v38  ;;  %v465_v39 = vpack.c.bf16 %v464_v38, %v464_v38 }
 0x795   :  { %3439 = vmatmul.mubr.msk.bf16.vlgmr.msra.gmra.mrb[12].mxu0 %vm230_vm3, %v465_v39 }
 0x796   :  { %3451 = vmatpush3.bf16.msra.mxu0 %v4098_v2  ;;  %3454 = vmatprep.mubr.msk.bf16.mxu0 %vm3975_vm0, %v3974_v0 }
 0x797   :  { %3452 = vmatprep.subr.bf16.mxu0 %v3974_v0 }
 0x79a   :  { %3453 = vmatpush3.bf16.msra.mxu0 %v4112_v5  ;;  %v714_v27 = vld [vmem:[#allocation2 + $0x18] sm:$0xff] }
 0x79b   :  { %3466 = vmatprep.subr.bf16.mxu0 %v3790_v8  ;;  %v720_v31 = vpack.c.bf16 %v714_v27, %v713_v28 }
 0x868   :  { %v504_v41 = vpop.f32.mrb[12].mxu0 }
 0x869   :  { %v510_v42 = vadd.f32 %v504_v41, %v204_v40  ;;  %v3440_v43 = vpop.f32.mrb[13].mxu0 }
 0x86a   :  { %v507_v44 = vpop.f32.mrb[14].mxu0 }
 0x86b   :  { %v511_v45 = vmul.f32 %v4142_v13, %v510_v42  ;;  %v3441_v46 = vpop.f32.mrb[15].mxu0 }
 0x86d   :  { %3824 = vtanh.f32 %v511_v45 }
 0x877   :  { %v3825_v47 = vpop.eup %3824 }
 0x878   :  { %v513_v48 = vmul.f32 %v3825_v47, %v4148_v20 }
 0x87a   :  { %v514_v49 = vadd.f32 %v4153_v22, %v513_v48  ;;  %v4292_v48 = vld [vmem:[%s5027_s5] sm:$0xff]  }
 0x87c   :  { %515 = vrot.lane.b32.xlu0 %v514_v49, %s3977_s19 }
 0x8ee   :  { %v516_v50 = vpop.permute.xlu0 %515 }
 0x8ef   :  { %v517_v51 = vsel %vm92_vm2, %v462_v36, %v516_v50 }
 0x8f0   :  { %v518_v52 = vmul.f32 %v517_v51, %v514_v49  ;;  %v4299_v49 = vld [vmem:[%s5027_s5 + $0x8] sm:$0xff]  }
 0x8f2   :  { %519 = vrot.lane.b32.xlu1 %v518_v52, %s3978_s22 }
 0x964   :  { %v520_v53 = vpop.permute.xlu1 %519 }
 0x965   :  { %v521_v54 = vadd.f32 %v520_v53, %v518_v52 }
 0x967   :  { %3826 = vtanh.f32 %v521_v54 }
 0x971   :  { %v3827_v56 = vpop.eup %3826 }
 0x972   :  { %v523_v59 = vmul.f32 %v3827_v56, %v516_v50  ;;  %v215_v56 = vadd.f32 %v4200_v57, %v4132_v7 }
 0x974   :  { %525 = vst.msk [vmem:[#allocation2 + $0x20] sm:$0xff] %vm230_vm3, %v523_v59  ;;  %v524_v60 = vpack.c.bf16 %v523_v59, %v523_v59 }
 0x976   :  { %3447 = vmatmul.mubr.msk.bf16.vlgmr.msra.gmra.mrb[12].mxu1 %vm230_vm3, %v524_v60 }
 0x977   :  { %3459 = vmatpush3.bf16.msra.mxu1 %v4098_v2  ;;  %3462 = vmatprep.mubr.msk.bf16.mxu1 %vm3975_vm0, %v3974_v0 }
 0x978   :  { %3460 = vmatprep.subr.bf16.mxu1 %v3974_v0 }
 0x97b   :  { %3461 = vmatpush3.bf16.msra.mxu1 %v4112_v5  ;;  %v715_v29 = vld [vmem:[#allocation2 + $0x20] sm:$0xff] }
 0x97c   :  { %3478 = vmatprep.subr.bf16.mxu1 %v3974_v0 }
 0xa49   :  { %v563_v62 = vpop.f32.mrb[12].mxu1 }
 0xa4a   :  { %v569_v63 = vadd.f32 %v563_v62, %v207_v61  ;;  %v3448_v1 = vpop.f32.mrb[13].mxu1 }
 0xa4b   :  { %v566_v3 = vpop.f32.mrb[14].mxu1  ;;  %v4323_v1 = vld [vmem:[%s5028_s6] ss:$0 sm:$0xff] }
 0xa4c   :  { %v570_v4 = vmul.f32 %v4142_v13, %v569_v63  ;;  %v3449_v9 = vpop.f32.mrb[15].mxu1 }
 0xa4e   :  { %3828 = vtanh.f32 %v570_v4 }
 0xa58   :  { %v3829_v2 = vpop.eup %3828 }
 0xa59   :  { %v572_v10 = vmul.f32 %v3829_v2, %v4148_v20 }
 0xa5b   :  { %v573_v12 = vadd.f32 %v4153_v22, %v572_v10 }
 0xa5d   :  { %574 = vrot.lane.b32.xlu0 %v573_v12, %s3977_s19 }
 0xacf   :  { %v575_v5 = vpop.permute.xlu0 %574 }
 0xad0   :  { %v576_v14 = vsel %vm92_vm2, %v521_v54, %v575_v5 }
 0xad1   :  { %v577_v58 = vmul.f32 %v576_v14, %v573_v12 }
 0xad3   :  { %578 = vrot.lane.b32.xlu1 %v577_v58, %s3978_s22 }
 0xb45   :  { %v579_v15 = vpop.permute.xlu1 %578 }
 0xb46   :  { %v580_v16 = vadd.f32 %v579_v15, %v577_v58 }
 0xb48   :  { %3830 = vtanh.f32 %v580_v16 }
 0xb52   :  { %v3831_v17 = vpop.eup %3830 }
 0xb53   :  { %v582_v18 = vmul.f32 %v3831_v17, %v575_v5 }
 0xb55   :  { %584 = vst.msk [vmem:[#allocation2 + $0x28] sm:$0xff] %vm230_vm3, %v582_v18  ;;  %v583_v21 = vpack.c.bf16 %v582_v18, %v582_v18 }
 0xb57   :  { %3455 = vmatmul.mubr.msk.bf16.vlgmr.msra.gmra.mrb[16].mxu0 %vm230_vm3, %v583_v21 }
 0xb58   :  { %3467 = vmatpush3.bf16.msra.mxu0 %v3790_v8  ;;  %3470 = vmatprep.mubr.msk.bf16.mxu0 %vm230_vm3, %v719_v25 }
 0xb59   :  { %3468 = vmatprep.subr.bf16.mxu0 %v3791_v24 }
 0xb5c   :  { %3469 = vmatpush3.bf16.msra.mxu0 %v3791_v24  ;;  %v716_v30 = vld [vmem:[#allocation2 + $0x28] sm:$0xff] }
 0xb5d   :  { %v721_v32 = vpack.c.bf16 %v716_v30, %v715_v29  ;;  %3494 = vmatprep.subr.bf16.mxu0 %v3974_v0 }
 0xb5f   :  { %3471 = vmatmul.mubr.msk.bf16.vlgmr.msra.gmra.mrb[20].mxu0 %vm230_vm3, %v720_v31 }
 0xb60   :  { %3474 = vmatprep.mubr.msk.bf16.mxu0 %vm230_vm3, %v721_v32  ;;  %3495 = vmatpush3.bf16.msra.mxu0 %v4292_v48 }
 0xb61   :  { %3496 = vmatprep.subr.bf16.mxu0 %v3974_v0 }
 0xb64   :  { %3497 = vmatpush3.bf16.msra.mxu0 %v4299_v49 }
 0xb65   :  { %3510 = vmatprep.subr.bf16.mxu0 %v3974_v0 }
 0xc2a   :  { %v622_v34 = vpop.f32.mrb[16].mxu0 }
 0xc2b   :  { %v628_v11 = vadd.f32 %v622_v34, %v212_v33  ;;  %v3456_v35 = vpop.f32.mrb[17].mxu0 }
 0xc2c   :  { %v625_v36 = vpop.f32.mrb[18].mxu0 }
 0xc2d   :  { %v629_v37 = vmul.f32 %v4142_v13, %v628_v11  ;;  %v3457_v38 = vpop.f32.mrb[19].mxu0 }
 0xc2f   :  { %3832 = vtanh.f32 %v629_v37 }
 0xc32   :  { %v4277_v39 = vpop.f32.mrb[20].mxu0 }
 0xc33   :  { %v787_v40 = vpop.f32.mrb[21].mxu0 }
 0xc34   :  { %v4279_v41 = vpop.f32.mrb[22].mxu0  ;;  %v788_v3 = vadd.f32 %v4323_v1, %v787_v40 }
 0xc35   :  { %v4281_v42 = vpop.f32.mrb[23].mxu0 }
 0xc36   :  { %v791_v37 = vadd.f32 %v4323_v1, %v4281_v42 }
 0xc39   :  { %v3833_v43 = vpop.eup %3832 }
 0xc3a   :  { %v631_v44 = vmul.f32 %v3833_v43, %v4148_v20 }
 0xc3c   :  { %v632_v55 = vadd.f32 %v4153_v22, %v631_v44 }
 0xc3e   :  { %633 = vrot.lane.b32.xlu0 %v632_v55, %s3977_s19 }
 0xcb0   :  { %v634_v45 = vpop.permute.xlu0 %633 }
 0xcb1   :  { %v635_v46 = vsel %vm92_vm2, %v580_v16, %v634_v45 }
 0xcb2   :  { %v636_v47 = vmul.f32 %v635_v46, %v632_v55 }
 0xcb4   :  { %637 = vrot.lane.b32.xlu1 %v636_v47, %s3978_s22 }
 0xd26   :  { %v638_v50 = vpop.permute.xlu1 %637 }
 0xd27   :  { %v639_v51 = vadd.f32 %v638_v50, %v636_v47 }
 0xd29   :  { %3834 = vtanh.f32 %v639_v51 }
 0xd33   :  { %v3835_v52 = vpop.eup %3834 }
 0xd34   :  { %v641_v53 = vmul.f32 %v3835_v52, %v634_v45 }
 0xd36   :  { %643 = vst.msk [vmem:[#allocation2 + $0x30] sm:$0xff] %vm230_vm3, %v641_v53  ;;  %v642_v54 = vpack.c.bf16 %v641_v53, %v641_v53 }
 0xd38   :  { %3463 = vmatmul.mubr.msk.bf16.vlgmr.msra.gmra.mrb[16].mxu1 %vm230_vm3, %v642_v54 }
 0xd39   :  { %3479 = vmatpush3.bf16.msra.mxu1 %v4292_v48  ;;  %3482 = vmatprep.mubr.msk.bf16.mxu1 %vm3975_vm0, %v3974_v0 }
 0xd3a   :  { %3480 = vmatprep.subr.bf16.mxu1 %v3974_v0 }
 0xd3d   :  { %3481 = vmatpush3.bf16.msra.mxu1 %v4299_v49  ;;  %v717_v11 = vld [vmem:[#allocation2 + $0x30] sm:$0xff] }
 0xd3e   :  { %3486 = vmatprep.subr.bf16.mxu1 %v3974_v0 }
 0xd40   :  { %3483 = vmatmul.mubr.bf16.vlgmr.msra.gmra.mrb[20].mxu1 %v3976_v6 }
 0xd41   :  { %3487 = vmatpush3.bf16.msra.mxu1 %v4292_v48  ;;  %3490 = vmatprep.mubr.msk.bf16.mxu1 %vm3975_vm0, %v3974_v0 }
 0xd42   :  { %3488 = vmatprep.subr.bf16.mxu1 %v3974_v0 }
 0xd45   :  { %3489 = vmatpush3.bf16.msra.mxu1 %v4299_v49 }
 0xd46   :  { %3502 = vmatprep.subr.bf16.mxu1 %v3974_v0 }
 0xe0b   :  { %v681_v59 = vpop.f32.mrb[16].mxu1 }
 0xe0c   :  { %v687_v60 = vadd.f32 %v681_v59, %v215_v56  ;;  %v3464_v61 = vpop.f32.mrb[17].mxu1 }
 0xe0d   :  { %v684_v62 = vpop.f32.mrb[18].mxu1 }
 0xe0e   :  { %v3465_v63 = vpop.f32.mrb[19].mxu1  ;;  %v688_v4 = vmul.f32 %v4142_v13, %v687_v60 }
 0xe10   :  { %3836 = vtanh.f32 %v688_v4  ;;  %v796_v4 = vadd.f32 %v4277_v39, %v4323_v1 }
 0xe13   :  { %v864_v9 = vpop.f32.mrb[20].mxu1 }
 0xe14   :  { %v870_v2 = vadd.f32 %v864_v9, %v788_v3  ;;  %v3484_v10 = vpop.f32.mrb[21].mxu1 }
 0xe15   :  { %v867_v12 = vpop.f32.mrb[22].mxu1 }
 0xe16   :  { %v871_v7 = vmul.f32 %v4142_v13, %v870_v2  ;;  %v3485_v57 = vpop.f32.mrb[23].mxu1 }
 0xe18   :  { %3838 = vtanh.f32 %v871_v7 }
 0xe1a   :  { %v3837_v5 = vpop.eup %3836 }
 0xe1b   :  { %v690_v15 = vmul.f32 %v3837_v5, %v4148_v20 }
 0xe1d   :  { %v691_v16 = vadd.f32 %v4153_v22, %v690_v15 }
 0xe22   :  { %v3839_v14 = vpop.eup %3838 }
 0xe23   :  { %v873_v58 = vmul.f32 %v3839_v14, %v4148_v20 }
 0xe25   :  { %v874_v8 = vadd.f32 %v4153_v22, %v873_v58 }
 0xe27   :  { %875 = vrot.lane.b32.xlu0 %v874_v8, %s3977_s19 }
 0xe2b   :  { %692 = vrot.lane.b32.xlu0 %v691_v16, %s3977_s19 }
 0xe99   :  { %v876_v17 = vpop.permute.xlu0 %875 }
 0xe9a   :  { %v877_v18 = vsel %vm92_vm2, 0.0, %v876_v17 }
 0xe9b   :  { %v878_v19 = vmul.f32 %v877_v18, %v874_v8 }
 0xe9d   :  { %879 = vrot.lane.b32.xlu1 %v878_v19, %s3978_s22  ;;  %v693_v21 = vpop.permute.xlu0 %692 }
 0xe9e   :  { %v694_v23 = vsel %vm92_vm2, %v639_v51, %v693_v21 }
 0xe9f   :  { %v695_v24 = vmul.f32 %v694_v23, %v691_v16  ;;  %v799_v23 = vadd.f32 %v4279_v41, %v4323_v1 }
 0xea1   :  { %696 = vrot.lane.b32.xlu0 %v695_v24, %s3978_s22 }
 0xf0f   :  { %v880_v25 = vpop.permute.xlu1 %879 }
 0xf10   :  { %v881_v27 = vadd.f32 %v880_v25, %v878_v19 }
 0xf12   :  { %3840 = vtanh.f32 %v881_v27 }
 0xf13   :  { %v697_v28 = vpop.permute.xlu0 %696 }
 0xf14   :  { %v698_v29 = vadd.f32 %v697_v28, %v695_v24 }
 0xf16   :  { %3842 = vtanh.f32 %v698_v29 }
 0xf1c   :  { %v3841_v30 = vpop.eup %3840 }
 0xf1d   :  { %v883_v31 = vmul.f32 %v3841_v30, %v876_v17 }
 0xf1f   :  { %885 = vst.msk [vmem:[#allocation3] sm:$0xff] %vm230_vm3, %v883_v31  ;;  %v884_v32 = vpack.c.bf16 %v883_v31, %v883_v31 }
 0xf20   :  { %v3843_v33 = vpop.eup %3842 }
 0xf21   :  { %v700_v34 = vmul.f32 %v3843_v33, %v693_v21  ;;  %3491 = vmatmul.mubr.msk.bf16.vlgmr.msra.gmra.mrb[24].mxu1 %vm230_vm3, %v884_v32 }
 0xf22   :  { %3503 = vmatpush3.bf16.msra.mxu1 %v4292_v48  ;;  %3506 = vmatprep.mubr.msk.bf16.mxu1 %vm3975_vm0, %v3974_v0 }
 0xf23   :  { %701 = vst.msk [vmem:[#allocation2 + $0x38] sm:$0xff] %vm230_vm3, %v700_v34  ;;  %3504 = vmatprep.subr.bf16.mxu1 %v3974_v0 }
 0xf26   :  { %3505 = vmatpush3.bf16.msra.mxu1 %v4299_v49 }
 0xf27   :  { %3518 = vmatprep.subr.bf16.mxu1 %v3974_v0 }
 0xf2a   :  { %v718_v35 = vld [vmem:[#allocation2 + $0x38] sm:$0xff] }
 0xf2b   :  { %v722_v36 = vpack.c.bf16 %v718_v35, %v717_v11 }
 0xf2d   :  { %3475 = vmatmul.mubr.msk.bf16.gmra.mrb[24].mxu0 %vm230_vm3, %v722_v36 }
 0xf2e   :  { %3498 = vmatprep.mubr.msk.bf16.mxu0 %vm3975_vm0, %v3974_v0 }
 0xff4   :  { %v923_v38 = vpop.f32.mrb[24].mxu1 }
 0xff5   :  { %v929_v40 = vadd.f32 %v923_v38, %v791_v37  ;;  %v3492_v43 = vpop.f32.mrb[25].mxu1 }
 0xff6   :  { %v926_v44 = vpop.f32.mrb[26].mxu1 }
 0xff7   :  { %v930_v55 = vmul.f32 %v4142_v13, %v929_v40  ;;  %v3493_v45 = vpop.f32.mrb[27].mxu1 }
 0xff9   :  { %3844 = vtanh.f32 %v930_v55 }
0x1000   :  { %v4355_v46 = vpop.f32.mrb[24].mxu0 }
0x1001   :  { %v4357_v47 = vpop.f32.mrb[25].mxu0 }
0x1002   :  { %v4359_v50 = vpop.f32.mrb[26].mxu0  ;;  %v804_v43 = vadd.f32 %v4323_v1, %v4357_v47 }
0x1003   :  { %v3845_v51 = vpop.eup %3844  ;;  %v4361_v52 = vpop.f32.mrb[27].mxu0 }
0x1004   :  { %v932_v53 = vmul.f32 %v3845_v51, %v4148_v20 }
0x1006   :  { %v933_v42 = vadd.f32 %v4153_v22, %v932_v53 }
0x1008   :  { %934 = vrot.lane.b32.xlu1 %v933_v42, %s3977_s19 }
0x107a   :  { %v935_v54 = vpop.permute.xlu1 %934 }
0x107b   :  { %v936_v56 = vsel %vm92_vm2, %v881_v27, %v935_v54 }
0x107c   :  { %v937_v59 = vmul.f32 %v936_v56, %v933_v42 }
0x107e   :  { %938 = vrot.lane.b32.xlu1 %v937_v59, %s3978_s22 }
0x10f0   :  { %v939_v60 = vpop.permute.xlu1 %938 }
0x10f1   :  { %v940_v61 = vadd.f32 %v939_v60, %v937_v59 }
0x10f3   :  { %3846 = vtanh.f32 %v940_v61 }
0x10fd   :  { %v3847_v62 = vpop.eup %3846 }
0x10fe   :  { %v942_v63 = vmul.f32 %v3847_v62, %v935_v54 }
0x1100   :  { %v943_v3 = vpack.c.bf16 %v942_v63, %v942_v63  ;;  %944 = vst.msk [vmem:[#allocation3 + $0x8] sm:$0xff] %vm230_vm3, %v942_v63 }
0x1102   :  { %3499 = vmatmul.mubr.msk.bf16.vlgmr.msra.gmra.mrb[28].mxu0 %vm230_vm3, %v943_v3 }
0x1103   :  { %3511 = vmatpush3.bf16.msra.mxu0 %v4292_v48  ;;  %3514 = vmatprep.mubr.msk.bf16.mxu0 %vm3975_vm0, %v3974_v0 }
0x1104   :  { %3512 = vmatprep.subr.bf16.mxu0 %v3974_v0 }
0x1107   :  { %3513 = vmatpush3.bf16.msra.mxu0 %v4299_v49 }
0x1108   :  { %3526 = vmatprep.subr.bf16.mxu0 %v3974_v0 }
0x11d5   :  { %v982_v9 = vpop.f32.mrb[28].mxu0 }
0x11d6   :  { %v988_v2 = vadd.f32 %v982_v9, %v796_v4  ;;  %v3500_v10 = vpop.f32.mrb[29].mxu0 }
0x11d7   :  { %v985_v12 = vpop.f32.mrb[30].mxu0 }
0x11d8   :  { %v989_v7 = vmul.f32 %v4142_v13, %v988_v2  ;;  %v3501_v57 = vpop.f32.mrb[31].mxu0  ;;  %v807_v2 = vadd.f32 %v4323_v1, %v4361_v52 }
0x11da   :  { %3848 = vtanh.f32 %v989_v7 }
0x11e4   :  { %v3849_v5 = vpop.eup %3848 }
0x11e5   :  { %v991_v14 = vmul.f32 %v3849_v5, %v4148_v20 }
0x11e7   :  { %v992_v58 = vadd.f32 %v4153_v22, %v991_v14 }
0x11e9   :  { %993 = vrot.lane.b32.xlu0 %v992_v58, %s3977_s19 }
0x125b   :  { %v994_v8 = vpop.permute.xlu0 %993 }
0x125c   :  { %v995_v15 = vsel %vm92_vm2, %v940_v61, %v994_v8 }
0x125d   :  { %v996_v39 = vmul.f32 %v995_v15, %v992_v58 }
0x125f   :  { %997 = vrot.lane.b32.xlu1 %v996_v39, %s3978_s22 }
0x12d1   :  { %v998_v16 = vpop.permute.xlu1 %997 }
0x12d2   :  { %v999_v17 = vadd.f32 %v998_v16, %v996_v39  ;;  %v3794_v39 = vld [vmem:[%s5029_s7] sm:$0xff]  }
0x12d4   :  { %3850 = vtanh.f32 %v999_v17 }
0x12de   :  { %v3851_v18 = vpop.eup %3850 }
0x12df   :  { %v1001_v19 = vmul.f32 %v3851_v18, %v994_v8 }
0x12e1   :  { %1003 = vst.msk [vmem:[#allocation3 + $0x10] sm:$0xff] %vm230_vm3, %v1001_v19  ;;  %v1002_v21 = vpack.c.bf16 %v1001_v19, %v1001_v19 }
0x12e3   :  { %3507 = vmatmul.mubr.msk.bf16.vlgmr.msra.gmra.mrb[28].mxu1 %vm230_vm3, %v1002_v21  ;;  %v1308_v21 = vld [vmem:[#allocation3 + $0x8] sm:$0xff] }
0x12e4   :  { %3519 = vmatpush3.bf16.msra.mxu1 %v4292_v48  ;;  %3522 = vmatprep.mubr.msk.bf16.mxu1 %vm3975_vm0, %v3974_v0 }
0x12e5   :  { %3520 = vmatprep.subr.bf16.mxu1 %v3974_v0 }
0x12e8   :  { %3521 = vmatpush3.bf16.msra.mxu1 %v4299_v49 }
0x12e9   :  { %3534 = vmatprep.subr.bf16.mxu1 %v3974_v0 }
0x13b6   :  { %v1041_v24 = vpop.f32.mrb[28].mxu1 }
0x13b7   :  { %v1047_v25 = vadd.f32 %v1041_v24, %v799_v23  ;;  %v3508_v27 = vpop.f32.mrb[29].mxu1  ;;  %v1307_v24 = vld [vmem:[#allocation3] sm:$0xff] }
0x13b8   :  { %v1044_v28 = vpop.f32.mrb[30].mxu1  ;;  %v1315_v27 = vpack.c.bf16 %v1308_v21, %v1307_v24 }
0x13b9   :  { %v1048_v29 = vmul.f32 %v4142_v13, %v1047_v25  ;;  %v3509_v30 = vpop.f32.mrb[31].mxu1  ;;  %v3795_v25 = vld [vmem:[%s5029_s7 + $0x8] sm:$0xff]  }
0x13bb   :  { %3852 = vtanh.f32 %v1048_v29  ;;  %v1309_v29 = vld [vmem:[#allocation3 + $0x10] sm:$0xff] }
0x13c5   :  { %v3853_v31 = vpop.eup %3852 }
0x13c6   :  { %v1050_v32 = vmul.f32 %v3853_v31, %v4148_v20 }
0x13c8   :  { %v1051_v33 = vadd.f32 %v4153_v22, %v1050_v32 }
0x13ca   :  { %1052 = vrot.lane.b32.xlu0 %v1051_v33, %s3977_s19 }
0x143c   :  { %v1053_v34 = vpop.permute.xlu0 %1052 }
0x143d   :  { %v1054_v11 = vsel %vm92_vm2, %v999_v17, %v1053_v34 }
0x143e   :  { %v1055_v41 = vmul.f32 %v1054_v11, %v1051_v33 }
0x1440   :  { %1056 = vrot.lane.b32.xlu1 %v1055_v41, %s3978_s22 }
0x14b2   :  { %v1057_v35 = vpop.permute.xlu1 %1056 }
0x14b3   :  { %v1058_v36 = vadd.f32 %v1057_v35, %v1055_v41 }
0x14b5   :  { %3854 = vtanh.f32 %v1058_v36 }
0x14bf   :  { %v3855_v37 = vpop.eup %3854 }
0x14c0   :  { %v1060_v38 = vmul.f32 %v3855_v37, %v1053_v34  ;;  %v812_v34 = vadd.f32 %v4355_v46, %v4323_v1 }
0x14c2   :  { %1062 = vst.msk [vmem:[#allocation3 + $0x18] sm:$0xff] %vm230_vm3, %v1060_v38  ;;  %v1061_v40 = vpack.c.bf16 %v1060_v38, %v1060_v38 }
0x14c4   :  { %3515 = vmatmul.mubr.msk.bf16.vlgmr.msra.gmra.mrb[32].mxu0 %vm230_vm3, %v1061_v40 }
0x14c5   :  { %3527 = vmatpush3.bf16.msra.mxu0 %v4292_v48  ;;  %3530 = vmatprep.mubr.msk.bf16.mxu0 %vm3975_vm0, %v3974_v0 }
0x14c6   :  { %3528 = vmatprep.subr.bf16.mxu0 %v3974_v0 }
0x14c9   :  { %3529 = vmatpush3.bf16.msra.mxu0 %v4299_v49  ;;  %v1310_v28 = vld [vmem:[#allocation3 + $0x18] sm:$0xff] }
0x14ca   :  { %3542 = vmatprep.subr.bf16.mxu0 %v3794_v39  ;;  %v1316_v32 = vpack.c.bf16 %v1310_v28, %v1309_v29 }
0x1597   :  { %v1100_v44 = vpop.f32.mrb[32].mxu0 }
0x1598   :  { %v1106_v55 = vadd.f32 %v1100_v44, %v804_v43  ;;  %v3516_v45 = vpop.f32.mrb[33].mxu0 }
0x1599   :  { %v1103_v51 = vpop.f32.mrb[34].mxu0 }
0x159a   :  { %v1107_v53 = vmul.f32 %v4142_v13, %v1106_v55  ;;  %v3517_v42 = vpop.f32.mrb[35].mxu0 }
0x159c   :  { %3856 = vtanh.f32 %v1107_v53 }
0x15a6   :  { %v3857_v54 = vpop.eup %3856 }
0x15a7   :  { %v1109_v56 = vmul.f32 %v3857_v54, %v4148_v20  ;;  %v4466_v54 = vld [vmem:[%s5030_s8] sm:$0xff]  }
0x15a9   :  { %v1110_v59 = vadd.f32 %v4153_v22, %v1109_v56 }
0x15ab   :  { %1111 = vrot.lane.b32.xlu0 %v1110_v59, %s3977_s19 }
0x161d   :  { %v1112_v60 = vpop.permute.xlu0 %1111 }
0x161e   :  { %v1113_v61 = vsel %vm92_vm2, %v1058_v36, %v1112_v60 }
0x161f   :  { %v1114_v47 = vmul.f32 %v1113_v61, %v1110_v59 }
0x1621   :  { %1115 = vrot.lane.b32.xlu1 %v1114_v47, %s3978_s22 }
0x1693   :  { %v1116_v62 = vpop.permute.xlu1 %1115 }
0x1694   :  { %v1117_v63 = vadd.f32 %v1116_v62, %v1114_v47  ;;  %v815_v47 = vadd.f32 %v4359_v50, %v4323_v1 }
0x1696   :  { %3858 = vtanh.f32 %v1117_v63 }
0x16a0   :  { %v3859_v3 = vpop.eup %3858 }
0x16a1   :  { %v1119_v4 = vmul.f32 %v3859_v3, %v1112_v60 }
0x16a3   :  { %1121 = vst.msk [vmem:[#allocation3 + $0x20] sm:$0xff] %vm230_vm3, %v1119_v4  ;;  %v1120_v9 = vpack.c.bf16 %v1119_v4, %v1119_v4 }
0x16a5   :  { %3523 = vmatmul.mubr.msk.bf16.vlgmr.msra.gmra.mrb[32].mxu1 %vm230_vm3, %v1120_v9 }
0x16a6   :  { %3535 = vmatpush3.bf16.msra.mxu1 %v4292_v48  ;;  %3538 = vmatprep.mubr.msk.bf16.mxu1 %vm3975_vm0, %v3974_v0 }
0x16a7   :  { %3536 = vmatprep.subr.bf16.mxu1 %v3974_v0 }
0x16aa   :  { %3537 = vmatpush3.bf16.msra.mxu1 %v4299_v49  ;;  %v1311_v30 = vld [vmem:[#allocation3 + $0x20] sm:$0xff] }
0x16ab   :  { %3554 = vmatprep.subr.bf16.mxu1 %v3974_v0 }
0x1778   :  { %v1159_v10 = vpop.f32.mrb[32].mxu1 }
0x1779   :  { %v1165_v12 = vadd.f32 %v1159_v10, %v807_v2  ;;  %v3524_v7 = vpop.f32.mrb[33].mxu1  ;;  %v4497_v2 = vld [vmem:[%s5031_s9] ss:$0 sm:$0xff] }
0x177a   :  { %v1162_v57 = vpop.f32.mrb[34].mxu1 }
0x177b   :  { %v1166_v5 = vmul.f32 %v4142_v13, %v1165_v12  ;;  %v3525_v14 = vpop.f32.mrb[35].mxu1  ;;  %v4503_v12 = vld [vmem:[%s5055_s27] ss:$0 sm:$0xff] }
0x177d   :  { %3860 = vtanh.f32 %v1166_v5 }
0x1787   :  { %v3861_v48 = vpop.eup %3860 }
0x1788   :  { %v1168_v58 = vmul.f32 %v3861_v48, %v4148_v20 }
0x178a   :  { %v1169_v8 = vadd.f32 %v4153_v22, %v1168_v58 }
0x178c   :  { %1170 = vrot.lane.b32.xlu0 %v1169_v8, %s3977_s19 }
0x17fe   :  { %v1171_v49 = vpop.permute.xlu0 %1170 }
0x17ff   :  { %v1172_v15 = vsel %vm92_vm2, %v1117_v63, %v1171_v49 }
0x1800   :  { %v1173_v52 = vmul.f32 %v1172_v15, %v1169_v8 }
0x1802   :  { %1174 = vrot.lane.b32.xlu1 %v1173_v52, %s3978_s22 }
0x1874   :  { %v1175_v16 = vpop.permute.xlu1 %1174 }
0x1875   :  { %v1176_v17 = vadd.f32 %v1175_v16, %v1173_v52  ;;  %v4516_v52 = vld [vmem:[%s5025_s20] ss:$0 sm:$0xff] }
0x1877   :  { %3862 = vtanh.f32 %v1176_v17 }
0x1881   :  { %v3863_v18 = vpop.eup %3862 }
0x1882   :  { %v1178_v19 = vmul.f32 %v3863_v18, %v1171_v49  ;;  %v4510_v49 = vld [vmem:[%s5056_s29] ss:$0 sm:$0xff] }
0x1884   :  { %1180 = vst.msk [vmem:[#allocation3 + $0x28] sm:$0xff] %vm230_vm3, %v1178_v19  ;;  %v1179_v23 = vpack.c.bf16 %v1178_v19, %v1178_v19 }
0x1886   :  { %3531 = vmatmul.mubr.msk.bf16.vlgmr.msra.gmra.mrb[36].mxu0 %vm230_vm3, %v1179_v23 }
0x1887   :  { %3543 = vmatpush3.bf16.msra.mxu0 %v3794_v39  ;;  %3546 = vmatprep.mubr.msk.bf16.mxu0 %vm230_vm3, %v1315_v27 }
0x1888   :  { %3544 = vmatprep.subr.bf16.mxu0 %v3795_v25 }
0x188b   :  { %3545 = vmatpush3.bf16.msra.mxu0 %v3795_v25  ;;  %v1312_v31 = vld [vmem:[#allocation3 + $0x28] sm:$0xff] }
0x188c   :  { %v1317_v33 = vpack.c.bf16 %v1312_v31, %v1311_v30  ;;  %3570 = vmatprep.subr.bf16.mxu0 %v3974_v0 }
0x188e   :  { %3547 = vmatmul.mubr.msk.bf16.vlgmr.msra.gmra.mrb[40].mxu0 %vm230_vm3, %v1316_v32 }
0x188f   :  { %3550 = vmatprep.mubr.msk.bf16.mxu0 %vm230_vm3, %v1317_v33  ;;  %3571 = vmatpush3.bf16.msra.mxu0 %v4466_v54 }
0x1890   :  { %3572 = vmatprep.subr.bf16.mxu0 %v3974_v0 }
0x1959   :  { %v1218_v11 = vpop.f32.mrb[36].mxu0 }
0x195a   :  { %v1224_v41 = vadd.f32 %v1218_v11, %v812_v34  ;;  %v3532_v35 = vpop.f32.mrb[37].mxu0 }
0x195b   :  { %v1221_v36 = vpop.f32.mrb[38].mxu0 }
0x195c   :  { %v1225_v37 = vmul.f32 %v4142_v13, %v1224_v41  ;;  %v3533_v38 = vpop.f32.mrb[39].mxu0 }
0x195e   :  { %3864 = vtanh.f32 %v1225_v37 }
0x1961   :  { %v4451_v40 = vpop.f32.mrb[40].mxu0 }
0x1962   :  { %v1383_v43 = vpop.f32.mrb[41].mxu0 }
0x1963   :  { %v4453_v44 = vpop.f32.mrb[42].mxu0  ;;  %v1384_v10 = vadd.f32 %v4497_v2, %v1383_v43 }
0x1964   :  { %v4455_v55 = vpop.f32.mrb[43].mxu0 }
0x1965   :  { %v1387_v37 = vadd.f32 %v4497_v2, %v4455_v55 }
0x1968   :  { %v3865_v45 = vpop.eup %3864 }
0x1969   :  { %v1227_v51 = vmul.f32 %v3865_v45, %v4148_v20  ;;  %v4473_v20 = vld [vmem:[%s5030_s8 + $0x8] sm:$0xff]  }
0x196a   :  { %3573 = vmatpush3.bf16.msra.mxu0 %v4473_v20 }
0x196b   :  { %v1228_v46 = vadd.f32 %v4153_v22, %v1227_v51  ;;  %3586 = vmatprep.subr.bf16.mxu0 %v3974_v0 }
0x196d   :  { %1229 = vrot.lane.b32.xlu0 %v1228_v46, %s3977_s19 }
0x19df   :  { %v1230_v53 = vpop.permute.xlu0 %1229 }
0x19e0   :  { %v1231_v13 = vsel %vm92_vm2, %v1176_v17, %v1230_v53 }
0x19e1   :  { %v1232_v42 = vmul.f32 %v1231_v13, %v1228_v46 }
0x19e3   :  { %1233 = vrot.lane.b32.xlu1 %v1232_v42, %s3978_s22 }
0x1a55   :  { %v1234_v22 = vpop.permute.xlu1 %1233 }
0x1a56   :  { %v1235_v56 = vadd.f32 %v1234_v22, %v1232_v42 }
0x1a58   :  { %3866 = vtanh.f32 %v1235_v56 }
0x1a62   :  { %v3867_v59 = vpop.eup %3866 }
0x1a63   :  { %v1237_v60 = vmul.f32 %v3867_v59, %v1230_v53 }
0x1a65   :  { %1239 = vst.msk [vmem:[#allocation3 + $0x30] sm:$0xff] %vm230_vm3, %v1237_v60  ;;  %v1238_v61 = vpack.c.bf16 %v1237_v60, %v1237_v60 }
0x1a67   :  { %3539 = vmatmul.mubr.msk.bf16.vlgmr.msra.gmra.mrb[36].mxu1 %vm230_vm3, %v1238_v61 }
0x1a68   :  { %3555 = vmatpush3.bf16.msra.mxu1 %v4466_v54  ;;  %3558 = vmatprep.mubr.msk.bf16.mxu1 %vm3975_vm0, %v3974_v0 }
0x1a69   :  { %3556 = vmatprep.subr.bf16.mxu1 %v3974_v0 }
0x1a6c   :  { %3557 = vmatpush3.bf16.msra.mxu1 %v4473_v20  ;;  %v1313_v41 = vld [vmem:[#allocation3 + $0x30] sm:$0xff] }
0x1a6d   :  { %3562 = vmatprep.subr.bf16.mxu1 %v3974_v0 }
0x1a6f   :  { %3559 = vmatmul.mubr.bf16.vlgmr.msra.gmra.mrb[40].mxu1 %v3976_v6 }
0x1a70   :  { %3563 = vmatpush3.bf16.msra.mxu1 %v4466_v54  ;;  %3566 = vmatprep.mubr.msk.bf16.mxu1 %vm3975_vm0, %v3974_v0 }
0x1a71   :  { %3564 = vmatprep.subr.bf16.mxu1 %v3974_v0 }
0x1a74   :  { %3565 = vmatpush3.bf16.msra.mxu1 %v4473_v20 }
0x1a75   :  { %3578 = vmatprep.subr.bf16.mxu1 %v3974_v0 }
0x1b3a   :  { %v1277_v62 = vpop.f32.mrb[36].mxu1 }
0x1b3b   :  { %v1283_v63 = vadd.f32 %v1277_v62, %v815_v47  ;;  %v3540_v3 = vpop.f32.mrb[37].mxu1 }
0x1b3c   :  { %v1280_v4 = vpop.f32.mrb[38].mxu1 }
0x1b3d   :  { %v3541_v9 = vpop.f32.mrb[39].mxu1  ;;  %v1284_v7 = vmul.f32 %v4503_v12, %v1283_v63 }
0x1b3f   :  { %3868 = vtanh.f32 %v1284_v7  ;;  %v1392_v7 = vadd.f32 %v4451_v40, %v4497_v2 }
0x1b42   :  { %v1460_v1 = vpop.f32.mrb[40].mxu1 }
0x1b43   :  { %v1466_v50 = vadd.f32 %v1460_v1, %v1384_v10  ;;  %v3560_v57 = vpop.f32.mrb[41].mxu1 }
0x1b44   :  { %v1463_v5 = vpop.f32.mrb[42].mxu1 }
0x1b45   :  { %v1467_v14 = vmul.f32 %v4503_v12, %v1466_v50  ;;  %v3561_v48 = vpop.f32.mrb[43].mxu1 }
0x1b47   :  { %3870 = vtanh.f32 %v1467_v14 }
0x1b49   :  { %v3869_v58 = vpop.eup %3868 }
0x1b4a   :  { %v1286_v16 = vmul.f32 %v4510_v49, %v3869_v58 }
0x1b4c   :  { %v1287_v17 = vadd.f32 %v4516_v52, %v1286_v16 }
0x1b51   :  { %v3871_v8 = vpop.eup %3870 }
0x1b52   :  { %v1469_v15 = vmul.f32 %v4510_v49, %v3871_v8 }
0x1b54   :  { %v1470_v39 = vadd.f32 %v4516_v52, %v1469_v15 }
0x1b56   :  { %1471 = vrot.lane.b32.xlu0 %v1470_v39, %s3977_s19 }
0x1b5a   :  { %1288 = vrot.lane.b32.xlu0 %v1287_v17, %s3977_s19 }
0x1bc8   :  { %v1472_v18 = vpop.permute.xlu0 %1471 }
0x1bc9   :  { %v1473_v19 = vsel %vm92_vm2, 0.0, %v1472_v18 }
0x1bca   :  { %v1474_v21 = vmul.f32 %v1473_v19, %v1470_v39 }
0x1bcc   :  { %1475 = vrot.lane.b32.xlu1 %v1474_v21, %s3978_s22  ;;  %v1289_v23 = vpop.permute.xlu0 %1288 }
0x1bcd   :  { %v1290_v24 = vsel %vm92_vm2, %v1235_v56, %v1289_v23 }
0x1bce   :  { %v1291_v25 = vmul.f32 %v1290_v24, %v1287_v17  ;;  %v1395_v24 = vadd.f32 %v4453_v44, %v4497_v2 }
0x1bd0   :  { %1292 = vrot.lane.b32.xlu0 %v1291_v25, %s3978_s22 }
0x1c3e   :  { %v1476_v27 = vpop.permute.xlu1 %1475 }
0x1c3f   :  { %v1477_v28 = vadd.f32 %v1476_v27, %v1474_v21 }
0x1c41   :  { %3872 = vtanh.f32 %v1477_v28 }
0x1c42   :  { %v1293_v29 = vpop.permute.xlu0 %1292 }
0x1c43   :  { %v1294_v30 = vadd.f32 %v1293_v29, %v1291_v25 }
0x1c45   :  { %3874 = vtanh.f32 %v1294_v30 }
0x1c4b   :  { %v3873_v31 = vpop.eup %3872 }
0x1c4c   :  { %v1479_v32 = vmul.f32 %v3873_v31, %v1472_v18 }
0x1c4e   :  { %1481 = vst.msk [vmem:[#allocation2] sm:$0xff] %vm230_vm3, %v1479_v32  ;;  %v1480_v33 = vpack.c.bf16 %v1479_v32, %v1479_v32 }
0x1c4f   :  { %v3875_v34 = vpop.eup %3874 }
0x1c50   :  { %v1296_v11 = vmul.f32 %v3875_v34, %v1289_v23  ;;  %3567 = vmatmul.mubr.msk.bf16.vlgmr.msra.gmra.mrb[44].mxu1 %vm230_vm3, %v1480_v33 }
0x1c51   :  { %3579 = vmatpush3.bf16.msra.mxu1 %v4466_v54  ;;  %3582 = vmatprep.mubr.msk.bf16.mxu1 %vm3975_vm0, %v3974_v0 }
0x1c52   :  { %1297 = vst.msk [vmem:[#allocation3 + $0x38] sm:$0xff] %vm230_vm3, %v1296_v11  ;;  %3580 = vmatprep.subr.bf16.mxu1 %v3974_v0 }
0x1c55   :  { %3581 = vmatpush3.bf16.msra.mxu1 %v4473_v20 }
0x1c56   :  { %3594 = vmatprep.subr.bf16.mxu1 %v3974_v0 }
0x1c59   :  { %v1314_v35 = vld [vmem:[#allocation3 + $0x38] sm:$0xff] }
0x1c5a   :  { %v1318_v36 = vpack.c.bf16 %v1314_v35, %v1313_v41 }
0x1c5c   :  { %3551 = vmatmul.mubr.msk.bf16.gmra.mrb[44].mxu0 %vm230_vm3, %v1318_v36 }
0x1c5d   :  { %3574 = vmatprep.mubr.msk.bf16.mxu0 %vm3975_vm0, %v3974_v0 }
0x1d23   :  { %v1519_v38 = vpop.f32.mrb[44].mxu1 }
0x1d24   :  { %v1525_v43 = vadd.f32 %v1519_v38, %v1387_v37  ;;  %v3568_v45 = vpop.f32.mrb[45].mxu1 }
0x1d25   :  { %v1522_v51 = vpop.f32.mrb[46].mxu1 }
0x1d26   :  { %v1526_v46 = vmul.f32 %v4503_v12, %v1525_v43  ;;  %v3569_v53 = vpop.f32.mrb[47].mxu1 }
0x1d28   :  { %3876 = vtanh.f32 %v1526_v46 }
0x1d2f   :  { %v4544_v13 = vpop.f32.mrb[44].mxu0 }
0x1d30   :  { %v4546_v42 = vpop.f32.mrb[45].mxu0 }
0x1d31   :  { %v4548_v22 = vpop.f32.mrb[46].mxu0  ;;  %v1400_v45 = vadd.f32 %v4497_v2, %v4546_v42 }
0x1d32   :  { %v3877_v56 = vpop.eup %3876  ;;  %v4550_v59 = vpop.f32.mrb[47].mxu0 }
0x1d33   :  { %v1528_v60 = vmul.f32 %v4510_v49, %v3877_v56 }
0x1d35   :  { %v1529_v55 = vadd.f32 %v4516_v52, %v1528_v60 }
0x1d37   :  { %1530 = vrot.lane.b32.xlu1 %v1529_v55, %s3977_s19 }
0x1da9   :  { %v1531_v61 = vpop.permute.xlu1 %1530 }
0x1daa   :  { %v1532_v47 = vsel %vm92_vm2, %v1477_v28, %v1531_v61 }
0x1dab   :  { %v1533_v62 = vmul.f32 %v1532_v47, %v1529_v55 }
0x1dad   :  { %1534 = vrot.lane.b32.xlu1 %v1533_v62, %s3978_s22 }
0x1e1f   :  { %v1535_v63 = vpop.permute.xlu1 %1534 }
0x1e20   :  { %v1536_v3 = vadd.f32 %v1535_v63, %v1533_v62 }
0x1e22   :  { %3878 = vtanh.f32 %v1536_v3 }
0x1e2c   :  { %v3879_v4 = vpop.eup %3878 }
0x1e2d   :  { %v1538_v9 = vmul.f32 %v3879_v4, %v1531_v61 }
0x1e2f   :  { %v1539_v10 = vpack.c.bf16 %v1538_v9, %v1538_v9  ;;  %1540 = vst.msk [vmem:[#allocation2 + $0x8] sm:$0xff] %vm230_vm3, %v1538_v9 }
0x1e31   :  { %3575 = vmatmul.mubr.msk.bf16.vlgmr.msra.gmra.mrb[48].mxu0 %vm230_vm3, %v1539_v10 }
0x1e32   :  { %3587 = vmatpush3.bf16.msra.mxu0 %v4466_v54  ;;  %3590 = vmatprep.mubr.msk.bf16.mxu0 %vm3975_vm0, %v3974_v0 }
0x1e33   :  { %3588 = vmatprep.subr.bf16.mxu0 %v3974_v0 }
0x1e36   :  { %3589 = vmatpush3.bf16.msra.mxu0 %v4473_v20 }
0x1e37   :  { %3602 = vmatprep.subr.bf16.mxu0 %v3974_v0 }
0x1f04   :  { %v1578_v1 = vpop.f32.mrb[48].mxu0 }
0x1f05   :  { %v1584_v50 = vadd.f32 %v1578_v1, %v1392_v7  ;;  %v3576_v57 = vpop.f32.mrb[49].mxu0 }
0x1f06   :  { %v1581_v5 = vpop.f32.mrb[50].mxu0 }
0x1f07   :  { %v1585_v14 = vmul.f32 %v4503_v12, %v1584_v50  ;;  %v3577_v48 = vpop.f32.mrb[51].mxu0  ;;  %v1403_v50 = vadd.f32 %v4497_v2, %v4550_v59 }
0x1f09   :  { %3880 = vtanh.f32 %v1585_v14 }
0x1f13   :  { %v3881_v58 = vpop.eup %3880 }
0x1f14   :  { %v1587_v8 = vmul.f32 %v4510_v49, %v3881_v58 }
0x1f16   :  { %v1588_v15 = vadd.f32 %v4516_v52, %v1587_v8 }
0x1f18   :  { %1589 = vrot.lane.b32.xlu0 %v1588_v15, %s3977_s19 }
0x1f8a   :  { %v1590_v39 = vpop.permute.xlu0 %1589 }
0x1f8b   :  { %v1591_v16 = vsel %vm92_vm2, %v1536_v3, %v1590_v39 }
0x1f8c   :  { %v1592_v40 = vmul.f32 %v1591_v16, %v1588_v15 }
0x1f8e   :  { %1593 = vrot.lane.b32.xlu1 %v1592_v40, %s3978_s22 }
0x2000   :  { %v1594_v17 = vpop.permute.xlu1 %1593 }
0x2001   :  { %v1595_v18 = vadd.f32 %v1594_v17, %v1592_v40  ;;  %v3798_v40 = vld [vmem:[%s5032_s10] sm:$0xff]  }
0x2003   :  { %3882 = vtanh.f32 %v1595_v18 }
0x200d   :  { %v3883_v19 = vpop.eup %3882 }
0x200e   :  { %v1597_v21 = vmul.f32 %v3883_v19, %v1590_v39 }
0x2010   :  { %1599 = vst.msk [vmem:[#allocation2 + $0x10] sm:$0xff] %vm230_vm3, %v1597_v21  ;;  %v1598_v23 = vpack.c.bf16 %v1597_v21, %v1597_v21 }
0x2012   :  { %3583 = vmatmul.mubr.msk.bf16.vlgmr.msra.gmra.mrb[48].mxu1 %vm230_vm3, %v1598_v23  ;;  %v1904_v23 = vld [vmem:[#allocation2 + $0x8] sm:$0xff] }
0x2013   :  { %3595 = vmatpush3.bf16.msra.mxu1 %v4466_v54  ;;  %3598 = vmatprep.mubr.msk.bf16.mxu1 %vm3975_vm0, %v3974_v0 }
0x2014   :  { %3596 = vmatprep.subr.bf16.mxu1 %v3974_v0 }
0x2017   :  { %3597 = vmatpush3.bf16.msra.mxu1 %v4473_v20 }
0x2018   :  { %3610 = vmatprep.subr.bf16.mxu1 %v3974_v0 }
0x20e5   :  { %v1637_v25 = vpop.f32.mrb[48].mxu1 }
0x20e6   :  { %v1643_v27 = vadd.f32 %v1637_v25, %v1395_v24  ;;  %v3584_v28 = vpop.f32.mrb[49].mxu1  ;;  %v1903_v25 = vld [vmem:[#allocation2] sm:$0xff] }
0x20e7   :  { %v1640_v29 = vpop.f32.mrb[50].mxu1  ;;  %v1911_v28 = vpack.c.bf16 %v1904_v23, %v1903_v25 }
0x20e8   :  { %v1644_v30 = vmul.f32 %v4503_v12, %v1643_v27  ;;  %v3585_v31 = vpop.f32.mrb[51].mxu1  ;;  %v3799_v27 = vld [vmem:[%s5032_s10 + $0x8] sm:$0xff]  }
0x20ea   :  { %3884 = vtanh.f32 %v1644_v30  ;;  %v1905_v30 = vld [vmem:[#allocation2 + $0x10] sm:$0xff] }
0x20f4   :  { %v3885_v32 = vpop.eup %3884 }
0x20f5   :  { %v1646_v33 = vmul.f32 %v4510_v49, %v3885_v32 }
0x20f7   :  { %v1647_v34 = vadd.f32 %v4516_v52, %v1646_v33 }
0x20f9   :  { %1648 = vrot.lane.b32.xlu0 %v1647_v34, %s3977_s19 }
0x216b   :  { %v1649_v11 = vpop.permute.xlu0 %1648 }
0x216c   :  { %v1650_v41 = vsel %vm92_vm2, %v1595_v18, %v1649_v11 }
0x216d   :  { %v1651_v44 = vmul.f32 %v1650_v41, %v1647_v34 }
0x216f   :  { %1652 = vrot.lane.b32.xlu1 %v1651_v44, %s3978_s22 }
0x21e1   :  { %v1653_v35 = vpop.permute.xlu1 %1652 }
0x21e2   :  { %v1654_v36 = vadd.f32 %v1653_v35, %v1651_v44 }
0x21e4   :  { %3886 = vtanh.f32 %v1654_v36 }
0x21ee   :  { %v3887_v37 = vpop.eup %3886 }
0x21ef   :  { %v1656_v38 = vmul.f32 %v3887_v37, %v1649_v11  ;;  %v1408_v11 = vadd.f32 %v4544_v13, %v4497_v2 }
0x21f1   :  { %1658 = vst.msk [vmem:[#allocation2 + $0x18] sm:$0xff] %vm230_vm3, %v1656_v38  ;;  %v1657_v43 = vpack.c.bf16 %v1656_v38, %v1656_v38 }
0x21f3   :  { %3591 = vmatmul.mubr.msk.bf16.vlgmr.msra.gmra.mrb[52].mxu0 %vm230_vm3, %v1657_v43 }
0x21f4   :  { %3603 = vmatpush3.bf16.msra.mxu0 %v4466_v54  ;;  %3606 = vmatprep.mubr.msk.bf16.mxu0 %vm3975_vm0, %v3974_v0 }
0x21f5   :  { %3604 = vmatprep.subr.bf16.mxu0 %v3974_v0 }
0x21f8   :  { %3605 = vmatpush3.bf16.msra.mxu0 %v4473_v20  ;;  %v1906_v29 = vld [vmem:[#allocation2 + $0x18] sm:$0xff] }
0x21f9   :  { %3618 = vmatprep.subr.bf16.mxu0 %v3798_v40  ;;  %v1912_v33 = vpack.c.bf16 %v1906_v29, %v1905_v30 }
0x22c6   :  { %v1696_v51 = vpop.f32.mrb[52].mxu0 }
0x22c7   :  { %v1702_v46 = vadd.f32 %v1696_v51, %v1400_v45  ;;  %v3592_v53 = vpop.f32.mrb[53].mxu0 }
0x22c8   :  { %v1699_v56 = vpop.f32.mrb[54].mxu0 }
0x22c9   :  { %v1703_v60 = vmul.f32 %v4503_v12, %v1702_v46  ;;  %v3593_v55 = vpop.f32.mrb[55].mxu0 }
0x22cb   :  { %3888 = vtanh.f32 %v1703_v60 }
0x22d5   :  { %v3889_v61 = vpop.eup %3888 }
0x22d6   :  { %v1705_v47 = vmul.f32 %v4510_v49, %v3889_v61 }
0x22d8   :  { %v1706_v62 = vadd.f32 %v4516_v52, %v1705_v47  ;;  %v4655_v47 = vld [vmem:[%s5033_s11] sm:$0xff]  }
0x22da   :  { %1707 = vrot.lane.b32.xlu0 %v1706_v62, %s3977_s19 }
0x234c   :  { %v1708_v63 = vpop.permute.xlu0 %1707 }
0x234d   :  { %v1709_v3 = vsel %vm92_vm2, %v1654_v36, %v1708_v63 }
0x234e   :  { %v1710_v42 = vmul.f32 %v1709_v3, %v1706_v62  ;;  %v4662_v62 = vld [vmem:[%s5033_s11 + $0x8] sm:$0xff]  }
0x2350   :  { %1711 = vrot.lane.b32.xlu1 %v1710_v42, %s3978_s22 }
0x23c2   :  { %v1712_v4 = vpop.permute.xlu1 %1711 }
0x23c3   :  { %v1713_v9 = vadd.f32 %v1712_v4, %v1710_v42 }
0x23c5   :  { %3890 = vtanh.f32 %v1713_v9 }
0x23cf   :  { %v3891_v10 = vpop.eup %3890 }
0x23d0   :  { %v1715_v7 = vmul.f32 %v3891_v10, %v1708_v63  ;;  %v1411_v10 = vadd.f32 %v4548_v22, %v4497_v2 }
0x23d2   :  { %1717 = vst.msk [vmem:[#allocation2 + $0x20] sm:$0xff] %vm230_vm3, %v1715_v7  ;;  %v1716_v1 = vpack.c.bf16 %v1715_v7, %v1715_v7 }
0x23d4   :  { %3599 = vmatmul.mubr.msk.bf16.vlgmr.msra.gmra.mrb[52].mxu1 %vm230_vm3, %v1716_v1 }
0x23d5   :  { %3611 = vmatpush3.bf16.msra.mxu1 %v4466_v54  ;;  %3614 = vmatprep.mubr.msk.bf16.mxu1 %vm3975_vm0, %v3974_v0 }
0x23d6   :  { %3612 = vmatprep.subr.bf16.mxu1 %v3974_v0 }
0x23d9   :  { %3613 = vmatpush3.bf16.msra.mxu1 %v4473_v20  ;;  %v1907_v31 = vld [vmem:[#allocation2 + $0x20] sm:$0xff] }
0x23da   :  { %3630 = vmatprep.subr.bf16.mxu1 %v3974_v0 }
0x24a7   :  { %v1755_v57 = vpop.f32.mrb[52].mxu1 }
0x24a8   :  { %v1761_v5 = vadd.f32 %v1755_v57, %v1403_v50  ;;  %v3600_v14 = vpop.f32.mrb[53].mxu1 }
0x24a9   :  { %v1758_v48 = vpop.f32.mrb[54].mxu1  ;;  %v4686_v14 = vld [vmem:[%s5034_s12] ss:$0 sm:$0xff] }
0x24aa   :  { %v1762_v58 = vmul.f32 %v4503_v12, %v1761_v5  ;;  %v3601_v8 = vpop.f32.mrb[55].mxu1 }
0x24ac   :  { %3892 = vtanh.f32 %v1762_v58 }
0x24b6   :  { %v3893_v54 = vpop.eup %3892 }
0x24b7   :  { %v1764_v15 = vmul.f32 %v4510_v49, %v3893_v54 }
0x24b9   :  { %v1765_v39 = vadd.f32 %v4516_v52, %v1764_v15 }
0x24bb   :  { %1766 = vrot.lane.b32.xlu0 %v1765_v39, %s3977_s19 }
0x252d   :  { %v1767_v20 = vpop.permute.xlu0 %1766 }
0x252e   :  { %v1768_v16 = vsel %vm92_vm2, %v1713_v9, %v1767_v20 }
0x252f   :  { %v1769_v59 = vmul.f32 %v1768_v16, %v1765_v39 }
0x2531   :  { %1770 = vrot.lane.b32.xlu1 %v1769_v59, %s3978_s22 }
0x25a3   :  { %v1771_v17 = vpop.permute.xlu1 %1770 }
0x25a4   :  { %v1772_v18 = vadd.f32 %v1771_v17, %v1769_v59 }
0x25a6   :  { %3894 = vtanh.f32 %v1772_v18 }
0x25b0   :  { %v3895_v19 = vpop.eup %3894 }
0x25b1   :  { %v1774_v21 = vmul.f32 %v3895_v19, %v1767_v20 }
0x25b3   :  { %1776 = vst.msk [vmem:[#allocation2 + $0x28] sm:$0xff] %vm230_vm3, %v1774_v21  ;;  %v1775_v24 = vpack.c.bf16 %v1774_v21, %v1774_v21 }
0x25b5   :  { %3607 = vmatmul.mubr.msk.bf16.vlgmr.msra.gmra.mrb[56].mxu0 %vm230_vm3, %v1775_v24 }
0x25b6   :  { %3619 = vmatpush3.bf16.msra.mxu0 %v3798_v40  ;;  %3622 = vmatprep.mubr.msk.bf16.mxu0 %vm230_vm3, %v1911_v28 }
0x25b7   :  { %3620 = vmatprep.subr.bf16.mxu0 %v3799_v27 }
0x25ba   :  { %3621 = vmatpush3.bf16.msra.mxu0 %v3799_v27  ;;  %v1908_v32 = vld [vmem:[#allocation2 + $0x28] sm:$0xff] }
0x25bb   :  { %v1913_v34 = vpack.c.bf16 %v1908_v32, %v1907_v31  ;;  %3646 = vmatprep.subr.bf16.mxu0 %v3974_v0 }
0x25bd   :  { %3623 = vmatmul.mubr.msk.bf16.vlgmr.msra.gmra.mrb[60].mxu0 %vm230_vm3, %v1912_v33 }
0x25be   :  { %3626 = vmatprep.mubr.msk.bf16.mxu0 %vm230_vm3, %v1913_v34  ;;  %3647 = vmatpush3.bf16.msra.mxu0 %v4655_v47 }
0x25bf   :  { %3648 = vmatprep.subr.bf16.mxu0 %v3974_v0 }
0x25c2   :  { %3649 = vmatpush3.bf16.msra.mxu0 %v4662_v62 }
0x25c3   :  { %3662 = vmatprep.subr.bf16.mxu0 %v3974_v0 }
0x2688   :  { %v1814_v41 = vpop.f32.mrb[56].mxu0 }
0x2689   :  { %v1820_v44 = vadd.f32 %v1814_v41, %v1408_v11  ;;  %v3608_v35 = vpop.f32.mrb[57].mxu0 }
0x268a   :  { %v1817_v36 = vpop.f32.mrb[58].mxu0 }
0x268b   :  { %v1821_v37 = vmul.f32 %v4503_v12, %v1820_v44  ;;  %v3609_v38 = vpop.f32.mrb[59].mxu0 }
0x268d   :  { %3896 = vtanh.f32 %v1821_v37 }
0x2690   :  { %v4640_v43 = vpop.f32.mrb[60].mxu0 }
0x2691   :  { %v1979_v45 = vpop.f32.mrb[61].mxu0 }
0x2692   :  { %v4642_v51 = vpop.f32.mrb[62].mxu0  ;;  %v1980_v48 = vadd.f32 %v4686_v14, %v1979_v45 }
0x2693   :  { %v4644_v46 = vpop.f32.mrb[63].mxu0 }
0x2694   :  { %v1983_v37 = vadd.f32 %v4686_v14, %v4644_v46 }
0x2697   :  { %v3897_v53 = vpop.eup %3896 }
0x2698   :  { %v1823_v56 = vmul.f32 %v4510_v49, %v3897_v53 }
0x269a   :  { %v1824_v13 = vadd.f32 %v4516_v52, %v1823_v56 }
0x269c   :  { %1825 = vrot.lane.b32.xlu0 %v1824_v13, %s3977_s19 }
0x270e   :  { %v1826_v60 = vpop.permute.xlu0 %1825 }
0x270f   :  { %v1827_v55 = vsel %vm92_vm2, %v1772_v18, %v1826_v60 }
0x2710   :  { %v1828_v61 = vmul.f32 %v1827_v55, %v1824_v13 }
0x2712   :  { %1829 = vrot.lane.b32.xlu1 %v1828_v61, %s3978_s22 }
0x2784   :  { %v1830_v63 = vpop.permute.xlu1 %1829 }
0x2785   :  { %v1831_v3 = vadd.f32 %v1830_v63, %v1828_v61 }
0x2787   :  { %3898 = vtanh.f32 %v1831_v3 }
0x2791   :  { %v3899_v42 = vpop.eup %3898 }
0x2792   :  { %v1833_v4 = vmul.f32 %v3899_v42, %v1826_v60 }
0x2794   :  { %1835 = vst.msk [vmem:[#allocation2 + $0x30] sm:$0xff] %vm230_vm3, %v1833_v4  ;;  %v1834_v9 = vpack.c.bf16 %v1833_v4, %v1833_v4 }
0x2796   :  { %3615 = vmatmul.mubr.msk.bf16.vlgmr.msra.gmra.mrb[56].mxu1 %vm230_vm3, %v1834_v9 }
0x2797   :  { %3631 = vmatpush3.bf16.msra.mxu1 %v4655_v47  ;;  %3634 = vmatprep.mubr.msk.bf16.mxu1 %vm3975_vm0, %v3974_v0 }
0x2798   :  { %3632 = vmatprep.subr.bf16.mxu1 %v3974_v0 }
0x279b   :  { %3633 = vmatpush3.bf16.msra.mxu1 %v4662_v62  ;;  %v1909_v44 = vld [vmem:[#allocation2 + $0x30] sm:$0xff] }
0x279c   :  { %3638 = vmatprep.subr.bf16.mxu1 %v3974_v0 }
0x279e   :  { %3635 = vmatmul.mubr.bf16.vlgmr.msra.gmra.mrb[60].mxu1 %v3976_v6 }
0x279f   :  { %3639 = vmatpush3.bf16.msra.mxu1 %v4655_v47  ;;  %3642 = vmatprep.mubr.msk.bf16.mxu1 %vm3975_vm0, %v3974_v0 }
0x27a0   :  { %3640 = vmatprep.subr.bf16.mxu1 %v3974_v0 }
0x27a3   :  { %3641 = vmatpush3.bf16.msra.mxu1 %v4662_v62 }
0x27a4   :  { %3654 = vmatprep.subr.bf16.mxu1 %v3974_v0 }
0x2869   :  { %v1873_v7 = vpop.f32.mrb[56].mxu1 }
0x286a   :  { %v1879_v1 = vadd.f32 %v1873_v7, %v1411_v10  ;;  %v3616_v50 = vpop.f32.mrb[57].mxu1 }
0x286b   :  { %v1876_v57 = vpop.f32.mrb[58].mxu1 }
0x286c   :  { %v3617_v5 = vpop.f32.mrb[59].mxu1  ;;  %v1880_v58 = vmul.f32 %v4503_v12, %v1879_v1 }
0x286e   :  { %3900 = vtanh.f32 %v1880_v58  ;;  %v1988_v58 = vadd.f32 %v4640_v43, %v4686_v14 }
0x2871   :  { %v2056_v8 = vpop.f32.mrb[60].mxu1 }
0x2872   :  { %v2062_v54 = vadd.f32 %v2056_v8, %v1980_v48  ;;  %v3636_v15 = vpop.f32.mrb[61].mxu1 }
0x2873   :  { %v2059_v39 = vpop.f32.mrb[62].mxu1 }
0x2874   :  { %v2063_v2 = vmul.f32 %v4503_v12, %v2062_v54  ;;  %v3637_v22 = vpop.f32.mrb[63].mxu1 }
0x2876   :  { %3902 = vtanh.f32 %v2063_v2 }
0x2878   :  { %v3901_v20 = vpop.eup %3900 }
0x2879   :  { %v1882_v17 = vmul.f32 %v4510_v49, %v3901_v20 }
0x287b   :  { %v1883_v18 = vadd.f32 %v4516_v52, %v1882_v17 }
0x2880   :  { %v3903_v16 = vpop.eup %3902 }
0x2881   :  { %v2065_v59 = vmul.f32 %v4510_v49, %v3903_v16 }
0x2883   :  { %v2066_v40 = vadd.f32 %v4516_v52, %v2065_v59 }
0x2885   :  { %2067 = vrot.lane.b32.xlu0 %v2066_v40, %s3977_s19 }
0x2889   :  { %1884 = vrot.lane.b32.xlu0 %v1883_v18, %s3977_s19 }
0x28f7   :  { %v2068_v19 = vpop.permute.xlu0 %2067 }
0x28f8   :  { %v2069_v21 = vsel %vm92_vm2, 0.0, %v2068_v19 }
0x28f9   :  { %v2070_v23 = vmul.f32 %v2069_v21, %v2066_v40 }
0x28fb   :  { %2071 = vrot.lane.b32.xlu1 %v2070_v23, %s3978_s22  ;;  %v1885_v24 = vpop.permute.xlu0 %1884 }
0x28fc   :  { %v1886_v25 = vsel %vm92_vm2, %v1831_v3, %v1885_v24 }
0x28fd   :  { %v1887_v27 = vmul.f32 %v1886_v25, %v1883_v18  ;;  %v1991_v25 = vadd.f32 %v4642_v51, %v4686_v14 }
0x28ff   :  { %1888 = vrot.lane.b32.xlu0 %v1887_v27, %s3978_s22 }
0x296d   :  { %v2072_v28 = vpop.permute.xlu1 %2071 }
0x296e   :  { %v2073_v29 = vadd.f32 %v2072_v28, %v2070_v23 }
0x2970   :  { %3904 = vtanh.f32 %v2073_v29 }
0x2971   :  { %v1889_v30 = vpop.permute.xlu0 %1888 }
0x2972   :  { %v1890_v31 = vadd.f32 %v1889_v30, %v1887_v27 }
0x2974   :  { %3906 = vtanh.f32 %v1890_v31 }
0x297a   :  { %v3905_v32 = vpop.eup %3904 }
0x297b   :  { %v2075_v33 = vmul.f32 %v3905_v32, %v2068_v19 }
0x297d   :  { %2077 = vst.msk [vmem:[#allocation3] sm:$0xff] %vm230_vm3, %v2075_v33  ;;  %v2076_v34 = vpack.c.bf16 %v2075_v33, %v2075_v33 }
0x297e   :  { %v3907_v11 = vpop.eup %3906 }
0x297f   :  { %v1892_v41 = vmul.f32 %v3907_v11, %v1885_v24  ;;  %3643 = vmatmul.mubr.msk.bf16.vlgmr.msra.gmra.mrb[64].mxu1 %vm230_vm3, %v2076_v34 }
0x2980   :  { %3655 = vmatpush3.bf16.msra.mxu1 %v4655_v47  ;;  %3658 = vmatprep.mubr.msk.bf16.mxu1 %vm3975_vm0, %v3974_v0 }
0x2981   :  { %1893 = vst.msk [vmem:[#allocation2 + $0x38] sm:$0xff] %vm230_vm3, %v1892_v41  ;;  %3656 = vmatprep.subr.bf16.mxu1 %v3974_v0 }
0x2984   :  { %3657 = vmatpush3.bf16.msra.mxu1 %v4662_v62 }
0x2985   :  { %3670 = vmatprep.subr.bf16.mxu1 %v3974_v0 }
0x2988   :  { %v1910_v35 = vld [vmem:[#allocation2 + $0x38] sm:$0xff] }
0x2989   :  { %v1914_v36 = vpack.c.bf16 %v1910_v35, %v1909_v44 }
0x298b   :  { %3627 = vmatmul.mubr.msk.bf16.gmra.mrb[64].mxu0 %vm230_vm3, %v1914_v36 }
0x298c   :  { %3650 = vmatprep.mubr.msk.bf16.mxu0 %vm3975_vm0, %v3974_v0 }
0x2a52   :  { %v2115_v38 = vpop.f32.mrb[64].mxu1 }
0x2a53   :  { %v2121_v45 = vadd.f32 %v2115_v38, %v1983_v37  ;;  %v3644_v53 = vpop.f32.mrb[65].mxu1 }
0x2a54   :  { %v2118_v56 = vpop.f32.mrb[66].mxu1 }
0x2a55   :  { %v2122_v13 = vmul.f32 %v4503_v12, %v2121_v45  ;;  %v3645_v60 = vpop.f32.mrb[67].mxu1 }
0x2a57   :  { %3908 = vtanh.f32 %v2122_v13 }
0x2a5e   :  { %v4718_v55 = vpop.f32.mrb[64].mxu0 }
0x2a5f   :  { %v4720_v61 = vpop.f32.mrb[65].mxu0 }
0x2a60   :  { %v4722_v63 = vpop.f32.mrb[66].mxu0  ;;  %v1996_v53 = vadd.f32 %v4686_v14, %v4720_v61 }
0x2a61   :  { %v3909_v3 = vpop.eup %3908  ;;  %v4724_v42 = vpop.f32.mrb[67].mxu0 }
0x2a62   :  { %v2124_v4 = vmul.f32 %v4510_v49, %v3909_v3 }
0x2a64   :  { %v2125_v46 = vadd.f32 %v4516_v52, %v2124_v4 }
0x2a66   :  { %2126 = vrot.lane.b32.xlu1 %v2125_v46, %s3977_s19 }
0x2ad8   :  { %v2127_v9 = vpop.permute.xlu1 %2126 }
0x2ad9   :  { %v2128_v10 = vsel %vm92_vm2, %v2073_v29, %v2127_v9 }
0x2ada   :  { %v2129_v7 = vmul.f32 %v2128_v10, %v2125_v46 }
0x2adc   :  { %2130 = vrot.lane.b32.xlu1 %v2129_v7, %s3978_s22 }
0x2b4e   :  { %v2131_v1 = vpop.permute.xlu1 %2130 }
0x2b4f   :  { %v2132_v50 = vadd.f32 %v2131_v1, %v2129_v7 }
0x2b51   :  { %3910 = vtanh.f32 %v2132_v50 }
0x2b5b   :  { %v3911_v57 = vpop.eup %3910 }
0x2b5c   :  { %v2134_v5 = vmul.f32 %v3911_v57, %v2127_v9 }
0x2b5e   :  { %v2135_v48 = vpack.c.bf16 %v2134_v5, %v2134_v5  ;;  %2136 = vst.msk [vmem:[#allocation3 + $0x8] sm:$0xff] %vm230_vm3, %v2134_v5 }
0x2b60   :  { %3651 = vmatmul.mubr.msk.bf16.vlgmr.msra.gmra.mrb[68].mxu0 %vm230_vm3, %v2135_v48 }
0x2b61   :  { %3663 = vmatpush3.bf16.msra.mxu0 %v4655_v47  ;;  %3666 = vmatprep.mubr.msk.bf16.mxu0 %vm3975_vm0, %v3974_v0 }
0x2b62   :  { %3664 = vmatprep.subr.bf16.mxu0 %v3974_v0 }
0x2b65   :  { %3665 = vmatpush3.bf16.msra.mxu0 %v4662_v62 }
0x2b66   :  { %3678 = vmatprep.subr.bf16.mxu0 %v3974_v0 }
0x2c33   :  { %v2174_v8 = vpop.f32.mrb[68].mxu0 }
0x2c34   :  { %v2180_v54 = vadd.f32 %v2174_v8, %v1988_v58  ;;  %v3652_v15 = vpop.f32.mrb[69].mxu0 }
0x2c35   :  { %v2177_v39 = vpop.f32.mrb[70].mxu0 }
0x2c36   :  { %v2181_v2 = vmul.f32 %v4503_v12, %v2180_v54  ;;  %v3653_v22 = vpop.f32.mrb[71].mxu0  ;;  %v1999_v54 = vadd.f32 %v4686_v14, %v4724_v42 }
0x2c38   :  { %3912 = vtanh.f32 %v2181_v2 }
0x2c42   :  { %v3913_v20 = vpop.eup %3912 }
0x2c43   :  { %v2183_v16 = vmul.f32 %v4510_v49, %v3913_v20 }
0x2c45   :  { %v2184_v59 = vadd.f32 %v4516_v52, %v2183_v16 }
0x2c47   :  { %2185 = vrot.lane.b32.xlu0 %v2184_v59, %s3977_s19 }
0x2cb9   :  { %v2186_v40 = vpop.permute.xlu0 %2185 }
0x2cba   :  { %v2187_v17 = vsel %vm92_vm2, %v2132_v50, %v2186_v40 }
0x2cbb   :  { %v2188_v43 = vmul.f32 %v2187_v17, %v2184_v59 }
0x2cbd   :  { %2189 = vrot.lane.b32.xlu1 %v2188_v43, %s3978_s22 }
0x2d2f   :  { %v2190_v18 = vpop.permute.xlu1 %2189 }
0x2d30   :  { %v2191_v19 = vadd.f32 %v2190_v18, %v2188_v43  ;;  %v3802_v43 = vld [vmem:[%s5035_s13] sm:$0xff]  }
0x2d32   :  { %3914 = vtanh.f32 %v2191_v19 }
0x2d3c   :  { %v3915_v21 = vpop.eup %3914 }
0x2d3d   :  { %v2193_v23 = vmul.f32 %v3915_v21, %v2186_v40 }
0x2d3f   :  { %2195 = vst.msk [vmem:[#allocation3 + $0x10] sm:$0xff] %vm230_vm3, %v2193_v23  ;;  %v2194_v24 = vpack.c.bf16 %v2193_v23, %v2193_v23 }
0x2d41   :  { %3659 = vmatmul.mubr.msk.bf16.vlgmr.msra.gmra.mrb[68].mxu1 %vm230_vm3, %v2194_v24  ;;  %v2500_v24 = vld [vmem:[#allocation3 + $0x8] sm:$0xff] }
0x2d42   :  { %3671 = vmatpush3.bf16.msra.mxu1 %v4655_v47  ;;  %3674 = vmatprep.mubr.msk.bf16.mxu1 %vm3975_vm0, %v3974_v0 }
0x2d43   :  { %3672 = vmatprep.subr.bf16.mxu1 %v3974_v0 }
0x2d46   :  { %3673 = vmatpush3.bf16.msra.mxu1 %v4662_v62 }
0x2d47   :  { %3686 = vmatprep.subr.bf16.mxu1 %v3974_v0 }
0x2e14   :  { %v2233_v27 = vpop.f32.mrb[68].mxu1 }
0x2e15   :  { %v2239_v28 = vadd.f32 %v2233_v27, %v1991_v25  ;;  %v3660_v29 = vpop.f32.mrb[69].mxu1  ;;  %v2499_v27 = vld [vmem:[#allocation3] sm:$0xff] }
0x2e16   :  { %v2236_v30 = vpop.f32.mrb[70].mxu1  ;;  %v2507_v29 = vpack.c.bf16 %v2500_v24, %v2499_v27 }
0x2e17   :  { %v2240_v31 = vmul.f32 %v4503_v12, %v2239_v28  ;;  %v3661_v32 = vpop.f32.mrb[71].mxu1  ;;  %v3803_v28 = vld [vmem:[%s5035_s13 + $0x8] sm:$0xff]  }
0x2e19   :  { %3916 = vtanh.f32 %v2240_v31  ;;  %v2501_v31 = vld [vmem:[#allocation3 + $0x10] sm:$0xff] }
0x2e23   :  { %v3917_v33 = vpop.eup %3916 }
0x2e24   :  { %v2242_v34 = vmul.f32 %v4510_v49, %v3917_v33 }
0x2e26   :  { %v2243_v11 = vadd.f32 %v4516_v52, %v2242_v34 }
0x2e28   :  { %2244 = vrot.lane.b32.xlu0 %v2243_v11, %s3977_s19 }
0x2e9a   :  { %v2245_v41 = vpop.permute.xlu0 %2244 }
0x2e9b   :  { %v2246_v44 = vsel %vm92_vm2, %v2191_v19, %v2245_v41 }
0x2e9c   :  { %v2247_v51 = vmul.f32 %v2246_v44, %v2243_v11 }
0x2e9e   :  { %2248 = vrot.lane.b32.xlu1 %v2247_v51, %s3978_s22 }
0x2f10   :  { %v2249_v35 = vpop.permute.xlu1 %2248 }
0x2f11   :  { %v2250_v36 = vadd.f32 %v2249_v35, %v2247_v51 }
0x2f13   :  { %3918 = vtanh.f32 %v2250_v36 }
0x2f1d   :  { %v3919_v37 = vpop.eup %3918 }
0x2f1e   :  { %v2252_v38 = vmul.f32 %v3919_v37, %v2245_v41  ;;  %v2004_v41 = vadd.f32 %v4718_v55, %v4686_v14 }
0x2f20   :  { %2254 = vst.msk [vmem:[#allocation3 + $0x18] sm:$0xff] %vm230_vm3, %v2252_v38  ;;  %v2253_v45 = vpack.c.bf16 %v2252_v38, %v2252_v38 }
0x2f22   :  { %3667 = vmatmul.mubr.msk.bf16.vlgmr.msra.gmra.mrb[72].mxu0 %vm230_vm3, %v2253_v45 }
0x2f23   :  { %3679 = vmatpush3.bf16.msra.mxu0 %v4655_v47  ;;  %3682 = vmatprep.mubr.msk.bf16.mxu0 %vm3975_vm0, %v3974_v0 }
0x2f24   :  { %3680 = vmatprep.subr.bf16.mxu0 %v3974_v0 }
0x2f27   :  { %3681 = vmatpush3.bf16.msra.mxu0 %v4662_v62  ;;  %v2502_v30 = vld [vmem:[#allocation3 + $0x18] sm:$0xff] }
0x2f28   :  { %3694 = vmatprep.subr.bf16.mxu0 %v3802_v43  ;;  %v2508_v34 = vpack.c.bf16 %v2502_v30, %v2501_v31 }
0x2ff5   :  { %v2292_v56 = vpop.f32.mrb[72].mxu0 }
0x2ff6   :  { %v2298_v13 = vadd.f32 %v2292_v56, %v1996_v53  ;;  %v3668_v60 = vpop.f32.mrb[73].mxu0 }
0x2ff7   :  { %v2295_v3 = vpop.f32.mrb[74].mxu0 }
0x2ff8   :  { %v2299_v4 = vmul.f32 %v4503_v12, %v2298_v13  ;;  %v3669_v46 = vpop.f32.mrb[75].mxu0 }
0x2ffa   :  { %3920 = vtanh.f32 %v2299_v4 }
0x3004   :  { %v3921_v9 = vpop.eup %3920 }
0x3005   :  { %v2301_v10 = vmul.f32 %v4510_v49, %v3921_v9  ;;  %v4829_v9 = vld [vmem:[%s5036_s14] sm:$0xff]  }
0x3007   :  { %v2302_v7 = vadd.f32 %v4516_v52, %v2301_v10 }
0x3009   :  { %2303 = vrot.lane.b32.xlu0 %v2302_v7, %s3977_s19 }
0x307b   :  { %v2304_v1 = vpop.permute.xlu0 %2303 }
0x307c   :  { %v2305_v50 = vsel %vm92_vm2, %v2250_v36, %v2304_v1 }
0x307d   :  { %v2306_v61 = vmul.f32 %v2305_v50, %v2302_v7 }
0x307f   :  { %2307 = vrot.lane.b32.xlu1 %v2306_v61, %s3978_s22 }
0x30f1   :  { %v2308_v57 = vpop.permute.xlu1 %2307 }
0x30f2   :  { %v2309_v5 = vadd.f32 %v2308_v57, %v2306_v61  ;;  %v2007_v61 = vadd.f32 %v4722_v63, %v4686_v14 }
0x30f4   :  { %3922 = vtanh.f32 %v2309_v5 }
0x30fe   :  { %v3923_v48 = vpop.eup %3922 }
0x30ff   :  { %v2311_v58 = vmul.f32 %v3923_v48, %v2304_v1 }
0x3101   :  { %2313 = vst.msk [vmem:[#allocation3 + $0x20] sm:$0xff] %vm230_vm3, %v2311_v58  ;;  %v2312_v8 = vpack.c.bf16 %v2311_v58, %v2311_v58 }
0x3103   :  { %3675 = vmatmul.mubr.msk.bf16.vlgmr.msra.gmra.mrb[72].mxu1 %vm230_vm3, %v2312_v8 }
0x3104   :  { %3687 = vmatpush3.bf16.msra.mxu1 %v4655_v47  ;;  %3690 = vmatprep.mubr.msk.bf16.mxu1 %vm3975_vm0, %v3974_v0 }
0x3105   :  { %3688 = vmatprep.subr.bf16.mxu1 %v3974_v0 }
0x3108   :  { %3689 = vmatpush3.bf16.msra.mxu1 %v4662_v62  ;;  %v2503_v32 = vld [vmem:[#allocation3 + $0x20] sm:$0xff] }
0x3109   :  { %3706 = vmatprep.subr.bf16.mxu1 %v3974_v0 }
0x31d6   :  { %v2351_v15 = vpop.f32.mrb[72].mxu1 }
0x31d7   :  { %v2357_v39 = vadd.f32 %v2351_v15, %v1999_v54  ;;  %v3676_v2 = vpop.f32.mrb[73].mxu1  ;;  %v4866_v15 = vld [vmem:[%s5055_s27] ss:$0 sm:$0xff] }
0x31d8   :  { %v2354_v22 = vpop.f32.mrb[74].mxu1 }
0x31d9   :  { %v2358_v20 = vmul.f32 %v4503_v12, %v2357_v39  ;;  %v3677_v16 = vpop.f32.mrb[75].mxu1 }
0x31db   :  { %3924 = vtanh.f32 %v2358_v20 }
0x31e5   :  { %v3925_v47 = vpop.eup %3924 }
0x31e6   :  { %v2360_v59 = vmul.f32 %v4510_v49, %v3925_v47 }
0x31e8   :  { %v2361_v40 = vadd.f32 %v4516_v52, %v2360_v59 }
0x31ea   :  { %2362 = vrot.lane.b32.xlu0 %v2361_v40, %s3977_s19 }
0x325c   :  { %v2363_v62 = vpop.permute.xlu0 %2362 }
0x325d   :  { %v2364_v17 = vsel %vm92_vm2, %v2309_v5, %v2363_v62 }
0x325e   :  { %v2365_v42 = vmul.f32 %v2364_v17, %v2361_v40  ;;  %v4873_v40 = vld [vmem:[%s5056_s29] ss:$0 sm:$0xff] }
0x325f   :  { %v4879_v17 = vld [vmem:[%s5025_s20] ss:$0 sm:$0xff] }
0x3260   :  { %2366 = vrot.lane.b32.xlu1 %v2365_v42, %s3978_s22 }
0x32d2   :  { %v2367_v18 = vpop.permute.xlu1 %2366 }
0x32d3   :  { %v2368_v19 = vadd.f32 %v2367_v18, %v2365_v42 }
0x32d5   :  { %3926 = vtanh.f32 %v2368_v19 }
0x32df   :  { %v3927_v21 = vpop.eup %3926 }
0x32e0   :  { %v2370_v23 = vmul.f32 %v3927_v21, %v2363_v62 }
0x32e2   :  { %2372 = vst.msk [vmem:[#allocation3 + $0x28] sm:$0xff] %vm230_vm3, %v2370_v23  ;;  %v2371_v25 = vpack.c.bf16 %v2370_v23, %v2370_v23 }
0x32e4   :  { %3683 = vmatmul.mubr.msk.bf16.vlgmr.msra.gmra.mrb[76].mxu0 %vm230_vm3, %v2371_v25 }
0x32e5   :  { %3695 = vmatpush3.bf16.msra.mxu0 %v3802_v43  ;;  %3698 = vmatprep.mubr.msk.bf16.mxu0 %vm230_vm3, %v2507_v29 }
0x32e6   :  { %3696 = vmatprep.subr.bf16.mxu0 %v3803_v28 }
0x32e9   :  { %3697 = vmatpush3.bf16.msra.mxu0 %v3803_v28  ;;  %v2504_v33 = vld [vmem:[#allocation3 + $0x28] sm:$0xff] }
0x32ea   :  { %v2509_v11 = vpack.c.bf16 %v2504_v33, %v2503_v32  ;;  %3722 = vmatprep.subr.bf16.mxu0 %v3974_v0 }
0x32ec   :  { %3699 = vmatmul.mubr.msk.bf16.vlgmr.msra.gmra.mrb[80].mxu0 %vm230_vm3, %v2508_v34 }
0x32ed   :  { %3702 = vmatprep.mubr.msk.bf16.mxu0 %vm230_vm3, %v2509_v11  ;;  %3723 = vmatpush3.bf16.msra.mxu0 %v4829_v9 }
0x32ee   :  { %3724 = vmatprep.subr.bf16.mxu0 %v3974_v0 }
0x33b7   :  { %v2410_v44 = vpop.f32.mrb[76].mxu0 }
0x33b8   :  { %v2416_v51 = vadd.f32 %v2410_v44, %v2004_v41  ;;  %v3684_v35 = vpop.f32.mrb[77].mxu0 }
0x33b9   :  { %v2413_v36 = vpop.f32.mrb[78].mxu0 }
0x33ba   :  { %v2417_v37 = vmul.f32 %v4503_v12, %v2416_v51  ;;  %v3685_v38 = vpop.f32.mrb[79].mxu0 }
0x33bc   :  { %3928 = vtanh.f32 %v2417_v37 }
0x33bf   :  { %v4814_v45 = vpop.f32.mrb[80].mxu0 }
0x33c0   :  { %v2575_v53 = vpop.f32.mrb[81].mxu0 }
0x33c1   :  { %v4816_v56 = vpop.f32.mrb[82].mxu0 }
0x33c2   :  { %v4818_v13 = vpop.f32.mrb[83].mxu0 }
0x33c6   :  { %v3929_v60 = vpop.eup %3928 }
0x33c7   :  { %v2419_v3 = vmul.f32 %v4510_v49, %v3929_v60  ;;  %v4836_v49 = vld [vmem:[%s5036_s14 + $0x8] sm:$0xff]  }
0x33c8   :  { %3725 = vmatpush3.bf16.msra.mxu0 %v4836_v49 }
0x33c9   :  { %v2420_v55 = vadd.f32 %v4516_v52, %v2419_v3  ;;  %3738 = vmatprep.subr.bf16.mxu0 %v3974_v0 }
0x33cb   :  { %2421 = vrot.lane.b32.xlu0 %v2420_v55, %s3977_s19 }
0x343d   :  { %v2422_v4 = vpop.permute.xlu0 %2421 }
0x343e   :  { %v2423_v12 = vsel %vm92_vm2, %v2368_v19, %v2422_v4 }
0x343f   :  { %v2424_v46 = vmul.f32 %v2423_v12, %v2420_v55 }
0x3441   :  { %2425 = vrot.lane.b32.xlu1 %v2424_v46, %s3978_s22 }
0x34b3   :  { %v2426_v52 = vpop.permute.xlu1 %2425 }
0x34b4   :  { %v2427_v10 = vadd.f32 %v2426_v52, %v2424_v46 }
0x34b6   :  { %3930 = vtanh.f32 %v2427_v10 }
0x34c0   :  { %v3931_v7 = vpop.eup %3930 }
0x34c1   :  { %v2429_v1 = vmul.f32 %v3931_v7, %v2422_v4 }
0x34c3   :  { %2431 = vst.msk [vmem:[#allocation3 + $0x30] sm:$0xff] %vm230_vm3, %v2429_v1  ;;  %v2430_v50 = vpack.c.bf16 %v2429_v1, %v2429_v1 }
0x34c5   :  { %3691 = vmatmul.mubr.msk.bf16.vlgmr.msra.gmra.mrb[76].mxu1 %vm230_vm3, %v2430_v50 }
0x34c6   :  { %3707 = vmatpush3.bf16.msra.mxu1 %v4829_v9  ;;  %3710 = vmatprep.mubr.msk.bf16.mxu1 %vm3975_vm0, %v3974_v0 }
0x34c7   :  { %3708 = vmatprep.subr.bf16.mxu1 %v3974_v0 }
0x34ca   :  { %3709 = vmatpush3.bf16.msra.mxu1 %v4836_v49  ;;  %v2505_v44 = vld [vmem:[#allocation3 + $0x30] sm:$0xff] }
0x34cb   :  { %3714 = vmatprep.subr.bf16.mxu1 %v3974_v0 }
0x34cd   :  { %3711 = vmatmul.mubr.bf16.vlgmr.msra.gmra.mrb[80].mxu1 %v3976_v6  ;;  %v4860_v6 = vld [vmem:[%s5037_s15] ss:$0 sm:$0xff] }
0x34ce   :  { %3715 = vmatpush3.bf16.msra.mxu1 %v4829_v9  ;;  %3718 = vmatprep.mubr.msk.bf16.mxu1 %vm3975_vm0, %v3974_v0  ;;  %v2576_v54 = vadd.f32 %v4860_v6, %v2575_v53  ;;  %v2579_v36 = vadd.f32 %v4860_v6, %v4818_v13 }
0x34cf   :  { %3716 = vmatprep.subr.bf16.mxu1 %v3974_v0 }
0x34d2   :  { %3717 = vmatpush3.bf16.msra.mxu1 %v4836_v49 }
0x34d3   :  { %3730 = vmatprep.subr.bf16.mxu1 %v3974_v0 }
0x3598   :  { %v2469_v57 = vpop.f32.mrb[76].mxu1 }
0x3599   :  { %v2475_v5 = vadd.f32 %v2469_v57, %v2007_v61  ;;  %v3692_v48 = vpop.f32.mrb[77].mxu1 }
0x359a   :  { %v2472_v58 = vpop.f32.mrb[78].mxu1 }
0x359b   :  { %v3693_v8 = vpop.f32.mrb[79].mxu1  ;;  %v2476_v39 = vmul.f32 %v4866_v15, %v2475_v5 }
0x359d   :  { %3932 = vtanh.f32 %v2476_v39 }
0x35a0   :  { %v2652_v14 = vpop.f32.mrb[80].mxu1 }
0x35a1   :  { %v2658_v63 = vadd.f32 %v2652_v14, %v2576_v54  ;;  %v3712_v2 = vpop.f32.mrb[81].mxu1  ;;  %v2584_v54 = vadd.f32 %v4814_v45, %v4860_v6 }
0x35a2   :  { %v2655_v22 = vpop.f32.mrb[82].mxu1 }
0x35a3   :  { %v2659_v20 = vmul.f32 %v4866_v15, %v2658_v63  ;;  %v3713_v16 = vpop.f32.mrb[83].mxu1 }
0x35a5   :  { %3934 = vtanh.f32 %v2659_v20 }
0x35a7   :  { %v3933_v47 = vpop.eup %3932 }
0x35a8   :  { %v2478_v43 = vmul.f32 %v4873_v40, %v3933_v47 }
0x35aa   :  { %v2479_v18 = vadd.f32 %v4879_v17, %v2478_v43 }
0x35af   :  { %v3935_v59 = vpop.eup %3934 }
0x35b0   :  { %v2661_v62 = vmul.f32 %v4873_v40, %v3935_v59 }
0x35b2   :  { %v2662_v42 = vadd.f32 %v4879_v17, %v2661_v62 }
0x35b4   :  { %2663 = vrot.lane.b32.xlu0 %v2662_v42, %s3977_s19 }
0x35b8   :  { %2480 = vrot.lane.b32.xlu0 %v2479_v18, %s3977_s19 }
0x3626   :  { %v2664_v19 = vpop.permute.xlu0 %2663 }
0x3627   :  { %v2665_v21 = vsel %vm92_vm2, 0.0, %v2664_v19 }
0x3628   :  { %v2666_v23 = vmul.f32 %v2665_v21, %v2662_v42 }
0x362a   :  { %2667 = vrot.lane.b32.xlu1 %v2666_v23, %s3978_s22  ;;  %v2481_v24 = vpop.permute.xlu0 %2480 }
0x362b   :  { %v2482_v25 = vsel %vm92_vm2, %v2427_v10, %v2481_v24 }
0x362c   :  { %v2483_v27 = vmul.f32 %v2482_v25, %v2479_v18 }
0x362e   :  { %2484 = vrot.lane.b32.xlu0 %v2483_v27, %s3978_s22 }
0x369c   :  { %v2668_v28 = vpop.permute.xlu1 %2667 }
0x369d   :  { %v2669_v29 = vadd.f32 %v2668_v28, %v2666_v23 }
0x369f   :  { %3936 = vtanh.f32 %v2669_v29 }
0x36a0   :  { %v2485_v30 = vpop.permute.xlu0 %2484 }
0x36a1   :  { %v2486_v31 = vadd.f32 %v2485_v30, %v2483_v27 }
0x36a3   :  { %3938 = vtanh.f32 %v2486_v31 }
0x36a9   :  { %v3937_v32 = vpop.eup %3936 }
0x36aa   :  { %v2671_v33 = vmul.f32 %v3937_v32, %v2664_v19 }
0x36ac   :  { %v2672_v34 = vpack.c.bf16 %v2671_v33, %v2671_v33 }
0x36ad   :  { %v3939_v11 = vpop.eup %3938 }
0x36ae   :  { %v2488_v41 = vmul.f32 %v3939_v11, %v2481_v24  ;;  %3719 = vmatmul.mubr.msk.bf16.vlgmr.msra.gmra.mrb[84].mxu1 %vm230_vm3, %v2672_v34  ;;  %v2587_v24 = vadd.f32 %v4816_v56, %v4860_v6 }
0x36af   :  { %3731 = vmatpush3.bf16.msra.mxu1 %v4829_v9  ;;  %3734 = vmatprep.mubr.msk.bf16.mxu1 %vm3975_vm0, %v3974_v0 }
0x36b0   :  { %2489 = vst.msk [vmem:[#allocation3 + $0x38] sm:$0xff] %vm230_vm3, %v2488_v41  ;;  %3732 = vmatprep.subr.bf16.mxu1 %v3974_v0 }
0x36b3   :  { %3733 = vmatpush3.bf16.msra.mxu1 %v4836_v49 }
0x36b4   :  { %3746 = vmatprep.subr.bf16.mxu1 %v3974_v0 }
0x36b7   :  { %v2506_v51 = vld [vmem:[#allocation3 + $0x38] sm:$0xff] }
0x36b8   :  { %v2510_v35 = vpack.c.bf16 %v2506_v51, %v2505_v44 }
0x36ba   :  { %3703 = vmatmul.mubr.msk.bf16.gmra.mrb[84].mxu0 %vm230_vm3, %v2510_v35 }
0x36bb   :  { %3726 = vmatprep.mubr.msk.bf16.mxu0 %vm3975_vm0, %v3974_v0 }
0x3781   :  { %v2710_v37 = vpop.f32.mrb[84].mxu1 }
0x3782   :  { %v2716_v38 = vadd.f32 %v2710_v37, %v2579_v36  ;;  %v3720_v53 = vpop.f32.mrb[85].mxu1 }
0x3783   :  { %v2713_v60 = vpop.f32.mrb[86].mxu1 }
0x3784   :  { %v2717_v3 = vmul.f32 %v4866_v15, %v2716_v38  ;;  %v3721_v55 = vpop.f32.mrb[87].mxu1 }
0x3786   :  { %3940 = vtanh.f32 %v2717_v3 }
0x378d   :  { %v4906_v4 = vpop.f32.mrb[84].mxu0 }
0x378e   :  { %v4908_v12 = vpop.f32.mrb[85].mxu0 }
0x378f   :  { %v4910_v46 = vpop.f32.mrb[86].mxu0  ;;  %v2592_v38 = vadd.f32 %v4860_v6, %v4908_v12 }
0x3790   :  { %v3941_v52 = vpop.eup %3940  ;;  %v4912_v10 = vpop.f32.mrb[87].mxu0 }
0x3791   :  { %v2719_v7 = vmul.f32 %v4873_v40, %v3941_v52 }
0x3793   :  { %v2720_v13 = vadd.f32 %v4879_v17, %v2719_v7 }
0x3795   :  { %2721 = vrot.lane.b32.xlu1 %v2720_v13, %s3977_s19 }
0x3807   :  { %v2722_v1 = vpop.permute.xlu1 %2721 }
0x3808   :  { %v2723_v50 = vsel %vm92_vm2, %v2669_v29, %v2722_v1 }
0x3809   :  { %v2724_v61 = vmul.f32 %v2723_v50, %v2720_v13 }
0x380b   :  { %2725 = vrot.lane.b32.xlu1 %v2724_v61, %s3978_s22 }
0x387d   :  { %v2726_v57 = vpop.permute.xlu1 %2725 }
0x387e   :  { %v2727_v5 = vadd.f32 %v2726_v57, %v2724_v61 }
0x3880   :  { %3942 = vtanh.f32 %v2727_v5 }
0x388a   :  { %v3943_v48 = vpop.eup %3942 }
0x388b   :  { %v2729_v58 = vmul.f32 %v3943_v48, %v2722_v1 }
0x388d   :  { %v2730_v8 = vpack.c.bf16 %v2729_v58, %v2729_v58 }
0x388f   :  { %3727 = vmatmul.mubr.msk.bf16.vlgmr.msra.gmra.mrb[88].mxu0 %vm230_vm3, %v2730_v8 }
0x3890   :  { %3739 = vmatpush3.bf16.msra.mxu0 %v4829_v9  ;;  %3742 = vmatprep.mubr.msk.bf16.mxu0 %vm3975_vm0, %v3974_v0 }
0x3891   :  { %3740 = vmatprep.subr.bf16.mxu0 %v3974_v0 }
0x3894   :  { %3741 = vmatpush3.bf16.msra.mxu0 %v4836_v49 }
0x3895   :  { %3754 = vmatprep.subr.bf16.mxu0 %v3974_v0 }
0x3962   :  { %v2768_v39 = vpop.f32.mrb[88].mxu0 }
0x3963   :  { %v2774_v14 = vadd.f32 %v2768_v39, %v2584_v54  ;;  %v3728_v63 = vpop.f32.mrb[89].mxu0  ;;  %v2595_v39 = vadd.f32 %v4860_v6, %v4912_v10 }
0x3964   :  { %v2771_v2 = vpop.f32.mrb[90].mxu0 }
0x3965   :  { %v2775_v22 = vmul.f32 %v4866_v15, %v2774_v14  ;;  %v3729_v20 = vpop.f32.mrb[91].mxu0 }
0x3967   :  { %3944 = vtanh.f32 %v2775_v22 }
0x3971   :  { %v3945_v16 = vpop.eup %3944 }
0x3972   :  { %v2777_v47 = vmul.f32 %v4873_v40, %v3945_v16 }
0x3974   :  { %v2778_v59 = vadd.f32 %v4879_v17, %v2777_v47 }
0x3976   :  { %2779 = vrot.lane.b32.xlu0 %v2778_v59, %s3977_s19 }
0x39e8   :  { %v2780_v62 = vpop.permute.xlu0 %2779 }
0x39e9   :  { %v2781_v42 = vsel %vm92_vm2, %v2727_v5, %v2780_v62 }
0x39ea   :  { %v2782_v45 = vmul.f32 %v2781_v42, %v2778_v59 }
0x39ec   :  { %2783 = vrot.lane.b32.xlu1 %v2782_v45, %s3978_s22 }
0x3a5e   :  { %v2784_v43 = vpop.permute.xlu1 %2783 }
0x3a5f   :  { %v2785_v18 = vadd.f32 %v2784_v43, %v2782_v45 }
0x3a61   :  { %3946 = vtanh.f32 %v2785_v18 }
0x3a6b   :  { %v3947_v19 = vpop.eup %3946 }
0x3a6c   :  { %v2787_v21 = vmul.f32 %v3947_v19, %v2780_v62 }
0x3a6e   :  { %v2788_v23 = vpack.c.bf16 %v2787_v21, %v2787_v21  ;;  %v2600_v21 = vadd.f32 %v4906_v4, %v4860_v6 }
0x3a70   :  { %3735 = vmatmul.mubr.msk.bf16.vlgmr.msra.gmra.mrb[88].mxu1 %vm230_vm3, %v2788_v23 }
0x3a71   :  { %3747 = vmatpush3.bf16.msra.mxu1 %v4829_v9  ;;  %3750 = vmatprep.mubr.msk.bf16.mxu1 %vm3975_vm0, %v3974_v0 }
0x3a72   :  { %3748 = vmatprep.subr.bf16.mxu1 %v3974_v0 }
0x3a75   :  { %3749 = vmatpush3.bf16.msra.mxu1 %v4836_v49 }
0x3a76   :  { %3762 = vmatprep.subr.bf16.mxu1 %v3974_v0 }
0x3b43   :  { %v2826_v25 = vpop.f32.mrb[88].mxu1 }
0x3b44   :  { %v2832_v27 = vadd.f32 %v2826_v25, %v2587_v24  ;;  %v3736_v28 = vpop.f32.mrb[89].mxu1 }
0x3b45   :  { %v2829_v29 = vpop.f32.mrb[90].mxu1 }
0x3b46   :  { %v2833_v30 = vmul.f32 %v4866_v15, %v2832_v27  ;;  %v3737_v31 = vpop.f32.mrb[91].mxu1 }
0x3b48   :  { %3948 = vtanh.f32 %v2833_v30 }
0x3b52   :  { %v3949_v32 = vpop.eup %3948 }
0x3b53   :  { %v2835_v33 = vmul.f32 %v4873_v40, %v3949_v32 }
0x3b55   :  { %v2836_v34 = vadd.f32 %v4879_v17, %v2835_v33 }
0x3b57   :  { %2837 = vrot.lane.b32.xlu0 %v2836_v34, %s3977_s19 }
0x3bc9   :  { %v2838_v11 = vpop.permute.xlu0 %2837 }
0x3bca   :  { %v2839_v41 = vsel %vm92_vm2, %v2785_v18, %v2838_v11 }
0x3bcb   :  { %v2840_v56 = vmul.f32 %v2839_v41, %v2836_v34 }
0x3bcd   :  { %2841 = vrot.lane.b32.xlu1 %v2840_v56, %s3978_s22 }
0x3c3f   :  { %v2842_v44 = vpop.permute.xlu1 %2841 }
0x3c40   :  { %v2843_v51 = vadd.f32 %v2842_v44, %v2840_v56 }
0x3c42   :  { %3950 = vtanh.f32 %v2843_v51 }
0x3c4c   :  { %v3951_v35 = vpop.eup %3950 }
0x3c4d   :  { %v2845_v36 = vmul.f32 %v3951_v35, %v2838_v11  ;;  %v2603_v35 = vadd.f32 %v4910_v46, %v4860_v6 }
0x3c4f   :  { %v2846_v37 = vpack.c.bf16 %v2845_v36, %v2845_v36 }
0x3c51   :  { %3743 = vmatmul.mubr.msk.bf16.vlgmr.msra.gmra.mrb[92].mxu0 %vm230_vm3, %v2846_v37 }
0x3c52   :  { %3755 = vmatpush3.bf16.msra.mxu0 %v4829_v9  ;;  %3758 = vmatprep.mubr.msk.bf16.mxu0 %vm3975_vm0, %v3974_v0 }
0x3c53   :  { %3756 = vmatprep.subr.bf16.mxu0 %v3974_v0 }
0x3c56   :  { %3757 = vmatpush3.bf16.msra.mxu0 %v4836_v49 }
0x3c57   :  { %3770 = vmatprep.subr.bf16.mxu0 %v3974_v0 }
0x3d24   :  { %v2884_v53 = vpop.f32.mrb[92].mxu0 }
0x3d25   :  { %v2890_v60 = vadd.f32 %v2884_v53, %v2592_v38  ;;  %v3744_v3 = vpop.f32.mrb[93].mxu0 }
0x3d26   :  { %v2887_v55 = vpop.f32.mrb[94].mxu0 }
0x3d27   :  { %v2891_v52 = vmul.f32 %v4866_v15, %v2890_v60  ;;  %v3745_v7 = vpop.f32.mrb[95].mxu0 }
0x3d29   :  { %3952 = vtanh.f32 %v2891_v52 }
0x3d33   :  { %v3953_v13 = vpop.eup %3952 }
0x3d34   :  { %v2893_v1 = vmul.f32 %v4873_v40, %v3953_v13  ;;  %v3806_v13 = vld [vmem:[%s5038_s16] sm:$0xff]  }
0x3d36   :  { %v2894_v50 = vadd.f32 %v4879_v17, %v2893_v1 }
0x3d38   :  { %2895 = vrot.lane.b32.xlu0 %v2894_v50, %s3977_s19 }
0x3daa   :  { %v2896_v61 = vpop.permute.xlu0 %2895 }
0x3dab   :  { %v2897_v57 = vsel %vm92_vm2, %v2843_v51, %v2896_v61 }
0x3dac   :  { %v2898_v12 = vmul.f32 %v2897_v57, %v2894_v50 }
0x3dae   :  { %2899 = vrot.lane.b32.xlu1 %v2898_v12, %s3978_s22 }
0x3e20   :  { %v2900_v5 = vpop.permute.xlu1 %2899 }
0x3e21   :  { %v2901_v48 = vadd.f32 %v2900_v5, %v2898_v12 }
0x3e23   :  { %3954 = vtanh.f32 %v2901_v48 }
0x3e2d   :  { %v3955_v58 = vpop.eup %3954 }
0x3e2e   :  { %v2903_v8 = vmul.f32 %v3955_v58, %v2896_v61 }
0x3e30   :  { %v2904_v54 = vpack.c.bf16 %v2903_v8, %v2903_v8 }
0x3e32   :  { %3751 = vmatmul.mubr.msk.bf16.vlgmr.msra.gmra.mrb[92].mxu1 %vm230_vm3, %v2904_v54 }
0x3e33   :  { %3763 = vmatpush3.bf16.msra.mxu1 %v4829_v9  ;;  %3766 = vmatprep.mubr.msk.bf16.mxu1 %vm3975_vm0, %v3974_v0 }
0x3e34   :  { %3764 = vmatprep.subr.bf16.mxu1 %v3974_v0 }
0x3e37   :  { %3765 = vmatpush3.bf16.msra.mxu1 %v4836_v49 }
0x3f05   :  { %v2942_v14 = vpop.f32.mrb[92].mxu1 }
0x3f06   :  { %v2948_v63 = vadd.f32 %v2942_v14, %v2595_v39  ;;  %v3752_v2 = vpop.f32.mrb[93].mxu1 }
0x3f07   :  { %v2945_v22 = vpop.f32.mrb[94].mxu1 }
0x3f08   :  { %v2949_v20 = vmul.f32 %v4866_v15, %v2948_v63  ;;  %v3753_v16 = vpop.f32.mrb[95].mxu1 }
0x3f0a   :  { %3956 = vtanh.f32 %v2949_v20 }
0x3f14   :  { %v3957_v47 = vpop.eup %3956 }
0x3f15   :  { %v2951_v9 = vmul.f32 %v4873_v40, %v3957_v47 }
0x3f17   :  { %v2952_v59 = vadd.f32 %v4879_v17, %v2951_v9 }
0x3f19   :  { %2953 = vrot.lane.b32.xlu0 %v2952_v59, %s3977_s19 }
0x3f8b   :  { %v2954_v62 = vpop.permute.xlu0 %2953 }
0x3f8c   :  { %v2955_v49 = vsel %vm92_vm2, %v2901_v48, %v2954_v62 }
0x3f8d   :  { %v2956_v10 = vmul.f32 %v2955_v49, %v2952_v59 }
0x3f8f   :  { %2957 = vrot.lane.b32.xlu1 %v2956_v10, %s3978_s22 }
0x4001   :  { %v2958_v42 = vpop.permute.xlu1 %2957 }
0x4002   :  { %v2959_v45 = vadd.f32 %v2958_v42, %v2956_v10 }
0x4004   :  { %3958 = vtanh.f32 %v2959_v45 }
0x400e   :  { %v3959_v43 = vpop.eup %3958 }
0x400f   :  { %v2961_v18 = vmul.f32 %v3959_v43, %v2954_v62 }
0x4011   :  { %v2962_v19 = vpack.c.bf16 %v2961_v18, %v2961_v18 }
0x4013   :  { %3759 = vmatmul.mubr.msk.bf16.vlgmr.msra.gmra.mrb[96].mxu0 %vm230_vm3, %v2962_v19 }
0x4014   :  { %3774 = vmatprep.mubr.msk.bf16.mxu0 %vm3975_vm0, %v3974_v0  ;;  %3771 = vmatpush3.bf16.msra.mxu0 %v3806_v13 }
0x4015   :  { %3772 = vmatprep.subr.bf16.mxu0 %v3974_v0 }
0x40e6   :  { %v3000_v23 = vpop.f32.mrb[96].mxu0 }
0x40e7   :  { %v3006_v24 = vadd.f32 %v3000_v23, %v2600_v21  ;;  %v3760_v25 = vpop.f32.mrb[97].mxu0 }
0x40e8   :  { %v3003_v27 = vpop.f32.mrb[98].mxu0 }
0x40e9   :  { %v3007_v28 = vmul.f32 %v4866_v15, %v3006_v24  ;;  %v3761_v29 = vpop.f32.mrb[99].mxu0 }
0x40eb   :  { %3960 = vtanh.f32 %v3007_v28 }
0x40f5   :  { %v3961_v30 = vpop.eup %3960 }
0x40f6   :  { %v3009_v31 = vmul.f32 %v4873_v40, %v3961_v30 }
0x40f8   :  { %v3010_v32 = vadd.f32 %v4879_v17, %v3009_v31 }
0x40fa   :  { %3011 = vrot.lane.b32.xlu0 %v3010_v32, %s3977_s19 }
0x416c   :  { %v3012_v33 = vpop.permute.xlu0 %3011 }
0x416d   :  { %v3013_v34 = vsel %vm92_vm2, %v2959_v45, %v3012_v33 }
0x416e   :  { %v3014_v4 = vmul.f32 %v3013_v34, %v3010_v32 }
0x4170   :  { %3015 = vrot.lane.b32.xlu1 %v3014_v4, %s3978_s22 }
0x41e2   :  { %v3016_v11 = vpop.permute.xlu1 %3015 }
0x41e3   :  { %v3017_v41 = vadd.f32 %v3016_v11, %v3014_v4 }
0x41e5   :  { %3962 = vtanh.f32 %v3017_v41 }
0x41ef   :  { %v3963_v56 = vpop.eup %3962 }
0x41f0   :  { %v3019_v44 = vmul.f32 %v3963_v56, %v3012_v33 }
0x41f2   :  { %v3020_v51 = vpack.c.bf16 %v3019_v44, %v3019_v44 }
0x41f4   :  { %3767 = vmatmul.mubr.msk.bf16.vlgmr.msra.gmra.mrb[96].mxu1 %vm230_vm3, %v3020_v51 }
0x42c7   :  { %v3058_v36 = vpop.f32.mrb[96].mxu1 }
0x42c8   :  { %v3064_v37 = vadd.f32 %v3058_v36, %v2603_v35  ;;  %v3768_v38 = vpop.f32.mrb[97].mxu1 }
0x42c9   :  { %v3061_v53 = vpop.f32.mrb[98].mxu1 }
0x42ca   :  { %v3065_v60 = vmul.f32 %v4866_v15, %v3064_v37  ;;  %v3769_v3 = vpop.f32.mrb[99].mxu1  ;;  %v3807_v15 = vld [vmem:[%s5038_s16 + $0x8] sm:$0xff]  }
0x42cb   :  { %3773 = vmatpush3.bf16.msra.mxu0 %v3807_v15 }
0x42cc   :  { %3964 = vtanh.f32 %v3065_v60 }
0x42d6   :  { %v3965_v55 = vpop.eup %3964 }
0x42d7   :  { %v3067_v52 = vmul.f32 %v4873_v40, %v3965_v55 }
0x42d9   :  { %v3068_v7 = vadd.f32 %v4879_v17, %v3067_v52 }
0x42db   :  { %3069 = vrot.lane.b32.xlu0 %v3068_v7, %s3977_s19 }
0x434d   :  { %v3070_v6 = vpop.permute.xlu0 %3069 }
0x434e   :  { %v3071_v46 = vsel %vm92_vm2, %v3017_v41, %v3070_v6 }
0x434f   :  { %v3072_v1 = vmul.f32 %v3071_v46, %v3068_v7 }
0x4351   :  { %3073 = vrot.lane.b32.xlu1 %v3072_v1, %s3978_s22 }
0x43c3   :  { %v3074_v40 = vpop.permute.xlu1 %3073 }
0x43c4   :  { %v3075_v17 = vadd.f32 %v3074_v40, %v3072_v1 }
0x43c6   :  { %3966 = vtanh.f32 %v3075_v17 }
0x43d0   :  { %v3967_v50 = vpop.eup %3966 }
0x43d1   :  { %v3077_v61 = vmul.f32 %v3967_v50, %v3070_v6 }
0x43d3   :  { %v3078_v57 = vpack.c.bf16 %v3077_v61, %v3077_v61 }
0x43d5   :  { %3775 = vmatmul.mubr.msk.bf16.vlgmr.msra.gmra.mrb[100].mxu0 %vm230_vm3, %v3078_v57 }
0x44a8   :  { %v3139_v0 = vpop.f32.mrb[100].mxu0 }
0x44a9   :  { %v3140_v12 = vadd.f32 %v3236_v26, %v3139_v0  ;;  %v3776_v5 = vpop.f32.mrb[101].mxu0 }
0x44aa   :  { %v3142_v48 = vpop.f32.mrb[102].mxu0 }
0x44ab   :  { %3145 = vst [vmem:[%s5040_s21] sm:$0xff] %v3140_v12  ;;  %v3777_v58 = vpop.f32.mrb[103].mxu0 }

</bundles_post_ra>
